<compile_context>
chip_gen: v7x
topology: tpu7x:2x2x1
jax: 0.10.0
libtpu: 0.0.40
codegen_flags: <defaults>
</compile_context>

<pallas_src>
import functools

import jax
import jax.numpy as jnp
from jax.experimental import pallas as pl
from jax.experimental.pallas import tpu as pltpu


# Below this many rows a pallas_call launch is pure overhead -> plain XLA.
_PALLAS_MIN_ROWS = 256


def _round_up(x, m):
    return ((x + m - 1) // m) * m


def _fused_mlp_kernel(x_ref, add_ref, w1_ref, w2_ref, b2_ref, o_ref):
    """Fused (x @ W1core + add) -> SiLU -> (@ W2 + b2) -> SiLU on one row tile.

    `add_ref` already contains the gathered condition contribution plus b1.
    Matmuls accumulate in f32 on the MXU; activations stay in f32 (EUP/VPU).
    """
    h = jnp.dot(x_ref[...], w1_ref[...], preferred_element_type=jnp.float32)
    h = h + add_ref[...].astype(jnp.float32)
    h = h * jax.nn.sigmoid(h)                                   # SiLU (f32)
    o = jnp.dot(h.astype(w2_ref.dtype), w2_ref[...],
                preferred_element_type=jnp.float32)
    o = o + b2_ref[...].astype(jnp.float32)
    o = o * jax.nn.sigmoid(o)                                   # SiLU (f32)
    o_ref[...] = o.astype(o_ref.dtype)


def fused_mlp_pallas(x, add, w1_core, w2, b2, *, tm=1024):
    """x: [N, d_core]; add: [N, d_hid] (cond@W1_cond + b1, gathered per row);
    w1_core: [d_core, d_hid]; w2: [d_hid, d_out]; b2: [d_out]."""
    n, d_in = x.shape
    d_hid = w1_core.shape[1]
    d_out = w2.shape[1]

    # Tile: multiple of 16 (covers f32/bf16 sublane packing); pad rows so the
    # grid divides evenly instead of collapsing to one giant block.
    tm = min(tm, _round_up(n, 16))
    n_pad = _round_up(n, tm)
    if n_pad != n:
        x = jnp.pad(x, ((0, n_pad - n), (0, 0)))
        add = jnp.pad(add, ((0, n_pad - n), (0, 0)))
    b2 = b2.reshape(1, d_out)

    out = pl.pallas_call(
        _fused_mlp_kernel,
        out_shape=jax.ShapeDtypeStruct((n_pad, d_out), x.dtype),
        grid_spec=pltpu.PrefetchScalarGridSpec(
            num_scalar_prefetch=0,
            grid=(n_pad // tm,),
            in_specs=[
                pl.BlockSpec((tm, d_in), lambda i: (i, 0)),       # x row tile
                pl.BlockSpec((tm, d_hid), lambda i: (i, 0)),      # add row tile
                pl.BlockSpec((d_in, d_hid), lambda i: (0, 0)),    # W1core (resident)
                pl.BlockSpec((d_hid, d_out), lambda i: (0, 0)),   # W2     (resident)
                pl.BlockSpec((1, d_out), lambda i: (0, 0)),       # b2
            ],
            out_specs=pl.BlockSpec((tm, d_out), lambda i: (i, 0)),
        ),
        compiler_params=pltpu.CompilerParams(
            dimension_semantics=("parallel",)),
    )(x, add, w1_core, w2, b2)

    return out[:n] if n_pad != n else out


def _mlp_forward(x_core, add, w1_core, w2, b2, *, tm=1024):
    """Dispatch: Pallas kernel for large row counts, plain XLA for tiny ones."""
    if x_core.shape[0] >= _PALLAS_MIN_ROWS:
        return fused_mlp_pallas(x_core, add, w1_core, w2, b2, tm=tm)
    h = jax.nn.silu(x_core @ w1_core + add)
    return jax.nn.silu(h @ w2 + b2)


def init_params(key, core_node_vector_dim, core_graph_vector_dim, condition_dim,
                dtype=jnp.float32):
    """Deterministic synthetic parameters matching the module's layer shapes."""
    ks = jax.random.split(key, 8)

    def lin(kw, kb, d_in, d_out):
        scale = 1.0 / jnp.sqrt(jnp.float32(d_in))
        w = jax.random.uniform(kw, (d_in, d_out), dtype, -scale, scale)
        b = jax.random.uniform(kb, (d_out,), dtype, -scale, scale)
        return w, b

    n_in = core_node_vector_dim + condition_dim
    g_in = core_graph_vector_dim + condition_dim
    nw1, nb1 = lin(ks[0], ks[1], n_in, core_node_vector_dim)
    nw2, nb2 = lin(ks[2], ks[3], core_node_vector_dim, core_node_vector_dim)
    gw1, gb1 = lin(ks[4], ks[5], g_in, core_graph_vector_dim)
    gw2, gb2 = lin(ks[6], ks[7], core_graph_vector_dim, core_graph_vector_dim)
    return {
        "node_mlp": (nw1, nb1, nw2, nb2),
        "graph_mlp": (gw1, gb1, gw2, gb2),
    }


def condition_embedding_forward(params, h_core, Z_core, condition,
                                node2graph=None, *, tm=1024):
    """Mirrors ConditionEmbeddingModel.forward (dropout=0 / eval mode)."""
    nw1, nb1, nw2, nb2 = params["node_mlp"]
    gw1, gb1, gw2, gb2 = params["graph_mlp"]
    d_node = h_core.shape[1]
    d_graph = Z_core.shape[1]

    # ---- node path: concat-free first layer ------------------------------
    nw1_core, nw1_cond = nw1[:d_node], nw1[d_node:]
    # tiny [N_graphs, d_node] pre-activation contribution of the condition
    cond_term_node = condition @ nw1_cond + nb1
    if node2graph is not None:
        add_node = jnp.take(cond_term_node, node2graph, axis=0)
    else:
        add_node = jnp.tile(cond_term_node, (h_core.shape[0], 1))
    h_out = _mlp_forward(h_core, add_node, nw1_core, nw2, nb2, tm=tm)

    # ---- graph path: same math, tiny row count ---------------------------
    gw1_core, gw1_cond = gw1[:d_graph], gw1[d_graph:]
    add_graph = condition @ gw1_cond + gb1
    z_out = _mlp_forward(Z_core, add_graph, gw1_core, gw2, gb2, tm=tm)

    return h_out, z_out


def _reference_forward(params, h_core, Z_core, condition, node2graph):
    """Pure-JAX reference (explicit concat, as in the PyTorch module)."""
    def mlp(x, w1, b1, w2, b2):
        h = jax.nn.silu(x @ w1 + b1)
        return jax.nn.silu(h @ w2 + b2)
    h_cond = jnp.take(condition, node2graph, axis=0)
    h_in = jnp.concatenate([h_core, h_cond], axis=-1)
    z_in = jnp.concatenate([Z_core, condition], axis=-1)
    return mlp(h_in, *params["node_mlp"]), mlp(z_in, *params["graph_mlp"])


if __name__ == "__main__":
    core_node_vector_dim = 32
    core_graph_vector_dim = 32
    condition_dim = 16
    # non-multiple-of-tile node count -> exercises padding + multi-step grid
    n_nodes, n_graphs = 2500, 8

    key = jax.random.PRNGKey(0)
    k_param, k_h, k_z, k_c, k_n2g = jax.random.split(key, 5)

    params = init_params(k_param, core_node_vector_dim, core_graph_vector_dim,
                         condition_dim)

    h_core = jax.random.normal(k_h, (n_nodes, core_node_vector_dim), jnp.float32)
    Z_core = jax.random.normal(k_z, (n_graphs, core_graph_vector_dim), jnp.float32)
    condition = jax.random.normal(k_c, (n_graphs, condition_dim), jnp.float32)
    node2graph = jax.random.randint(k_n2g, (n_nodes,), 0, n_graphs, jnp.int32)

    fwd = jax.jit(functools.partial(condition_embedding_forward, params))
    h_out, z_out = fwd(h_core, Z_core, condition, node2graph)
    jax.block_until_ready((h_out, z_out))

    # correctness check against pure-JAX reference
    h_ref, z_ref = _reference_forward(params, h_core, Z_core, condition,
                                      node2graph)
    assert h_out.shape == (n_nodes, core_node_vector_dim)
    assert z_out.shape == (n_graphs, core_graph_vector_dim)
    assert jnp.allclose(h_out, h_ref, rtol=1e-3, atol=1e-3), \
        float(jnp.max(jnp.abs(h_out - h_ref)))
    assert jnp.allclose(z_out, z_ref, rtol=1e-3, atol=1e-3), \
        float(jnp.max(jnp.abs(z_out - z_ref)))

    print("KERNEL_OK")
</pallas_src>

<mosaic_0001>
module attributes {stable_mosaic.version = 11 : i64} {
  func.func @_fused_mlp_kernel(%arg0: i32, %arg1: memref<1024x32xf32, #tpu.memory_space<vmem>>, %arg2: memref<1024x32xf32, #tpu.memory_space<vmem>>, %arg3: memref<32x32xf32, #tpu.memory_space<vmem>>, %arg4: memref<32x32xf32, #tpu.memory_space<vmem>>, %arg5: memref<1x32xf32, #tpu.memory_space<vmem>>, %arg6: memref<1024x32xf32, #tpu.memory_space<vmem>>) attributes {dimension_semantics = [#tpu.dimension_semantics<parallel>], iteration_bounds = array<i64: 3>, scalar_prefetch = 0 : i64, scratch_operands = 0 : i64, tpu.core_type = #tpu.core_type<tc>, window_params = [{transform_indices = @transform_0, window_bounds = array<i64: 1024, 32>}, {transform_indices = @transform_1, window_bounds = array<i64: 1024, 32>}, {pipeline_mode = #tpu.pipeline_mode<synchronous>, transform_indices = @transform_2, window_bounds = array<i64: 32, 32>}, {pipeline_mode = #tpu.pipeline_mode<synchronous>, transform_indices = @transform_3, window_bounds = array<i64: 32, 32>}, {pipeline_mode = #tpu.pipeline_mode<synchronous>, transform_indices = @transform_4, window_bounds = array<i64: 1, 32>}, {transform_indices = @transform_5, window_bounds = array<i64: 1024, 32>}]} {
    %c0 = arith.constant 0 : index
    %c0_0 = arith.constant 0 : index
    %0 = vector.load %arg1[%c0, %c0_0] : memref<1024x32xf32, #tpu.memory_space<vmem>>, vector<1024x32xf32>
    %c0_1 = arith.constant 0 : index
    %c0_2 = arith.constant 0 : index
    %1 = vector.load %arg3[%c0_1, %c0_2] : memref<32x32xf32, #tpu.memory_space<vmem>>, vector<32x32xf32>
    %cst = arith.constant dense<0.000000e+00> : vector<1024x32xf32>
    %2 = tpu.matmul %0, %1, %cst {dimension_numbers = #tpu.dot_dimension_numbers<[1], [0], [0], [1], [0, 0, 1, 1], [], []>} : vector<1024x32xf32>, vector<32x32xf32>, vector<1024x32xf32> -> vector<1024x32xf32>
    %c0_3 = arith.constant 0 : index
    %c0_4 = arith.constant 0 : index
    %3 = vector.load %arg2[%c0_3, %c0_4] : memref<1024x32xf32, #tpu.memory_space<vmem>>, vector<1024x32xf32>
    %4 = arith.addf %2, %3 : vector<1024x32xf32>
    %5 = arith.negf %4 : vector<1024x32xf32>
    %6 = math.exp %5 : vector<1024x32xf32>
    %cst_5 = arith.constant 1.000000e+00 : f32
    %7 = vector.broadcast %cst_5 : f32 to vector<1024x32xf32>
    %8 = arith.addf %7, %6 : vector<1024x32xf32>
    %9 = arith.divf %7, %8 : vector<1024x32xf32>
    %10 = arith.mulf %4, %9 : vector<1024x32xf32>
    %c0_6 = arith.constant 0 : index
    %c0_7 = arith.constant 0 : index
    %11 = vector.load %arg4[%c0_6, %c0_7] : memref<32x32xf32, #tpu.memory_space<vmem>>, vector<32x32xf32>
    %cst_8 = arith.constant dense<0.000000e+00> : vector<1024x32xf32>
    %12 = tpu.matmul %10, %11, %cst_8 {dimension_numbers = #tpu.dot_dimension_numbers<[1], [0], [0], [1], [0, 0, 1, 1], [], []>} : vector<1024x32xf32>, vector<32x32xf32>, vector<1024x32xf32> -> vector<1024x32xf32>
    %c0_9 = arith.constant 0 : index
    %c0_10 = arith.constant 0 : index
    %13 = vector.load %arg5[%c0_9, %c0_10] : memref<1x32xf32, #tpu.memory_space<vmem>>, vector<1x32xf32>
    %14 = vector.broadcast %13 : vector<1x32xf32> to vector<1024x32xf32>
    %15 = arith.addf %12, %14 : vector<1024x32xf32>
    %16 = arith.negf %15 : vector<1024x32xf32>
    %17 = math.exp %16 : vector<1024x32xf32>
    %cst_11 = arith.constant 1.000000e+00 : f32
    %18 = vector.broadcast %cst_11 : f32 to vector<1024x32xf32>
    %19 = arith.addf %18, %17 : vector<1024x32xf32>
    %20 = arith.divf %18, %19 : vector<1024x32xf32>
    %21 = arith.mulf %15, %20 : vector<1024x32xf32>
    %c0_12 = arith.constant 0 : index
    %c0_13 = arith.constant 0 : index
    %22 = vector.load %arg6[%c0_12, %c0_13] : memref<1024x32xf32, #tpu.memory_space<vmem>>, vector<1024x32xf32>
    tpu.vector_store %arg6[%c0_12, %c0_13], %21 {strides = array<i32>} : memref<1024x32xf32, #tpu.memory_space<vmem>>, vector<1024x32xf32>,
    return
  }
  func.func @transform_0(%arg0: i32) -> (i32, i32) {
    %c0_i32 = arith.constant 0 : i32
    %c0_i32_0 = arith.constant 0 : i32
    return %arg0, %c0_i32 : i32, i32
  }
  func.func @transform_1(%arg0: i32) -> (i32, i32) {
    %c0_i32 = arith.constant 0 : i32
    %c0_i32_0 = arith.constant 0 : i32
    return %arg0, %c0_i32 : i32, i32
  }
  func.func @transform_2(%arg0: i32) -> (i32, i32) {
    %c0_i32 = arith.constant 0 : i32
    %c0_i32_0 = arith.constant 0 : i32
    %c0_i32_1 = arith.constant 0 : i32
    return %c0_i32, %c0_i32_0 : i32, i32
  }
  func.func @transform_3(%arg0: i32) -> (i32, i32) {
    %c0_i32 = arith.constant 0 : i32
    %c0_i32_0 = arith.constant 0 : i32
    %c0_i32_1 = arith.constant 0 : i32
    return %c0_i32, %c0_i32_0 : i32, i32
  }
  func.func @transform_4(%arg0: i32) -> (i32, i32) {
    %c0_i32 = arith.constant 0 : i32
    %c0_i32_0 = arith.constant 0 : i32
    %c0_i32_1 = arith.constant 0 : i32
    return %c0_i32, %c0_i32_0 : i32, i32
  }
  func.func @transform_5(%arg0: i32) -> (i32, i32) {
    %c0_i32 = arith.constant 0 : i32
    %c0_i32_0 = arith.constant 0 : i32
    return %arg0, %c0_i32 : i32, i32
  }
}

</mosaic_0001>

<bundles_post_ra>
// kernel: condition_embedding_forward.1
= control target key start
LH: loop header
LB: loop body
LE: loop exit
PB: predicated region body
PF: predicated region fallthrough
CT: control target
= control target key end

     0   :  { %s6966_s18 = smov 0   ;;  %s8956_s0 = inlined_call_operand.vmem [shape: f32[3072,32], index: 0, kind: input, shape index: {}]   ;;  %s8957_s1 = inlined_call_operand.vmem [shape: f32[3072,32], index: 1, kind: input, shape index: {}]   ;;  %s8958_s2 = inlined_call_operand.vmem [shape: f32[32,32], index: 2, kind: input, shape index: {}]   ;;  %s8959_s3 = inlined_call_operand.vmem [shape: f32[32,32], index: 3, kind: input, shape index: {}]   ;;  %s8960_s4 = inlined_call_operand.vmem [shape: f32[1,32], index: 4, kind: input, shape index: {}]   ;;  %s8961_s5 = inlined_call_operand.vmem [shape: f32[3072,32], index: 5, kind: output, shape index: {}]  }
   0x1 LB: > { %s4688_s19 = sadd.s32 4294967295, %s6934_s18   ;;  %p4692_p0 = scmp.ge.s32.totalorder %s6934_s18, 1  ;;  %s6934_s18 = sphi %s6966_s18, %s15_s18  }
   0x2   : > { %p199_p1 = scmp.lt.s32.totalorder %s6934_s18, 4 }
   0x4   : > { %p200_p2 = pnand %p4692_p0, %p199_p1 }
   0x5   : > { %v378_v0 = vld [vmem:[%s8958_s2] sm:$0xff] (!%p200_p2)  ;;  %v379_v1 = vld [vmem:[%s8958_s2 + $0x8] sm:$0xff] (!%p200_p2)  ;;  %v380_v2 = vld [vmem:[%s8958_s2 + $0x10] sm:$0xff] (!%p200_p2)  ;;  %s4693_s26 = sshll.u32 (!%p200_p2), %s4688_s19, 7  ;;  %vm510_vm0 = vcmask (!%p200_p2), 261120  }
   0x6   : > { %203 = sbr.rel (%p200_p2) target bundleno = 772 (0x304), region = 40  ;;  %v5878_v3 = vpack.c.bf16 (!%p200_p2), %v379_v1, %v378_v0  ;;  %v381_v4 = vld [vmem:[%s8958_s2 + $0x18] sm:$0xff] (!%p200_p2)  ;;  %p233_p3 = scmp.lt.s32.totalorder (!%p200_p2), %s4693_s26, 383  ;;  %v2496_v63 = vld [vmem:[%s8959_s3] sm:$0xff] (!%p200_p2)  ;;  %v2497_v0 = vld [vmem:[%s8959_s3 + $0x8] sm:$0xff] (!%p200_p2) }
   0x7   : > { %v5882_v5 = vpack.c.bf16 (!%p200_p2), %v381_v4, %v380_v2  ;;  %v5886_v1 = vpack.c.bf16 (!%p200_p2), %v2497_v0, %v2496_v63  ;;  %v2498_v4 = vld [vmem:[%s8959_s3 + $0x10] sm:$0xff] (!%p200_p2) }
   0x8   : > { %5879 = vmatprep.subr.bf16.mxu0 (!%p200_p2), %v5878_v3 }
   0x9   : > { %5881 = vmatpush3.bf16.msra.mxu0 (!%p200_p2), %v5878_v3  ;;  %5887 = vmatprep.subr.bf16.mxu1 (!%p200_p2), %v5886_v1 }
   0xa   : > { %5883 = vmatprep.subr.bf16.mxu0 (!%p200_p2), %v5882_v5  ;;  %5889 = vmatpush3.bf16.msra.mxu1 (!%p200_p2), %v5886_v1 }
   0xd   : > { %s8963_s26 = smov (!%p233_p3, %s4693_s26), 383  ;;  %5885 = vmatpush3.bf16.msra.mxu0 %v5882_v5  ;;  %v2499_v5 = vld [vmem:[%s8959_s3 + $0x18] sm:$0xff] }
   0xe   : > { %s6986_s29 = sshll.u32 %s8963_s26, 3 }
   0xf   : > { %s6992_s7 = scalar_lea.vmem %s8956_s0, %s6986_s29  ;;  %s7221_s19 = scalar_lea.vmem %s8957_s1, %s6986_s29 }
  0x10   : > { %v250_v6 = vld [vmem:[%s6992_s7] sm:$0xff]  ;;  %v251_v7 = vld [vmem:[%s6992_s7 + $0x8] sm:$0xff]  ;;  %v252_v8 = vld [vmem:[%s6992_s7 + $0x10] sm:$0xff]  ;;  %s8074_s24 = scalar_lea.vmem %s8961_s5, %s6986_s29 }
  0x11   : > { %5486 = vmatprep.mubr.msk.f32.mxu0 %vm510_vm0, %v250_v6  ;;  %v253_v9 = vld [vmem:[%s6992_s7 + $0x18] sm:$0xff]  ;;  %v254_v10 = vld [vmem:[%s6992_s7 + $0x20] sm:$0xff]  ;;  %v255_v11 = vld [vmem:[%s6992_s7 + $0x28] sm:$0xff]  ;;  %v5890_v6 = vpack.c.bf16 %v2499_v5, %v2498_v4 }
  0x12   : > { %5487 = vmatmul.mubr.msk.f32.vlgmr.msra.gmra.mrb[0].mxu0 %vm510_vm0, %v251_v7  ;;  %v256_v12 = vld [vmem:[%s6992_s7 + $0x30] sm:$0xff]  ;;  %v257_v13 = vld [vmem:[%s6992_s7 + $0x38] sm:$0xff]  ;;  %v258_v14 = vld [vmem:[%s6992_s7 + $0x40] sm:$0xff] }
  0x13   : > { %5489 = vmatprep.mubr.msk.f32.mxu0 %vm510_vm0, %v252_v8  ;;  %v259_v15 = vld [vmem:[%s6992_s7 + $0x48] sm:$0xff]  ;;  %v260_v16 = vld [vmem:[%s6992_s7 + $0x50] sm:$0xff]  ;;  %v261_v17 = vld [vmem:[%s6992_s7 + $0x58] sm:$0xff]  ;;  %5891 = vmatprep.subr.bf16.mxu1 %v5890_v6 }
  0x14   : > { %v262_v18 = vld [vmem:[%s6992_s7 + $0x60] sm:$0xff]  ;;  %v263_v19 = vld [vmem:[%s6992_s7 + $0x68] sm:$0xff]  ;;  %v264_v20 = vld [vmem:[%s6992_s7 + $0x70] sm:$0xff]  ;;  %5893 = vmatpush3.bf16.msra.mxu1 %v5890_v6 }
  0x15   : > { %v265_v21 = vld [vmem:[%s6992_s7 + $0x78] sm:$0xff]  ;;  %v266_v22 = vld [vmem:[%s6992_s7 + $0x80] sm:$0xff]  ;;  %v267_v23 = vld [vmem:[%s6992_s7 + $0x88] sm:$0xff] }
  0x16   : > { %5490 = vmatmul.mubr.msk.f32.gmra.mrb[2].mxu0 %vm510_vm0, %v253_v9  ;;  %v268_v24 = vld [vmem:[%s6992_s7 + $0x90] sm:$0xff]  ;;  %v269_v25 = vld [vmem:[%s6992_s7 + $0x98] sm:$0xff]  ;;  %v270_v26 = vld [vmem:[%s6992_s7 + $0xa0] sm:$0xff] }
  0x17   : > { %5492 = vmatprep.mubr.msk.f32.mxu0 %vm510_vm0, %v254_v10  ;;  %v271_v27 = vld [vmem:[%s6992_s7 + $0xa8] sm:$0xff]  ;;  %v272_v28 = vld [vmem:[%s6992_s7 + $0xb0] sm:$0xff]  ;;  %v273_v29 = vld [vmem:[%s6992_s7 + $0xb8] sm:$0xff] }
  0x18   : > { %v274_v30 = vld [vmem:[%s6992_s7 + $0xc0] sm:$0xff]  ;;  %v275_v31 = vld [vmem:[%s6992_s7 + $0xc8] sm:$0xff]  ;;  %v276_v32 = vld [vmem:[%s6992_s7 + $0xd0] sm:$0xff] }
  0x19   : > { %v277_v33 = vld [vmem:[%s6992_s7 + $0xd8] sm:$0xff]  ;;  %v278_v34 = vld [vmem:[%s6992_s7 + $0xe0] sm:$0xff]  ;;  %v279_v35 = vld [vmem:[%s6992_s7 + $0xe8] sm:$0xff] }
  0x1a   : > { %5493 = vmatmul.mubr.msk.f32.gmra.mrb[4].mxu0 %vm510_vm0, %v255_v11  ;;  %v280_v36 = vld [vmem:[%s6992_s7 + $0xf0] sm:$0xff]  ;;  %v281_v37 = vld [vmem:[%s6992_s7 + $0xf8] sm:$0xff]  ;;  %v282_v38 = vld [vmem:[%s6992_s7 + $0x100] sm:$0xff] }
  0x1b   : > { %5495 = vmatprep.mubr.msk.f32.mxu0 %vm510_vm0, %v256_v12  ;;  %v283_v39 = vld [vmem:[%s6992_s7 + $0x108] sm:$0xff]  ;;  %v284_v40 = vld [vmem:[%s6992_s7 + $0x110] sm:$0xff]  ;;  %v285_v41 = vld [vmem:[%s6992_s7 + $0x118] sm:$0xff] }
  0x1c   : > { %v286_v42 = vld [vmem:[%s6992_s7 + $0x120] sm:$0xff]  ;;  %v287_v43 = vld [vmem:[%s6992_s7 + $0x128] sm:$0xff]  ;;  %v288_v44 = vld [vmem:[%s6992_s7 + $0x130] sm:$0xff] }
  0x1d   : > { %v289_v45 = vld [vmem:[%s6992_s7 + $0x138] sm:$0xff]  ;;  %v290_v46 = vld [vmem:[%s6992_s7 + $0x140] sm:$0xff]  ;;  %v291_v47 = vld [vmem:[%s6992_s7 + $0x148] sm:$0xff] }
  0x1e   : > { %5496 = vmatmul.mubr.msk.f32.gmra.mrb[6].mxu0 %vm510_vm0, %v257_v13  ;;  %v292_v48 = vld [vmem:[%s6992_s7 + $0x150] sm:$0xff]  ;;  %v293_v49 = vld [vmem:[%s6992_s7 + $0x158] sm:$0xff]  ;;  %v294_v50 = vld [vmem:[%s6992_s7 + $0x160] sm:$0xff] }
  0x1f   : > { %5498 = vmatprep.mubr.msk.f32.mxu0 %vm510_vm0, %v258_v14  ;;  %v295_v51 = vld [vmem:[%s6992_s7 + $0x168] sm:$0xff]  ;;  %v296_v52 = vld [vmem:[%s6992_s7 + $0x170] sm:$0xff]  ;;  %v297_v53 = vld [vmem:[%s6992_s7 + $0x178] sm:$0xff] }
  0x20   : > { %v298_v54 = vld [vmem:[%s6992_s7 + $0x180] sm:$0xff]  ;;  %v299_v55 = vld [vmem:[%s6992_s7 + $0x188] sm:$0xff]  ;;  %v300_v56 = vld [vmem:[%s6992_s7 + $0x190] sm:$0xff] }
  0x21   : > { %v301_v57 = vld [vmem:[%s6992_s7 + $0x198] sm:$0xff]  ;;  %v302_v58 = vld [vmem:[%s6992_s7 + $0x1a0] sm:$0xff]  ;;  %v303_v59 = vld [vmem:[%s6992_s7 + $0x1a8] sm:$0xff] }
  0x22   : > { %5499 = vmatmul.mubr.msk.f32.gmra.mrb[8].mxu0 %vm510_vm0, %v259_v15  ;;  %v304_v60 = vld [vmem:[%s6992_s7 + $0x1b0] sm:$0xff]  ;;  %v305_v61 = vld [vmem:[%s6992_s7 + $0x1b8] sm:$0xff]  ;;  %v306_v62 = vld [vmem:[%s6992_s7 + $0x1c0] sm:$0xff] }
  0x23   : > { %5501 = vmatprep.mubr.msk.f32.mxu0 %vm510_vm0, %v260_v16  ;;  %v307_v2 = vld [vmem:[%s6992_s7 + $0x1c8] sm:$0xff]  ;;  %v308_v3 = vld [vmem:[%s6992_s7 + $0x1d0] sm:$0xff]  ;;  %v309_v7 = vld [vmem:[%s6992_s7 + $0x1d8] sm:$0xff] }
  0x24   : > { %v310_v8 = vld [vmem:[%s6992_s7 + $0x1e0] sm:$0xff]  ;;  %v311_v9 = vld [vmem:[%s6992_s7 + $0x1e8] sm:$0xff]  ;;  %v312_v10 = vld [vmem:[%s6992_s7 + $0x1f0] sm:$0xff] }
  0x25   : > { %v313_v11 = vld [vmem:[%s6992_s7 + $0x1f8] sm:$0xff]  ;;  %v314_v12 = vld [vmem:[%s6992_s7 + $0x200] sm:$0xff]  ;;  %v315_v13 = vld [vmem:[%s6992_s7 + $0x208] sm:$0xff] }
  0x26   : > { %5502 = vmatmul.mubr.msk.f32.gmra.mrb[10].mxu0 %vm510_vm0, %v261_v17  ;;  %v316_v14 = vld [vmem:[%s6992_s7 + $0x210] sm:$0xff]  ;;  %v317_v15 = vld [vmem:[%s6992_s7 + $0x218] sm:$0xff]  ;;  %v318_v16 = vld [vmem:[%s6992_s7 + $0x220] sm:$0xff] }
  0x27   : > { %5504 = vmatprep.mubr.msk.f32.mxu0 %vm510_vm0, %v262_v18  ;;  %v319_v17 = vld [vmem:[%s6992_s7 + $0x228] sm:$0xff]  ;;  %v320_v18 = vld [vmem:[%s6992_s7 + $0x230] sm:$0xff]  ;;  %v385_v63 = vld [vmem:[%s7221_s19 + $0x18] sm:$0xff] }
  0x28   : > { %v359_v0 = vld [vmem:[%s6992_s7 + $0x368] sm:$0xff] }
  0x2a   : > { %5505 = vmatmul.mubr.msk.f32.gmra.mrb[12].mxu0 %vm510_vm0, %v263_v19  ;;  %v321_v19 = vld [vmem:[%s6992_s7 + $0x238] sm:$0xff] }
  0x2b   : > { %5507 = vmatprep.mubr.msk.f32.mxu0 %vm510_vm0, %v264_v20  ;;  %v322_v20 = vld [vmem:[%s6992_s7 + $0x240] sm:$0xff] }
  0x2e   : > { %5508 = vmatmul.mubr.msk.f32.gmra.mrb[14].mxu0 %vm510_vm0, %v265_v21  ;;  %v323_v21 = vld [vmem:[%s6992_s7 + $0x248] sm:$0xff] }
  0x2f   : > { %5510 = vmatprep.mubr.msk.f32.mxu0 %vm510_vm0, %v266_v22  ;;  %v324_v22 = vld [vmem:[%s6992_s7 + $0x250] sm:$0xff] }
  0x32   : > { %5511 = vmatmul.mubr.msk.f32.gmra.mrb[16].mxu0 %vm510_vm0, %v267_v23  ;;  %v325_v23 = vld [vmem:[%s6992_s7 + $0x258] sm:$0xff] }
  0x33   : > { %5513 = vmatprep.mubr.msk.f32.mxu0 %vm510_vm0, %v268_v24  ;;  %v326_v24 = vld [vmem:[%s6992_s7 + $0x260] sm:$0xff] }
  0x36   : > { %5514 = vmatmul.mubr.msk.f32.gmra.mrb[18].mxu0 %vm510_vm0, %v269_v25  ;;  %v327_v25 = vld [vmem:[%s6992_s7 + $0x268] sm:$0xff] }
  0x37   : > { %5516 = vmatprep.mubr.msk.f32.mxu0 %vm510_vm0, %v270_v26  ;;  %v328_v26 = vld [vmem:[%s6992_s7 + $0x270] sm:$0xff] }
  0x3a   : > { %5517 = vmatmul.mubr.msk.f32.gmra.mrb[20].mxu0 %vm510_vm0, %v271_v27  ;;  %v329_v27 = vld [vmem:[%s6992_s7 + $0x278] sm:$0xff] }
  0x3b   : > { %5519 = vmatprep.mubr.msk.f32.mxu0 %vm510_vm0, %v272_v28  ;;  %v330_v28 = vld [vmem:[%s6992_s7 + $0x280] sm:$0xff] }
  0x3e   : > { %5520 = vmatmul.mubr.msk.f32.gmra.mrb[22].mxu0 %vm510_vm0, %v273_v29  ;;  %v331_v29 = vld [vmem:[%s6992_s7 + $0x288] sm:$0xff] }
  0x3f   : > { %5522 = vmatprep.mubr.msk.f32.mxu0 %vm510_vm0, %v274_v30  ;;  %v332_v30 = vld [vmem:[%s6992_s7 + $0x290] sm:$0xff] }
  0x42   : > { %5523 = vmatmul.mubr.msk.f32.gmra.mrb[24].mxu0 %vm510_vm0, %v275_v31  ;;  %v333_v31 = vld [vmem:[%s6992_s7 + $0x298] sm:$0xff] }
  0x43   : > { %5525 = vmatprep.mubr.msk.f32.mxu0 %vm510_vm0, %v276_v32  ;;  %v334_v32 = vld [vmem:[%s6992_s7 + $0x2a0] sm:$0xff] }
  0x46   : > { %5526 = vmatmul.mubr.msk.f32.gmra.mrb[26].mxu0 %vm510_vm0, %v277_v33  ;;  %v335_v33 = vld [vmem:[%s6992_s7 + $0x2a8] sm:$0xff] }
  0x47   : > { %5528 = vmatprep.mubr.msk.f32.mxu0 %vm510_vm0, %v278_v34  ;;  %v336_v34 = vld [vmem:[%s6992_s7 + $0x2b0] sm:$0xff] }
  0x4a   : > { %5529 = vmatmul.mubr.msk.f32.gmra.mrb[28].mxu0 %vm510_vm0, %v279_v35  ;;  %v337_v35 = vld [vmem:[%s6992_s7 + $0x2b8] sm:$0xff] }
  0x4b   : > { %5531 = vmatprep.mubr.msk.f32.mxu0 %vm510_vm0, %v280_v36  ;;  %v338_v36 = vld [vmem:[%s6992_s7 + $0x2c0] sm:$0xff] }
  0x4e   : > { %5532 = vmatmul.mubr.msk.f32.gmra.mrb[30].mxu0 %vm510_vm0, %v281_v37  ;;  %v339_v37 = vld [vmem:[%s6992_s7 + $0x2c8] sm:$0xff] }
  0x4f   : > { %5534 = vmatprep.mubr.msk.f32.mxu0 %vm510_vm0, %v282_v38  ;;  %v340_v38 = vld [vmem:[%s6992_s7 + $0x2d0] sm:$0xff] }
  0x52   : > { %5535 = vmatmul.mubr.msk.f32.gmra.mrb[32].mxu0 %vm510_vm0, %v283_v39  ;;  %v341_v39 = vld [vmem:[%s6992_s7 + $0x2d8] sm:$0xff] }
  0x53   : > { %5537 = vmatprep.mubr.msk.f32.mxu0 %vm510_vm0, %v284_v40  ;;  %v342_v40 = vld [vmem:[%s6992_s7 + $0x2e0] sm:$0xff] }
  0x56   : > { %5538 = vmatmul.mubr.msk.f32.gmra.mrb[34].mxu0 %vm510_vm0, %v285_v41  ;;  %v343_v41 = vld [vmem:[%s6992_s7 + $0x2e8] sm:$0xff] }
  0x57   : > { %5540 = vmatprep.mubr.msk.f32.mxu0 %vm510_vm0, %v286_v42  ;;  %v344_v42 = vld [vmem:[%s6992_s7 + $0x2f0] sm:$0xff] }
  0x5a   : > { %5541 = vmatmul.mubr.msk.f32.gmra.mrb[36].mxu0 %vm510_vm0, %v287_v43  ;;  %v345_v43 = vld [vmem:[%s6992_s7 + $0x2f8] sm:$0xff] }
  0x5b   : > { %5543 = vmatprep.mubr.msk.f32.mxu0 %vm510_vm0, %v288_v44  ;;  %v346_v44 = vld [vmem:[%s6992_s7 + $0x300] sm:$0xff] }
  0x5e   : > { %5544 = vmatmul.mubr.msk.f32.gmra.mrb[38].mxu0 %vm510_vm0, %v289_v45  ;;  %v347_v45 = vld [vmem:[%s6992_s7 + $0x308] sm:$0xff] }
  0x5f   : > { %5546 = vmatprep.mubr.msk.f32.mxu0 %vm510_vm0, %v290_v46  ;;  %v348_v46 = vld [vmem:[%s6992_s7 + $0x310] sm:$0xff] }
  0x62   : > { %5547 = vmatmul.mubr.msk.f32.gmra.mrb[40].mxu0 %vm510_vm0, %v291_v47  ;;  %v349_v47 = vld [vmem:[%s6992_s7 + $0x318] sm:$0xff] }
  0x63   : > { %5549 = vmatprep.mubr.msk.f32.mxu0 %vm510_vm0, %v292_v48  ;;  %v350_v48 = vld [vmem:[%s6992_s7 + $0x320] sm:$0xff] }
  0x66   : > { %5550 = vmatmul.mubr.msk.f32.gmra.mrb[42].mxu0 %vm510_vm0, %v293_v49  ;;  %v351_v49 = vld [vmem:[%s6992_s7 + $0x328] sm:$0xff] }
  0x67   : > { %5552 = vmatprep.mubr.msk.f32.mxu0 %vm510_vm0, %v294_v50  ;;  %v352_v50 = vld [vmem:[%s6992_s7 + $0x330] sm:$0xff] }
  0x6a   : > { %5553 = vmatmul.mubr.msk.f32.gmra.mrb[44].mxu0 %vm510_vm0, %v295_v51  ;;  %v353_v51 = vld [vmem:[%s6992_s7 + $0x338] sm:$0xff] }
  0x6b   : > { %5555 = vmatprep.mubr.msk.f32.mxu0 %vm510_vm0, %v296_v52  ;;  %v354_v52 = vld [vmem:[%s6992_s7 + $0x340] sm:$0xff] }
  0x6e   : > { %5556 = vmatmul.mubr.msk.f32.gmra.mrb[46].mxu0 %vm510_vm0, %v297_v53  ;;  %v355_v53 = vld [vmem:[%s6992_s7 + $0x348] sm:$0xff] }
  0x6f   : > { %5558 = vmatprep.mubr.msk.f32.mxu0 %vm510_vm0, %v298_v54  ;;  %v356_v54 = vld [vmem:[%s6992_s7 + $0x350] sm:$0xff] }
  0x72   : > { %5559 = vmatmul.mubr.msk.f32.gmra.mrb[48].mxu0 %vm510_vm0, %v299_v55  ;;  %v383_v55 = vld [vmem:[%s7221_s19 + $0x8] sm:$0xff] }
  0x73   : > { %5561 = vmatprep.mubr.msk.f32.mxu0 %vm510_vm0, %v300_v56  ;;  %v357_v56 = vld [vmem:[%s6992_s7 + $0x358] sm:$0xff] }
  0x76   : > { %5562 = vmatmul.mubr.msk.f32.gmra.mrb[50].mxu0 %vm510_vm0, %v301_v57  ;;  %v382_v57 = vld [vmem:[%s7221_s19] sm:$0xff] }
  0x77   : > { %5564 = vmatprep.mubr.msk.f32.mxu0 %vm510_vm0, %v302_v58  ;;  %v358_v58 = vld [vmem:[%s6992_s7 + $0x360] sm:$0xff] }
  0x7a   : > { %5565 = vmatmul.mubr.msk.f32.gmra.mrb[52].mxu0 %vm510_vm0, %v303_v59 }
  0x7b   : > { %5567 = vmatprep.mubr.msk.f32.mxu0 %vm510_vm0, %v304_v60 }
  0x7e   : > { %5568 = vmatmul.mubr.msk.f32.gmra.mrb[54].mxu0 %vm510_vm0, %v305_v61 }
  0x7f   : > { %5570 = vmatprep.mubr.msk.f32.mxu0 %vm510_vm0, %v306_v62 }
  0x82   : > { %5571 = vmatmul.mubr.msk.f32.gmra.mrb[56].mxu0 %vm510_vm0, %v307_v2  ;;  %v384_v2 = vld [vmem:[%s7221_s19 + $0x10] sm:$0xff] }
  0x83   : > { %5573 = vmatprep.mubr.msk.f32.mxu0 %vm510_vm0, %v308_v3  ;;  %v360_v3 = vld [vmem:[%s6992_s7 + $0x370] sm:$0xff] }
  0x86   : > { %5574 = vmatmul.mubr.msk.f32.gmra.mrb[58].mxu0 %vm510_vm0, %v309_v7 }
  0x87   : > { %5576 = vmatprep.mubr.msk.f32.mxu0 %vm510_vm0, %v310_v8 }
  0x8a   : > { %5577 = vmatmul.mubr.msk.f32.gmra.mrb[60].mxu0 %vm510_vm0, %v311_v9  ;;  %v387_v9 = vld [vmem:[%s7221_s19 + $0x28] sm:$0xff] }
  0x8b   : > { %5579 = vmatprep.mubr.msk.f32.mxu0 %vm510_vm0, %v312_v10  ;;  %v361_v10 = vld [vmem:[%s6992_s7 + $0x378] sm:$0xff] }
  0x8e   : > { %5580 = vmatmul.mubr.msk.f32.gmra.mrb[62].mxu0 %vm510_vm0, %v313_v11 }
  0x8f   : > { %5582 = vmatprep.mubr.msk.f32.mxu0 %vm510_vm0, %v314_v12  ;;  %v386_v12 = vld [vmem:[%s7221_s19 + $0x20] sm:$0xff] }
  0x92   : > { %5583 = vmatmul.mubr.msk.f32.gmra.mrb[64].mxu0 %vm510_vm0, %v315_v13  ;;  %v362_v13 = vld [vmem:[%s6992_s7 + $0x380] sm:$0xff] }
  0x93   : > { %5585 = vmatprep.mubr.msk.f32.mxu0 %vm510_vm0, %v316_v14 }
  0x96   : > { %5586 = vmatmul.mubr.msk.f32.gmra.mrb[66].mxu0 %vm510_vm0, %v317_v15 }
  0x97   : > { %5588 = vmatprep.mubr.msk.f32.mxu0 %vm510_vm0, %v318_v16 }
  0x9a   : > { %5589 = vmatmul.mubr.msk.f32.gmra.mrb[68].mxu0 %vm510_vm0, %v319_v17 }
  0x9b   : > { %5591 = vmatprep.mubr.msk.f32.mxu0 %vm510_vm0, %v320_v18 }
  0x9e   : > { %5592 = vmatmul.mubr.msk.f32.gmra.mrb[70].mxu0 %vm510_vm0, %v321_v19  ;;  %v389_v19 = vld [vmem:[%s7221_s19 + $0x38] sm:$0xff] }
  0x9f   : > { %5594 = vmatprep.mubr.msk.f32.mxu0 %vm510_vm0, %v322_v20  ;;  %v363_v20 = vld [vmem:[%s6992_s7 + $0x388] sm:$0xff] }
  0xa2   : > { %5595 = vmatmul.mubr.msk.f32.gmra.mrb[72].mxu0 %vm510_vm0, %v323_v21 }
  0xa3   : > { %5597 = vmatprep.mubr.msk.f32.mxu0 %vm510_vm0, %v324_v22  ;;  %v388_v22 = vld [vmem:[%s7221_s19 + $0x30] sm:$0xff] }
  0xa6   : > { %5598 = vmatmul.mubr.msk.f32.gmra.mrb[74].mxu0 %vm510_vm0, %v325_v23  ;;  %v364_v23 = vld [vmem:[%s6992_s7 + $0x390] sm:$0xff] }
  0xa7   : > { %5600 = vmatprep.mubr.msk.f32.mxu0 %vm510_vm0, %v326_v24 }
  0xaa   : > { %5601 = vmatmul.mubr.msk.f32.gmra.mrb[76].mxu0 %vm510_vm0, %v327_v25 }
  0xab   : > { %5603 = vmatprep.mubr.msk.f32.mxu0 %vm510_vm0, %v328_v26 }
  0xae   : > { %5604 = vmatmul.mubr.msk.f32.gmra.mrb[78].mxu0 %vm510_vm0, %v329_v27 }
  0xaf   : > { %5606 = vmatprep.mubr.msk.f32.mxu0 %vm510_vm0, %v330_v28 }
  0xb2   : > { %5607 = vmatmul.mubr.msk.f32.gmra.mrb[80].mxu0 %vm510_vm0, %v331_v29  ;;  %v391_v29 = vld [vmem:[%s7221_s19 + $0x48] sm:$0xff] }
  0xb3   : > { %5609 = vmatprep.mubr.msk.f32.mxu0 %vm510_vm0, %v332_v30  ;;  %v365_v30 = vld [vmem:[%s6992_s7 + $0x398] sm:$0xff] }
  0xb6   : > { %5610 = vmatmul.mubr.msk.f32.gmra.mrb[82].mxu0 %vm510_vm0, %v333_v31 }
  0xb7   : > { %5612 = vmatprep.mubr.msk.f32.mxu0 %vm510_vm0, %v334_v32 }
  0xba   : > { %5613 = vmatmul.mubr.msk.f32.gmra.mrb[84].mxu0 %vm510_vm0, %v335_v33  ;;  %v390_v33 = vld [vmem:[%s7221_s19 + $0x40] sm:$0xff] }
  0xbb   : > { %5615 = vmatprep.mubr.msk.f32.mxu0 %vm510_vm0, %v336_v34  ;;  %v366_v34 = vld [vmem:[%s6992_s7 + $0x3a0] sm:$0xff] }
  0xbe   : > { %5616 = vmatmul.mubr.msk.f32.gmra.mrb[86].mxu0 %vm510_vm0, %v337_v35 }
  0xbf   : > { %5618 = vmatprep.mubr.msk.f32.mxu0 %vm510_vm0, %v338_v36 }
  0xc2   : > { %5619 = vmatmul.mubr.msk.f32.gmra.mrb[88].mxu0 %vm510_vm0, %v339_v37 }
  0xc3   : > { %5621 = vmatprep.mubr.msk.f32.mxu0 %vm510_vm0, %v340_v38 }
  0xc6   : > { %5622 = vmatmul.mubr.msk.f32.gmra.mrb[90].mxu0 %vm510_vm0, %v341_v39 }
  0xc7   : > { %5624 = vmatprep.mubr.msk.f32.mxu0 %vm510_vm0, %v342_v40 }
  0xca   : > { %5625 = vmatmul.mubr.msk.f32.gmra.mrb[92].mxu0 %vm510_vm0, %v343_v41 }
  0xcb   : > { %5627 = vmatprep.mubr.msk.f32.mxu0 %vm510_vm0, %v344_v42 }
  0xce   : > { %5628 = vmatmul.mubr.msk.f32.gmra.mrb[94].mxu0 %vm510_vm0, %v345_v43  ;;  %v393_v43 = vld [vmem:[%s7221_s19 + $0x58] sm:$0xff] }
  0xcf   : > { %5630 = vmatprep.mubr.msk.f32.mxu0 %vm510_vm0, %v346_v44  ;;  %v367_v44 = vld [vmem:[%s6992_s7 + $0x3a8] sm:$0xff] }
  0xd2   : > { %5631 = vmatmul.mubr.msk.f32.gmra.mrb[96].mxu0 %vm510_vm0, %v347_v45 }
  0xd3   : > { %5633 = vmatprep.mubr.msk.f32.mxu0 %vm510_vm0, %v348_v46 }
  0xd6   : > { %5634 = vmatmul.mubr.msk.f32.gmra.mrb[98].mxu0 %vm510_vm0, %v349_v47  ;;  %v392_v47 = vld [vmem:[%s7221_s19 + $0x50] sm:$0xff] }
  0xd7   : > { %5636 = vmatprep.mubr.msk.f32.mxu0 %vm510_vm0, %v350_v48  ;;  %v368_v48 = vld [vmem:[%s6992_s7 + $0x3b0] sm:$0xff] }
  0xda   : > { %5637 = vmatmul.mubr.msk.f32.gmra.mrb[100].mxu0 %vm510_vm0, %v351_v49 }
  0xdb   : > { %5639 = vmatprep.mubr.msk.f32.mxu0 %vm510_vm0, %v352_v50 }
  0xde   : > { %5640 = vmatmul.mubr.msk.f32.gmra.mrb[102].mxu0 %vm510_vm0, %v353_v51 }
  0xdf   : > { %5642 = vmatprep.mubr.msk.f32.mxu0 %vm510_vm0, %v354_v52 }
  0xe2   : > { %5643 = vmatmul.mubr.msk.f32.gmra.mrb[104].mxu0 %vm510_vm0, %v355_v53 }
  0xe3   : > { %5645 = vmatprep.mubr.msk.f32.mxu0 %vm510_vm0, %v356_v54 }
  0xe5   : > { %v5488_v59 = vpop.f32.mrb[0].mxu0 }
  0xe6   : > { %v7230_v60 = vadd.f32 %v5488_v59, %v383_v55  ;;  %v961_v61 = vpop.f32.mrb[1].mxu0  ;;  %5646 = vmatmul.mubr.msk.f32.gmra.mrb[106].mxu0 %vm510_vm0, %v357_v56 }
  0xe7   : > { %v7233_v62 = vadd.f32 %v961_v61, %v382_v57  ;;  %5648 = vmatprep.mubr.msk.f32.mxu0 %vm510_vm0, %v358_v58  ;;  %v395_v57 = vld [vmem:[%s7221_s19 + $0x68] sm:$0xff]  ;;  %v369_v58 = vld [vmem:[%s6992_s7 + $0x3b8] sm:$0xff] }
  0xe8   : > { %v4828_v1 = vmul.f32 -1.442695, %v7230_v60 }
  0xe9   : > { %v4827_v4 = vmul.f32 -1.442695, %v7233_v62  ;;  %v5491_v5 = vpop.f32.mrb[2].mxu0 }
  0xea   : > { %5902 = vpow2.f32 %v4828_v1  ;;  %v7242_v6 = vadd.f32 %v5491_v5, %v385_v63  ;;  %v971_v7 = vpop.f32.mrb[3].mxu0  ;;  %5649 = vmatmul.mubr.msk.f32.gmra.mrb[108].mxu0 %vm510_vm0, %v359_v0  ;;  %v394_v63 = vld [vmem:[%s7221_s19 + $0x60] sm:$0xff] }
  0xeb   : > { %5904 = vpow2.f32 %v4827_v4  ;;  %v7245_v8 = vadd.f32 %v971_v7, %v384_v2  ;;  %5651 = vmatprep.mubr.msk.f32.mxu0 %vm510_vm0, %v360_v3  ;;  %v370_v0 = vld [vmem:[%s6992_s7 + $0x3c0] sm:$0xff] }
  0xec   : > { %v4830_v11 = vmul.f32 -1.442695, %v7242_v6 }
  0xed   : > { %v4829_v14 = vmul.f32 -1.442695, %v7245_v8  ;;  %v5494_v15 = vpop.f32.mrb[4].mxu0 }
  0xee   : > { %5906 = vpow2.f32 %v4830_v11  ;;  %v7254_v16 = vadd.f32 %v5494_v15, %v387_v9  ;;  %v981_v17 = vpop.f32.mrb[5].mxu0  ;;  %5652 = vmatmul.mubr.msk.f32.gmra.mrb[110].mxu0 %vm510_vm0, %v361_v10  ;;  %v397_v11 = vld [vmem:[%s7221_s19 + $0x78] sm:$0xff]  ;;  %v396_v15 = vld [vmem:[%s7221_s19 + $0x70] sm:$0xff] }
  0xef   : > { %5908 = vpow2.f32 %v4829_v14  ;;  %v7257_v18 = vadd.f32 %v981_v17, %v386_v12  ;;  %5654 = vmatprep.mubr.msk.f32.mxu0 %vm510_vm0, %v362_v13  ;;  %v371_v12 = vld [vmem:[%s6992_s7 + $0x3c8] sm:$0xff]  ;;  %v372_v17 = vld [vmem:[%s6992_s7 + $0x3d0] sm:$0xff] }
  0xf0   : > { %v4832_v21 = vmul.f32 -1.442695, %v7254_v16 }
  0xf1   : > { %v4831_v24 = vmul.f32 -1.442695, %v7257_v18  ;;  %v5497_v25 = vpop.f32.mrb[6].mxu0 }
  0xf2   : > { %5910 = vpow2.f32 %v4832_v21  ;;  %v7266_v26 = vadd.f32 %v5497_v25, %v389_v19  ;;  %v991_v27 = vpop.f32.mrb[7].mxu0  ;;  %5655 = vmatmul.mubr.msk.f32.gmra.mrb[112].mxu0 %vm510_vm0, %v363_v20 }
  0xf3   : > { %5912 = vpow2.f32 %v4831_v24  ;;  %v7269_v28 = vadd.f32 %v991_v27, %v388_v22  ;;  %5657 = vmatprep.mubr.msk.f32.mxu0 %vm510_vm0, %v364_v23 }
  0xf4   : > { %v5903_v31 = vpop.eup %5902  ;;  %v4834_v32 = vmul.f32 -1.442695, %v7266_v26 }
  0xf5   : > { %v5905_v35 = vpop.eup %5904  ;;  %v1985_v36 = vadd.f32 1.0, %v5903_v31  ;;  %v4833_v37 = vmul.f32 -1.442695, %v7269_v28  ;;  %v5500_v38 = vpop.f32.mrb[8].mxu0 }
  0xf6   : > { %v1984_v39 = vadd.f32 1.0, %v5905_v35  ;;  %5914 = vpow2.f32 %v4834_v32  ;;  %v7278_v40 = vadd.f32 %v5500_v38, %v391_v29  ;;  %v1001_v41 = vpop.f32.mrb[9].mxu0  ;;  %5658 = vmatmul.mubr.msk.f32.gmra.mrb[114].mxu0 %vm510_vm0, %v365_v30  ;;  %v399_v30 = vld [vmem:[%s7221_s19 + $0x88] sm:$0xff]  ;;  %v373_v32 = vld [vmem:[%s6992_s7 + $0x3d8] sm:$0xff]  ;;  %v374_v38 = vld [vmem:[%s6992_s7 + $0x3e0] sm:$0xff] }
  0xf7   : > { %5916 = vrcp.f32 %v1985_v36  ;;  %v7281_v42 = vadd.f32 %v1001_v41, %v390_v33  ;;  %5660 = vmatprep.mubr.msk.f32.mxu0 %vm510_vm0, %v366_v34 }
  0xf8   : > { %v5907_v45 = vpop.eup %5906  ;;  %5918 = vrcp.f32 %v1984_v39  ;;  %v4836_v46 = vmul.f32 -1.442695, %v7278_v40 }
  0xf9   : > { %v5909_v49 = vpop.eup %5908  ;;  %v1987_v50 = vadd.f32 1.0, %v5907_v45  ;;  %5920 = vpow2.f32 %v4833_v37  ;;  %v4835_v51 = vmul.f32 -1.442695, %v7281_v42  ;;  %v5503_v52 = vpop.f32.mrb[10].mxu0  ;;  %v398_v37 = vld [vmem:[%s7221_s19 + $0x80] sm:$0xff] }
  0xfa   : > { %v1986_v53 = vadd.f32 1.0, %v5909_v49  ;;  %5922 = vpow2.f32 %v4836_v46  ;;  %v7290_v54 = vadd.f32 %v5503_v52, %v393_v43  ;;  %v1011_v55 = vpop.f32.mrb[11].mxu0  ;;  %5661 = vmatmul.mubr.msk.f32.gmra.mrb[116].mxu0 %vm510_vm0, %v367_v44  ;;  %v401_v49 = vld [vmem:[%s7221_s19 + $0x98] sm:$0xff] }
  0xfb   : > { %5924 = vrcp.f32 %v1987_v50  ;;  %v7293_v56 = vadd.f32 %v1011_v55, %v392_v47  ;;  %5663 = vmatprep.mubr.msk.f32.mxu0 %vm510_vm0, %v368_v48  ;;  %v375_v50 = vld [vmem:[%s6992_s7 + $0x3e8] sm:$0xff] }
  0xfc   : > { %v5911_v59 = vpop.eup %5910  ;;  %5926 = vrcp.f32 %v1986_v53  ;;  %v4838_v61 = vmul.f32 -1.442695, %v7290_v54 }
  0xfd   : > { %v5913_v1 = vpop.eup %5912  ;;  %v1989_v2 = vadd.f32 1.0, %v5911_v59  ;;  %5928 = vpow2.f32 %v4835_v51  ;;  %v4837_v3 = vmul.f32 -1.442695, %v7293_v56  ;;  %v5506_v4 = vpop.f32.mrb[12].mxu0 }
  0xfe   : > { %v1988_v5 = vadd.f32 1.0, %v5913_v1  ;;  %5930 = vpow2.f32 %v4838_v61  ;;  %v7302_v7 = vadd.f32 %v5506_v4, %v395_v57  ;;  %v1021_v9 = vpop.f32.mrb[13].mxu0  ;;  %5664 = vmatmul.mubr.msk.f32.gmra.mrb[118].mxu0 %vm510_vm0, %v369_v58  ;;  %v400_v57 = vld [vmem:[%s7221_s19 + $0x90] sm:$0xff] }
  0xff   : > { %5932 = vrcp.f32 %v1989_v2  ;;  %v7305_v10 = vadd.f32 %v1021_v9, %v394_v63  ;;  %5666 = vmatprep.mubr.msk.f32.mxu0 %vm510_vm0, %v370_v0  ;;  %v376_v58 = vld [vmem:[%s6992_s7 + $0x3f0] sm:$0xff]  ;;  %v377_v9 = vld [vmem:[%s6992_s7 + $0x3f8] sm:$0xff] }
 0x100   : > { %v5915_v13 = vpop.eup %5914  ;;  %5934 = vrcp.f32 %v1988_v5  ;;  %v4840_v14 = vmul.f32 -1.442695, %v7302_v7  ;;  %v403_v5 = vld [vmem:[%s7221_s19 + $0xa8] sm:$0xff] }
 0x101   : > { %v5917_v19 = vpop.eup %5916  ;;  %v1991_v20 = vadd.f32 1.0, %v5915_v13  ;;  %5936 = vpow2.f32 %v4837_v3  ;;  %v4839_v21 = vmul.f32 -1.442695, %v7305_v10  ;;  %v5509_v22 = vpop.f32.mrb[14].mxu0 }
 0x102   : > { %v5919_v23 = vpop.eup %5918  ;;  %5938 = vpow2.f32 %v4840_v14  ;;  %v7314_v24 = vadd.f32 %v5509_v22, %v397_v11  ;;  %v1031_v25 = vpop.f32.mrb[15].mxu0  ;;  %5667 = vmatmul.mubr.msk.f32.gmra.mrb[120].mxu0 %vm510_vm0, %v371_v12  ;;  %v2369_v34 = vmul.f32 %v5917_v19, %v7230_v60 }
 0x103   : > { %v5921_v27 = vpop.eup %5920  ;;  %v7317_v29 = vadd.f32 %v1031_v25, %v396_v15  ;;  %5669 = vmatprep.mubr.msk.f32.mxu0 %vm510_vm0, %v372_v17  ;;  %v2368_v31 = vmul.f32 %v5919_v23, %v7233_v62  ;;  %5940 = vpow2.f32 %v4839_v21  ;;  %v402_v15 = vld [vmem:[%s7221_s19 + $0xa0] sm:$0xff] }
 0x104   : > { %v5923_v33 = vpop.eup %5922  ;;  %v1990_v35 = vadd.f32 1.0, %v5921_v27  ;;  %v4842_v36 = vmul.f32 -1.442695, %v7314_v24  ;;  %5942 = vrcp.f32 %v1991_v20  ;;  %v405_v27 = vld [vmem:[%s7221_s19 + $0xb8] sm:$0xff] }
 0x105   : > { %v5925_v39 = vpop.eup %5924  ;;  %v1993_v41 = vadd.f32 1.0, %v5923_v33  ;;  %v4841_v43 = vmul.f32 -1.442695, %v7317_v29  ;;  %v5512_v44 = vpop.f32.mrb[16].mxu0  ;;  %5686 = vmatprep.mubr.msk.f32.mxu1 %vm510_vm0, %v2368_v31 }
 0x106   : > { %v5927_v62 = vpop.eup %5926  ;;  %5944 = vrcp.f32 %v1990_v35  ;;  %v7329_v45 = vadd.f32 %v5512_v44, %v399_v30  ;;  %v1041_v60 = vpop.f32.mrb[17].mxu0  ;;  %5670 = vmatmul.mubr.msk.f32.gmra.mrb[122].mxu0 %vm510_vm0, %v373_v32  ;;  %5687 = vmatmul.mubr.msk.f32.vlgmr.msra.gmra.mrb[0].mxu1 %vm510_vm0, %v2369_v34  ;;  %v2371_v52 = vmul.f32 %v5925_v39, %v7242_v6  ;;  %v404_v32 = vld [vmem:[%s7221_s19 + $0xb0] sm:$0xff] }
 0x107   : > { %v5929_v46 = vpop.eup %5928  ;;  %v2370_v47 = vmul.f32 %v5927_v62, %v7245_v8  ;;  %5946 = vrcp.f32 %v1993_v41  ;;  %v7334_v48 = vadd.f32 %v1041_v60, %v398_v37  ;;  %5672 = vmatprep.mubr.msk.f32.mxu0 %vm510_vm0, %v374_v38 }
 0x108   : > { %v5931_v51 = vpop.eup %5930  ;;  %v1992_v53 = vadd.f32 1.0, %v5929_v46  ;;  %5948 = vpow2.f32 %v4842_v36  ;;  %v4844_v55 = vmul.f32 -1.442695, %v7329_v45 }
 0x109   : > { %v5933_v59 = vpop.eup %5932  ;;  %v1995_v61 = vadd.f32 1.0, %v5931_v51  ;;  %5950 = vpow2.f32 %v4841_v43  ;;  %v4843_v8 = vmul.f32 -1.442695, %v7334_v48  ;;  %v5515_v63 = vpop.f32.mrb[18].mxu0  ;;  %5689 = vmatprep.mubr.msk.f32.mxu1 %vm510_vm0, %v2370_v47 }
 0x10a   : > { %v5935_v0 = vpop.eup %5934  ;;  %5952 = vrcp.f32 %v1992_v53  ;;  %v7345_v1 = vadd.f32 %v5515_v63, %v401_v49  ;;  %v1051_v6 = vpop.f32.mrb[19].mxu0  ;;  %5673 = vmatmul.mubr.msk.f32.gmra.mrb[124].mxu0 %vm510_vm0, %v375_v50  ;;  %5690 = vmatmul.mubr.msk.f32.gmra.mrb[2].mxu1 %vm510_vm0, %v2371_v52  ;;  %v2373_v12 = vmul.f32 %v5933_v59, %v7254_v16 }
 0x10b   : > { %v5937_v2 = vpop.eup %5936  ;;  %v2372_v3 = vmul.f32 %v5935_v0, %v7257_v18  ;;  %5954 = vrcp.f32 %v1995_v61  ;;  %v7350_v4 = vadd.f32 %v1051_v6, %v400_v57  ;;  %5675 = vmatprep.mubr.msk.f32.mxu0 %vm510_vm0, %v376_v58 }
 0x10c   : > { %v5939_v11 = vpop.eup %5938  ;;  %v1994_v13 = vadd.f32 1.0, %v5937_v2  ;;  %5956 = vpow2.f32 %v4844_v55  ;;  %v4846_v14 = vmul.f32 -1.442695, %v7345_v1 }
 0x10d   : > { %v1997_v17 = vadd.f32 1.0, %v5939_v11  ;;  %5958 = vpow2.f32 %v4843_v8  ;;  %v5518_v19 = vpop.f32.mrb[20].mxu0  ;;  %5692 = vmatprep.mubr.msk.f32.mxu1 %vm510_vm0, %v2372_v3  ;;  %v5941_v18 = vpop.eup %5940  ;;  %v4845_v20 = vmul.f32 -1.442695, %v7350_v4 }
 0x10e   : > { %5960 = vrcp.f32 %v1994_v13  ;;  %v7360_v21 = vadd.f32 %v5518_v19, %v403_v5  ;;  %v1061_v22 = vpop.f32.mrb[21].mxu0  ;;  %5676 = vmatmul.mubr.msk.f32.gmra.mrb[126].mxu0 %vm510_vm0, %v377_v9  ;;  %5693 = vmatmul.mubr.msk.f32.gmra.mrb[4].mxu1 %vm510_vm0, %v2373_v12  ;;  %v5943_v16 = vpop.eup %5942  ;;  %v1996_v23 = vadd.f32 1.0, %v5941_v18 }
 0x10f   : > { %5962 = vrcp.f32 %v1997_v17  ;;  %v7364_v25 = vadd.f32 %v1061_v22, %v402_v15  ;;  %v2375_v38 = vmul.f32 %v5943_v16, %v7266_v26  ;;  %v406_v26 = vld [vmem:[%s7221_s19 + $0xc0] sm:$0xff] }
 0x110   : > { %v5945_v30 = vpop.eup %5944  ;;  %5964 = vpow2.f32 %v4846_v14  ;;  %v4848_v31 = vmul.f32 -1.442695, %v7360_v21 }
 0x111   : > { %v5947_v33 = vpop.eup %5946  ;;  %v2374_v34 = vmul.f32 %v5945_v30, %v7269_v28  ;;  %5966 = vrcp.f32 %v1996_v23  ;;  %v4847_v35 = vmul.f32 -1.442695, %v7364_v25  ;;  %v5521_v36 = vpop.f32.mrb[22].mxu0  ;;  %v407_v28 = vld [vmem:[%s7221_s19 + $0xc8] sm:$0xff] }
 0x112   : > { %v5949_v37 = vpop.eup %5948  ;;  %5968 = vpow2.f32 %v4845_v20  ;;  %v7372_v39 = vadd.f32 %v5521_v36, %v405_v27  ;;  %v1071_v41 = vpop.f32.mrb[23].mxu0  ;;  %v2377_v55 = vmul.f32 %v5947_v33, %v7278_v40  ;;  %v408_v40 = vld [vmem:[%s7221_s19 + $0xd0] sm:$0xff] }
 0x113   : > { %v5951_v43 = vpop.eup %5950  ;;  %v1999_v44 = vadd.f32 1.0, %v5949_v37  ;;  %5970 = vpow2.f32 %v4848_v31  ;;  %5695 = vmatprep.mubr.msk.f32.mxu1 %vm510_vm0, %v2374_v34  ;;  %v7375_v62 = vadd.f32 %v1071_v41, %v404_v32 }
 0x114   : > { %v5953_v60 = vpop.eup %5952  ;;  %v1998_v46 = vadd.f32 1.0, %v5951_v43  ;;  %5972 = vpow2.f32 %v4847_v35  ;;  %v4850_v47 = vmul.f32 -1.442695, %v7372_v39  ;;  %5696 = vmatmul.mubr.msk.f32.gmra.mrb[6].mxu1 %vm510_vm0, %v2375_v38  ;;  %v412_v43 = vld [vmem:[%s7221_s19 + $0xf0] sm:$0xff] }
 0x115   : > { %v5955_v49 = vpop.eup %5954  ;;  %v2376_v50 = vmul.f32 %v5953_v60, %v7281_v42  ;;  %5974 = vrcp.f32 %v1999_v44  ;;  %v4849_v51 = vmul.f32 -1.442695, %v7375_v62  ;;  %v5524_v52 = vpop.f32.mrb[24].mxu0  ;;  %v409_v42 = vld [vmem:[%s7221_s19 + $0xd8] sm:$0xff] }
 0x116   : > { %v5957_v53 = vpop.eup %5956  ;;  %5976 = vrcp.f32 %v1998_v46  ;;  %v7384_v57 = vadd.f32 %v5524_v52, %v407_v28  ;;  %v1081_v58 = vpop.f32.mrb[25].mxu0  ;;  %v2379_v12 = vmul.f32 %v5955_v49, %v7290_v54  ;;  %v410_v54 = vld [vmem:[%s7221_s19 + $0xe0] sm:$0xff] }
 0x117   : > { %v5959_v59 = vpop.eup %5958  ;;  %v2001_v61 = vadd.f32 1.0, %v5957_v53  ;;  %5978 = vpow2.f32 %v4850_v47  ;;  %5698 = vmatprep.mubr.msk.f32.mxu1 %vm510_vm0, %v2376_v50  ;;  %v7387_v8 = vadd.f32 %v1081_v58, %v406_v26 }
 0x118   : > { %v5961_v63 = vpop.eup %5960  ;;  %v2000_v0 = vadd.f32 1.0, %v5959_v59  ;;  %5980 = vpow2.f32 %v4849_v51  ;;  %v4852_v6 = vmul.f32 -1.442695, %v7384_v57  ;;  %5699 = vmatmul.mubr.msk.f32.gmra.mrb[8].mxu1 %vm510_vm0, %v2377_v55  ;;  %v414_v59 = vld [vmem:[%s7221_s19 + $0x100] sm:$0xff] }
 0x119   : > { %v5963_v2 = vpop.eup %5962  ;;  %v2378_v3 = vmul.f32 %v5961_v63, %v7293_v56  ;;  %5982 = vrcp.f32 %v2001_v61  ;;  %v4851_v5 = vmul.f32 -1.442695, %v7387_v8  ;;  %v5527_v9 = vpop.f32.mrb[26].mxu0  ;;  %v411_v56 = vld [vmem:[%s7221_s19 + $0xe8] sm:$0xff] }
 0x11a   : > { %v5965_v11 = vpop.eup %5964  ;;  %5984 = vrcp.f32 %v2000_v0  ;;  %v7396_v13 = vadd.f32 %v5527_v9, %v409_v42  ;;  %v1091_v14 = vpop.f32.mrb[27].mxu0  ;;  %v2381_v23 = vmul.f32 %v5963_v2, %v7302_v7  ;;  %v413_v7 = vld [vmem:[%s7221_s19 + $0xf8] sm:$0xff] }
 0x11b   : > { %v5967_v15 = vpop.eup %5966  ;;  %v2003_v17 = vadd.f32 1.0, %v5965_v11  ;;  %5986 = vpow2.f32 %v4852_v6  ;;  %5701 = vmatprep.mubr.msk.f32.mxu1 %vm510_vm0, %v2378_v3  ;;  %v7399_v19 = vadd.f32 %v1091_v14, %v408_v40 }
 0x11c   : > { %v5969_v18 = vpop.eup %5968  ;;  %v2380_v20 = vmul.f32 %v5967_v15, %v7305_v10  ;;  %5988 = vpow2.f32 %v4851_v5  ;;  %v4854_v22 = vmul.f32 -1.442695, %v7396_v13  ;;  %5702 = vmatmul.mubr.msk.f32.gmra.mrb[10].mxu1 %vm510_vm0, %v2379_v12  ;;  %v416_v15 = vld [vmem:[%s7221_s19 + $0x110] sm:$0xff] }
 0x11d   : > { %v5971_v16 = vpop.eup %5970  ;;  %5990 = vrcp.f32 %v2003_v17  ;;  %v2002_v27 = vadd.f32 1.0, %v5969_v18  ;;  %v5530_v30 = vpop.f32.mrb[28].mxu0  ;;  %v4853_v33 = vmul.f32 -1.442695, %v7399_v19 }
 0x11e   : > { %v5973_v31 = vpop.eup %5972  ;;  %v2005_v32 = vadd.f32 1.0, %v5971_v16  ;;  %5992 = vpow2.f32 %v4854_v22  ;;  %v7408_v10 = vadd.f32 %v5530_v30, %v411_v56  ;;  %5704 = vmatprep.mubr.msk.f32.mxu1 %vm510_vm0, %v2380_v20  ;;  %v1101_v34 = vpop.f32.mrb[29].mxu0 }
 0x11f   : > { %v5975_v35 = vpop.eup %5974  ;;  %5994 = vrcp.f32 %v2002_v27  ;;  %v2004_v36 = vadd.f32 1.0, %v5973_v31  ;;  %v7411_v37 = vadd.f32 %v1101_v34, %v410_v54 }
 0x120   : > { %v5977_v38 = vpop.eup %5976  ;;  %5996 = vrcp.f32 %v2005_v32  ;;  %v4856_v41 = vmul.f32 -1.442695, %v7408_v10  ;;  %5705 = vmatmul.mubr.msk.f32.gmra.mrb[12].mxu1 %vm510_vm0, %v2381_v23  ;;  %v2383_v28 = vmul.f32 %v5975_v35, %v7314_v24  ;;  %v415_v24 = vld [vmem:[%s7221_s19 + $0x108] sm:$0xff] }
 0x121   : > { %v5979_v44 = vpop.eup %5978  ;;  %v2382_v60 = vmul.f32 %v5977_v38, %v7317_v29  ;;  %5998 = vrcp.f32 %v2004_v36  ;;  %v5533_v46 = vpop.f32.mrb[30].mxu0  ;;  %v4855_v49 = vmul.f32 -1.442695, %v7411_v37  ;;  %v419_v32 = vld [vmem:[%s7221_s19 + $0x128] sm:$0xff] }
 0x122   : > { %v5981_v47 = vpop.eup %5980  ;;  %v2007_v26 = vadd.f32 1.0, %v5979_v44  ;;  %6000 = vpow2.f32 %v4853_v33  ;;  %v7420_v50 = vadd.f32 %v5533_v46, %v413_v7  ;;  %v1111_v51 = vpop.f32.mrb[31].mxu0 }
 0x123   : > { %v5983_v52 = vpop.eup %5982  ;;  %v2006_v53 = vadd.f32 1.0, %v5981_v47  ;;  %6002 = vpow2.f32 %v4856_v41  ;;  %5707 = vmatprep.mubr.msk.f32.mxu1 %vm510_vm0, %v2382_v60  ;;  %v7423_v55 = vadd.f32 %v1111_v51, %v412_v43  ;;  %v421_v47 = vld [vmem:[%s7221_s19 + $0x138] sm:$0xff] }
 0x124   : > { %v5985_v29 = vpop.eup %5984  ;;  %6004 = vrcp.f32 %v2007_v26  ;;  %v4858_v58 = vmul.f32 -1.442695, %v7420_v50  ;;  %5708 = vmatmul.mubr.msk.f32.gmra.mrb[14].mxu1 %vm510_vm0, %v2383_v28  ;;  %v2385_v42 = vmul.f32 %v5983_v52, %v7329_v45  ;;  %v417_v45 = vld [vmem:[%s7221_s19 + $0x118] sm:$0xff]  ;;  %v420_v52 = vld [vmem:[%s7221_s19 + $0x130] sm:$0xff] }
 0x125   : > { %v5987_v61 = vpop.eup %5986  ;;  %v2384_v63 = vmul.f32 %v5985_v29, %v7334_v48  ;;  %6006 = vrcp.f32 %v2006_v53  ;;  %v5536_v0 = vpop.f32.mrb[32].mxu0  ;;  %v4857_v2 = vmul.f32 -1.442695, %v7423_v55 }
 0x126   : > { %v5989_v6 = vpop.eup %5988  ;;  %v2009_v40 = vadd.f32 1.0, %v5987_v61  ;;  %6008 = vpow2.f32 %v4855_v49  ;;  %v7432_v3 = vadd.f32 %v5536_v0, %v415_v24  ;;  %v1121_v5 = vpop.f32.mrb[33].mxu0 }
 0x127   : > { %v5991_v9 = vpop.eup %5990  ;;  %v2008_v11 = vadd.f32 1.0, %v5989_v6  ;;  %6010 = vpow2.f32 %v4858_v58  ;;  %5710 = vmatprep.mubr.msk.f32.mxu1 %vm510_vm0, %v2384_v63  ;;  %v7435_v12 = vadd.f32 %v1121_v5, %v414_v59  ;;  %v423_v6 = vld [vmem:[%s7221_s19 + $0x148] sm:$0xff] }
 0x128   : > { %v5993_v48 = vpop.eup %5992  ;;  %6012 = vrcp.f32 %v2009_v40  ;;  %v4860_v14 = vmul.f32 -1.442695, %v7432_v3  ;;  %5711 = vmatmul.mubr.msk.f32.gmra.mrb[16].mxu1 %vm510_vm0, %v2385_v42  ;;  %v2387_v30 = vmul.f32 %v5991_v9, %v7345_v1  ;;  %v422_v9 = vld [vmem:[%s7221_s19 + $0x140] sm:$0xff] }
 0x129   : > { %v5995_v17 = vpop.eup %5994  ;;  %6014 = vrcp.f32 %v2008_v11  ;;  %v2011_v56 = vadd.f32 1.0, %v5993_v48  ;;  %v4859_v18 = vmul.f32 -1.442695, %v7435_v12  ;;  %v5539_v20 = vpop.f32.mrb[34].mxu0 }
 0x12a   : > { %v5997_v22 = vpop.eup %5996  ;;  %v2386_v54 = vmul.f32 %v5995_v17, %v7350_v4  ;;  %6016 = vpow2.f32 %v4857_v2  ;;  %v7443_v16 = vadd.f32 %v5539_v20, %v417_v45  ;;  %v1131_v23 = vpop.f32.mrb[35].mxu0  ;;  %v418_v4 = vld [vmem:[%s7221_s19 + $0x120] sm:$0xff] }
 0x12b   : > { %v5999_v27 = vpop.eup %5998  ;;  %6018 = vrcp.f32 %v2011_v56  ;;  %v7446_v31 = vadd.f32 %v1131_v23, %v416_v15  ;;  %v2389_v60 = vmul.f32 %v5997_v22, %v7360_v21  ;;  %v425_v22 = vld [vmem:[%s7221_s19 + $0x158] sm:$0xff] }
 0x12c   : > { %v6001_v33 = vpop.eup %6000  ;;  %v2388_v34 = vmul.f32 %v5999_v27, %v7364_v25  ;;  %6020 = vpow2.f32 %v4860_v14  ;;  %v4862_v35 = vmul.f32 -1.442695, %v7443_v16  ;;  %5713 = vmatprep.mubr.msk.f32.mxu1 %vm510_vm0, %v2386_v54 }
 0x12d   : > { %v6003_v36 = vpop.eup %6002  ;;  %v2010_v7 = vadd.f32 1.0, %v6001_v33  ;;  %6022 = vpow2.f32 %v4859_v18  ;;  %v4861_v38 = vmul.f32 -1.442695, %v7446_v31  ;;  %5714 = vmatmul.mubr.msk.f32.gmra.mrb[18].mxu1 %vm510_vm0, %v2387_v30  ;;  %v5542_v1 = vpop.f32.mrb[36].mxu0  ;;  %v424_v30 = vld [vmem:[%s7221_s19 + $0x150] sm:$0xff] }
 0x12e   : > { %v6005_v41 = vpop.eup %6004  ;;  %v2013_v43 = vadd.f32 1.0, %v6003_v36  ;;  %6024 = vpow2.f32 %v4862_v35  ;;  %v7455_v25 = vadd.f32 %v5542_v1, %v419_v32  ;;  %5716 = vmatprep.mubr.msk.f32.mxu1 %vm510_vm0, %v2388_v34  ;;  %v1141_v44 = vpop.f32.mrb[37].mxu0 }
 0x12f   : > { %v6007_v28 = vpop.eup %6006  ;;  %6026 = vrcp.f32 %v2010_v7  ;;  %v7459_v46 = vadd.f32 %v1141_v44, %v418_v4  ;;  %v2391_v63 = vmul.f32 %v6005_v41, %v7372_v39 }
 0x130   : > { %v6009_v26 = vpop.eup %6008  ;;  %v2390_v49 = vmul.f32 %v6007_v28, %v7375_v62  ;;  %6028 = vrcp.f32 %v2013_v43  ;;  %v4864_v51 = vmul.f32 -1.442695, %v7455_v25  ;;  %v427_v43 = vld [vmem:[%s7221_s19 + $0x168] sm:$0xff] }
 0x131   : > { %v6011_v53 = vpop.eup %6010  ;;  %v2012_v24 = vadd.f32 1.0, %v6009_v26  ;;  %6030 = vpow2.f32 %v4861_v38  ;;  %v4863_v29 = vmul.f32 -1.442695, %v7459_v46  ;;  %5717 = vmatmul.mubr.msk.f32.gmra.mrb[20].mxu1 %vm510_vm0, %v2389_v60  ;;  %v5545_v21 = vpop.f32.mrb[38].mxu0 }
 0x132   : > { %v6013_v58 = vpop.eup %6012  ;;  %v2015_v59 = vadd.f32 1.0, %v6011_v53  ;;  %6032 = vpow2.f32 %v4864_v51  ;;  %v7467_v61 = vadd.f32 %v5545_v21, %v421_v47  ;;  %5719 = vmatprep.mubr.msk.f32.mxu1 %vm510_vm0, %v2390_v49  ;;  %v1151_v62 = vpop.f32.mrb[39].mxu0  ;;  %v426_v47 = vld [vmem:[%s7221_s19 + $0x160] sm:$0xff] }
 0x133   : > { %v6015_v42 = vpop.eup %6014  ;;  %6034 = vrcp.f32 %v2012_v24  ;;  %v7471_v0 = vadd.f32 %v1151_v62, %v420_v52  ;;  %v2393_v56 = vmul.f32 %v6013_v58, %v7384_v57 }
 0x134   : > { %v6017_v40 = vpop.eup %6016  ;;  %v2392_v2 = vmul.f32 %v6015_v42, %v7387_v8  ;;  %6036 = vrcp.f32 %v2015_v59  ;;  %v4866_v5 = vmul.f32 -1.442695, %v7467_v61  ;;  %v429_v59 = vld [vmem:[%s7221_s19 + $0x178] sm:$0xff] }
 0x135   : > { %v6019_v11 = vpop.eup %6018  ;;  %v2014_v45 = vadd.f32 1.0, %v6017_v40  ;;  %6038 = vpow2.f32 %v4863_v29  ;;  %v4865_v48 = vmul.f32 -1.442695, %v7471_v0  ;;  %5720 = vmatmul.mubr.msk.f32.gmra.mrb[22].mxu1 %vm510_vm0, %v2391_v63  ;;  %v5548_v39 = vpop.f32.mrb[40].mxu0 }
 0x136   : > { %v6021_v14 = vpop.eup %6020  ;;  %6040 = vpow2.f32 %v4866_v5  ;;  %v7479_v15 = vadd.f32 %v5548_v39, %v423_v6  ;;  %5722 = vmatprep.mubr.msk.f32.mxu1 %vm510_vm0, %v2392_v2  ;;  %v1161_v8 = vpop.f32.mrb[41].mxu0  ;;  %v2395_v1 = vmul.f32 %v6019_v11, %v7396_v13  ;;  %v428_v6 = vld [vmem:[%s7221_s19 + $0x170] sm:$0xff] }
 0x137   : > { %v6023_v17 = vpop.eup %6022  ;;  %6042 = vrcp.f32 %v2014_v45  ;;  %v2017_v18 = vadd.f32 1.0, %v6021_v14  ;;  %v7483_v20 = vadd.f32 %v1161_v8, %v422_v9 }
 0x138   : > { %v6025_v54 = vpop.eup %6024  ;;  %v2016_v23 = vadd.f32 1.0, %v6023_v17  ;;  %6044 = vpow2.f32 %v4865_v48  ;;  %v4868_v27 = vmul.f32 -1.442695, %v7479_v15  ;;  %v431_v17 = vld [vmem:[%s7221_s19 + $0x188] sm:$0xff] }
 0x139   : > { %v6027_v32 = vpop.eup %6026  ;;  %6046 = vrcp.f32 %v2017_v18  ;;  %v2019_v33 = vadd.f32 1.0, %v6025_v54  ;;  %v4867_v34 = vmul.f32 -1.442695, %v7483_v20  ;;  %5723 = vmatmul.mubr.msk.f32.gmra.mrb[24].mxu1 %vm510_vm0, %v2393_v56  ;;  %v5551_v57 = vpop.f32.mrb[42].mxu0 }
 0x13a   : > { %v6029_v35 = vpop.eup %6028  ;;  %v2394_v4 = vmul.f32 %v6027_v32, %v7399_v19  ;;  %6048 = vrcp.f32 %v2016_v23  ;;  %v7491_v36 = vadd.f32 %v5551_v57, %v425_v22  ;;  %v1171_v7 = vpop.f32.mrb[43].mxu0 }
 0x13b   : > { %v6031_v38 = vpop.eup %6030  ;;  %6050 = vrcp.f32 %v2019_v33  ;;  %v7494_v41 = vadd.f32 %v1171_v7, %v424_v30  ;;  %v2397_v21 = vmul.f32 %v6029_v35, %v7408_v10  ;;  %v433_v35 = vld [vmem:[%s7221_s19 + $0x198] sm:$0xff] }
 0x13c   : > { %v6033_v44 = vpop.eup %6032  ;;  %v2018_v28 = vadd.f32 1.0, %v6031_v38  ;;  %6052 = vpow2.f32 %v4868_v27  ;;  %v4870_v60 = vmul.f32 -1.442695, %v7491_v36  ;;  %5725 = vmatprep.mubr.msk.f32.mxu1 %vm510_vm0, %v2394_v4 }
 0x13d   : > { %v6035_v19 = vpop.eup %6034  ;;  %v2021_v26 = vadd.f32 1.0, %v6033_v44  ;;  %6054 = vpow2.f32 %v4867_v34  ;;  %v4869_v49 = vmul.f32 -1.442695, %v7494_v41  ;;  %5726 = vmatmul.mubr.msk.f32.gmra.mrb[26].mxu1 %vm510_vm0, %v2395_v1  ;;  %v5554_v13 = vpop.f32.mrb[44].mxu0  ;;  %v432_v1 = vld [vmem:[%s7221_s19 + $0x190] sm:$0xff] }
 0x13e   : > { %v6037_v51 = vpop.eup %6036  ;;  %v2396_v52 = vmul.f32 %v6035_v19, %v7411_v37  ;;  %6056 = vrcp.f32 %v2018_v28  ;;  %v7503_v53 = vadd.f32 %v5554_v13, %v427_v43  ;;  %v1181_v24 = vpop.f32.mrb[45].mxu0 }
 0x13f   : > { %v6039_v29 = vpop.eup %6038  ;;  %6058 = vrcp.f32 %v2021_v26  ;;  %v7506_v58 = vadd.f32 %v1181_v24, %v426_v47  ;;  %v2399_v39 = vmul.f32 %v6037_v51, %v7420_v50  ;;  %v435_v51 = vld [vmem:[%s7221_s19 + $0x1a8] sm:$0xff] }
 0x140   : > { %v6041_v62 = vpop.eup %6040  ;;  %v2020_v42 = vadd.f32 1.0, %v6039_v29  ;;  %6060 = vpow2.f32 %v4870_v60  ;;  %v4872_v63 = vmul.f32 -1.442695, %v7503_v53  ;;  %5728 = vmatprep.mubr.msk.f32.mxu1 %vm510_vm0, %v2396_v52 }
 0x141   : > { %v6043_v37 = vpop.eup %6042  ;;  %v2023_v40 = vadd.f32 1.0, %v6041_v62  ;;  %6062 = vpow2.f32 %v4869_v49  ;;  %5729 = vmatmul.mubr.msk.f32.gmra.mrb[28].mxu1 %vm510_vm0, %v2397_v21  ;;  %v5557_v2 = vpop.f32.mrb[46].mxu0  ;;  %v4871_v9 = vmul.f32 -1.442695, %v7506_v58  ;;  %v434_v21 = vld [vmem:[%s7221_s19 + $0x1a0] sm:$0xff] }
 0x142   : > { %v6045_v10 = vpop.eup %6044  ;;  %v2398_v5 = vmul.f32 %v6043_v37, %v7423_v55  ;;  %6064 = vrcp.f32 %v2020_v42  ;;  %v7515_v11 = vadd.f32 %v5557_v2, %v429_v59  ;;  %v1191_v45 = vpop.f32.mrb[47].mxu0  ;;  %v430_v55 = vld [vmem:[%s7221_s19 + $0x180] sm:$0xff] }
 0x143   : > { %v6047_v48 = vpop.eup %6046  ;;  %6066 = vrcp.f32 %v2023_v40  ;;  %v2022_v14 = vadd.f32 1.0, %v6045_v10  ;;  %v7518_v8 = vadd.f32 %v1191_v45, %v428_v6 }
 0x144   : > { %v6049_v56 = vpop.eup %6048  ;;  %6068 = vpow2.f32 %v4872_v63  ;;  %v4874_v18 = vmul.f32 -1.442695, %v7515_v11  ;;  %5731 = vmatprep.mubr.msk.f32.mxu1 %vm510_vm0, %v2398_v5  ;;  %v2401_v34 = vmul.f32 %v6047_v48, %v7432_v3  ;;  %v437_v5 = vld [vmem:[%s7221_s19 + $0x1b8] sm:$0xff] }
 0x145   : > { %v6051_v22 = vpop.eup %6050  ;;  %v2400_v54 = vmul.f32 %v6049_v56, %v7435_v12  ;;  %6070 = vrcp.f32 %v2022_v14  ;;  %v4873_v23 = vmul.f32 -1.442695, %v7518_v8  ;;  %5732 = vmatmul.mubr.msk.f32.gmra.mrb[30].mxu1 %vm510_vm0, %v2399_v39  ;;  %v5560_v50 = vpop.f32.mrb[48].mxu0  ;;  %v436_v39 = vld [vmem:[%s7221_s19 + $0x1b0] sm:$0xff] }
 0x146   : > { %v6053_v27 = vpop.eup %6052  ;;  %6072 = vpow2.f32 %v4871_v9  ;;  %v7527_v30 = vadd.f32 %v5560_v50, %v431_v17  ;;  %v1201_v32 = vpop.f32.mrb[49].mxu0  ;;  %v2403_v49 = vmul.f32 %v6051_v22, %v7443_v16 }
 0x147   : > { %v6055_v33 = vpop.eup %6054  ;;  %v2025_v57 = vadd.f32 1.0, %v6053_v27  ;;  %6074 = vpow2.f32 %v4874_v18  ;;  %5734 = vmatprep.mubr.msk.f32.mxu1 %vm510_vm0, %v2400_v54  ;;  %v7531_v12 = vadd.f32 %v1201_v32, %v430_v55  ;;  %v439_v32 = vld [vmem:[%s7221_s19 + $0x1c8] sm:$0xff] }
 0x148   : > { %v6057_v4 = vpop.eup %6056  ;;  %v2024_v7 = vadd.f32 1.0, %v6055_v33  ;;  %6076 = vpow2.f32 %v4873_v23  ;;  %v4876_v38 = vmul.f32 -1.442695, %v7527_v30 }
 0x149   : > { %v6059_v43 = vpop.eup %6058  ;;  %v2402_v44 = vmul.f32 %v6057_v4, %v7446_v31  ;;  %6078 = vrcp.f32 %v2025_v57  ;;  %v4875_v3 = vmul.f32 -1.442695, %v7531_v12  ;;  %5735 = vmatmul.mubr.msk.f32.gmra.mrb[32].mxu1 %vm510_vm0, %v2401_v34  ;;  %v5563_v28 = vpop.f32.mrb[50].mxu0  ;;  %v438_v57 = vld [vmem:[%s7221_s19 + $0x1c0] sm:$0xff] }
 0x14a   : > { %v6061_v60 = vpop.eup %6060  ;;  %6080 = vrcp.f32 %v2024_v7  ;;  %v7539_v47 = vadd.f32 %v5563_v28, %v433_v35  ;;  %v1211_v19 = vpop.f32.mrb[51].mxu0  ;;  %v2405_v2 = vmul.f32 %v6059_v43, %v7455_v25 }
 0x14b   : > { %v6063_v26 = vpop.eup %6062  ;;  %v2027_v13 = vadd.f32 1.0, %v6061_v60  ;;  %6082 = vpow2.f32 %v4876_v38  ;;  %5737 = vmatprep.mubr.msk.f32.mxu1 %vm510_vm0, %v2402_v44  ;;  %v7543_v31 = vadd.f32 %v1211_v19, %v432_v1  ;;  %v441_v19 = vld [vmem:[%s7221_s19 + $0x1d8] sm:$0xff] }
 0x14c   : > { %v6065_v52 = vpop.eup %6064  ;;  %v2026_v24 = vadd.f32 1.0, %v6063_v26  ;;  %6084 = vpow2.f32 %v4875_v3  ;;  %v4878_v29 = vmul.f32 -1.442695, %v7539_v47 }
 0x14d   : > { %v6067_v59 = vpop.eup %6066  ;;  %v2404_v62 = vmul.f32 %v6065_v52, %v7459_v46  ;;  %6086 = vrcp.f32 %v2027_v13  ;;  %v4877_v16 = vmul.f32 -1.442695, %v7543_v31  ;;  %5738 = vmatmul.mubr.msk.f32.gmra.mrb[34].mxu1 %vm510_vm0, %v2403_v49  ;;  %v5566_v42 = vpop.f32.mrb[52].mxu0  ;;  %v440_v13 = vld [vmem:[%s7221_s19 + $0x1d0] sm:$0xff] }
 0x14e   : > { %v6069_v63 = vpop.eup %6068  ;;  %6088 = vrcp.f32 %v2026_v24  ;;  %v7551_v6 = vadd.f32 %v5566_v42, %v435_v51  ;;  %v1221_v37 = vpop.f32.mrb[53].mxu0  ;;  %v2407_v23 = vmul.f32 %v6067_v59, %v7467_v61 }
 0x14f   : > { %v6071_v40 = vpop.eup %6070  ;;  %v2029_v10 = vadd.f32 1.0, %v6069_v63  ;;  %6090 = vpow2.f32 %v4878_v29  ;;  %5740 = vmatprep.mubr.msk.f32.mxu1 %vm510_vm0, %v2404_v62  ;;  %v7555_v46 = vadd.f32 %v1221_v37, %v434_v21  ;;  %v443_v37 = vld [vmem:[%s7221_s19 + $0x1e8] sm:$0xff] }
 0x150   : > { %v6073_v9 = vpop.eup %6072  ;;  %v2406_v45 = vmul.f32 %v6071_v40, %v7471_v0  ;;  %6092 = vpow2.f32 %v4877_v16  ;;  %v4880_v48 = vmul.f32 -1.442695, %v7551_v6 }
 0x151   : > { %v6075_v14 = vpop.eup %6074  ;;  %6094 = vrcp.f32 %v2029_v10  ;;  %v2028_v17 = vadd.f32 1.0, %v6073_v9  ;;  %5741 = vmatmul.mubr.msk.f32.gmra.mrb[36].mxu1 %vm510_vm0, %v2405_v2  ;;  %v5569_v25 = vpop.f32.mrb[54].mxu0  ;;  %v4879_v55 = vmul.f32 -1.442695, %v7555_v46  ;;  %v442_v10 = vld [vmem:[%s7221_s19 + $0x1e0] sm:$0xff] }
 0x152   : > { %v6077_v56 = vpop.eup %6076  ;;  %v2031_v18 = vadd.f32 1.0, %v6075_v14  ;;  %6096 = vpow2.f32 %v4880_v48  ;;  %v7563_v22 = vadd.f32 %v5569_v25, %v437_v5  ;;  %5743 = vmatprep.mubr.msk.f32.mxu1 %vm510_vm0, %v2406_v45  ;;  %v1231_v0 = vpop.f32.mrb[55].mxu0 }
 0x153   : > { %v6079_v54 = vpop.eup %6078  ;;  %6098 = vrcp.f32 %v2028_v17  ;;  %v2030_v50 = vadd.f32 1.0, %v6077_v56  ;;  %v7567_v27 = vadd.f32 %v1231_v0, %v436_v39 }
 0x154   : > { %v6081_v33 = vpop.eup %6080  ;;  %6100 = vrcp.f32 %v2031_v18  ;;  %v4882_v34 = vmul.f32 -1.442695, %v7563_v22  ;;  %v2409_v28 = vmul.f32 %v6079_v54, %v7479_v15 }
 0x155   : > { %v6083_v35 = vpop.eup %6082  ;;  %v2408_v4 = vmul.f32 %v6081_v33, %v7483_v20  ;;  %6102 = vrcp.f32 %v2030_v50  ;;  %5744 = vmatmul.mubr.msk.f32.gmra.mrb[38].mxu1 %vm510_vm0, %v2407_v23  ;;  %v5572_v7 = vpop.f32.mrb[56].mxu0  ;;  %v4881_v1 = vmul.f32 -1.442695, %v7567_v27 }
 0x156   : > { %v6085_v38 = vpop.eup %6084  ;;  %v2033_v61 = vadd.f32 1.0, %v6083_v35  ;;  %6104 = vpow2.f32 %v4879_v55  ;;  %v7575_v43 = vadd.f32 %v5572_v7, %v439_v32  ;;  %v1241_v44 = vpop.f32.mrb[57].mxu0  ;;  %v445_v55 = vld [vmem:[%s7221_s19 + $0x1f8] sm:$0xff] }
 0x157   : > { %v6087_v3 = vpop.eup %6086  ;;  %v2032_v60 = vadd.f32 1.0, %v6085_v38  ;;  %6106 = vpow2.f32 %v4882_v34  ;;  %5746 = vmatprep.mubr.msk.f32.mxu1 %vm510_vm0, %v2408_v4  ;;  %v7579_v20 = vadd.f32 %v1241_v44, %v438_v57 }
 0x158   : > { %v6089_v26 = vpop.eup %6088  ;;  %6108 = vrcp.f32 %v2033_v61  ;;  %v4884_v49 = vmul.f32 -1.442695, %v7575_v43  ;;  %v2411_v42 = vmul.f32 %v6087_v3, %v7491_v36  ;;  %v447_v61 = vld [vmem:[%s7221_s19 + $0x208] sm:$0xff] }
 0x159   : > { %v6091_v51 = vpop.eup %6090  ;;  %v2410_v52 = vmul.f32 %v6089_v26, %v7494_v41  ;;  %6110 = vrcp.f32 %v2032_v60  ;;  %5747 = vmatmul.mubr.msk.f32.gmra.mrb[40].mxu1 %vm510_vm0, %v2409_v28  ;;  %v5575_v15 = vpop.f32.mrb[58].mxu0  ;;  %v4883_v21 = vmul.f32 -1.442695, %v7579_v20  ;;  %v446_v28 = vld [vmem:[%s7221_s19 + $0x200] sm:$0xff] }
 0x15a   : > { %v6093_v24 = vpop.eup %6092  ;;  %v2035_v29 = vadd.f32 1.0, %v6091_v51  ;;  %6112 = vpow2.f32 %v4881_v1  ;;  %v7587_v59 = vadd.f32 %v5575_v15, %v441_v19  ;;  %v1251_v62 = vpop.f32.mrb[59].mxu0 }
 0x15b   : > { %v6095_v16 = vpop.eup %6094  ;;  %v2034_v63 = vadd.f32 1.0, %v6093_v24  ;;  %6114 = vpow2.f32 %v4884_v49  ;;  %5749 = vmatprep.mubr.msk.f32.mxu1 %vm510_vm0, %v2410_v52  ;;  %v7591_v41 = vadd.f32 %v1251_v62, %v440_v13 }
 0x15c   : > { %v6097_v40 = vpop.eup %6096  ;;  %6116 = vrcp.f32 %v2035_v29  ;;  %v4886_v2 = vmul.f32 -1.442695, %v7587_v59  ;;  %v2413_v56 = vmul.f32 %v6095_v16, %v7503_v53  ;;  %v449_v29 = vld [vmem:[%s7221_s19 + $0x218] sm:$0xff] }
 0x15d   : > { %v6099_v5 = vpop.eup %6098  ;;  %6118 = vrcp.f32 %v2034_v63  ;;  %v2037_v9 = vadd.f32 1.0, %v6097_v40  ;;  %v4885_v45 = vmul.f32 -1.442695, %v7591_v41  ;;  %5750 = vmatmul.mubr.msk.f32.gmra.mrb[42].mxu1 %vm510_vm0, %v2411_v42  ;;  %v5578_v36 = vpop.f32.mrb[60].mxu0  ;;  %v448_v42 = vld [vmem:[%s7221_s19 + $0x210] sm:$0xff] }
 0x15e   : > { %v6101_v48 = vpop.eup %6100  ;;  %v2412_v39 = vmul.f32 %v6099_v5, %v7506_v58  ;;  %6120 = vpow2.f32 %v4883_v21  ;;  %v7599_v14 = vadd.f32 %v5578_v36, %v443_v37  ;;  %v1261_v17 = vpop.f32.mrb[61].mxu0  ;;  %v444_v58 = vld [vmem:[%s7221_s19 + $0x1f0] sm:$0xff] }
 0x15f   : > { %v6103_v25 = vpop.eup %6102  ;;  %6122 = vrcp.f32 %v2037_v9  ;;  %v7602_v18 = vadd.f32 %v1261_v17, %v442_v10  ;;  %v2415_v7 = vmul.f32 %v6101_v48, %v7515_v11  ;;  %v451_v48 = vld [vmem:[%s7221_s19 + $0x228] sm:$0xff] }
 0x160   : > { %v6105_v0 = vpop.eup %6104  ;;  %v2414_v54 = vmul.f32 %v6103_v25, %v7518_v8  ;;  %6124 = vpow2.f32 %v4886_v2  ;;  %v4888_v23 = vmul.f32 -1.442695, %v7599_v14  ;;  %5752 = vmatprep.mubr.msk.f32.mxu1 %vm510_vm0, %v2412_v39 }
 0x161   : > { %v6107_v50 = vpop.eup %6106  ;;  %v2036_v32 = vadd.f32 1.0, %v6105_v0  ;;  %6126 = vpow2.f32 %v4885_v45  ;;  %v4887_v33 = vmul.f32 -1.442695, %v7602_v18  ;;  %5753 = vmatmul.mubr.msk.f32.gmra.mrb[44].mxu1 %vm510_vm0, %v2413_v56  ;;  %v5581_v53 = vpop.f32.mrb[62].mxu0  ;;  %v450_v56 = vld [vmem:[%s7221_s19 + $0x220] sm:$0xff] }
 0x162   : > { %v6109_v34 = vpop.eup %6108  ;;  %v2039_v57 = vadd.f32 1.0, %v6107_v50  ;;  %6128 = vpow2.f32 %v4888_v23  ;;  %v7611_v8 = vadd.f32 %v5581_v53, %v445_v55  ;;  %5755 = vmatprep.mubr.msk.f32.mxu1 %vm510_vm0, %v2414_v54  ;;  %v1271_v35 = vpop.f32.mrb[63].mxu0 }
 0x163   : > { %v6111_v4 = vpop.eup %6110  ;;  %6130 = vrcp.f32 %v2036_v32  ;;  %v7615_v38 = vadd.f32 %v1271_v35, %v444_v58  ;;  %v2417_v15 = vmul.f32 %v6109_v34, %v7527_v30 }
 0x164   : > { %v6113_v1 = vpop.eup %6112  ;;  %v2416_v44 = vmul.f32 %v6111_v4, %v7531_v12  ;;  %6132 = vrcp.f32 %v2039_v57  ;;  %v4890_v3 = vmul.f32 -1.442695, %v7611_v8  ;;  %v453_v57 = vld [vmem:[%s7221_s19 + $0x238] sm:$0xff] }
 0x165   : > { %v6115_v60 = vpop.eup %6114  ;;  %v2038_v19 = vadd.f32 1.0, %v6113_v1  ;;  %6134 = vpow2.f32 %v4887_v33  ;;  %v4889_v26 = vmul.f32 -1.442695, %v7615_v38  ;;  %5756 = vmatmul.mubr.msk.f32.gmra.mrb[46].mxu1 %vm510_vm0, %v2415_v7  ;;  %v5584_v11 = vpop.f32.mrb[64].mxu0 }
 0x166   : > { %v6117_v49 = vpop.eup %6116  ;;  %v2041_v13 = vadd.f32 1.0, %v6115_v60  ;;  %6136 = vpow2.f32 %v4890_v3  ;;  %v7623_v51 = vadd.f32 %v5584_v11, %v447_v61  ;;  %5758 = vmatprep.mubr.msk.f32.mxu1 %vm510_vm0, %v2416_v44  ;;  %v1281_v12 = vpop.f32.mrb[65].mxu0  ;;  %v452_v61 = vld [vmem:[%s7221_s19 + $0x230] sm:$0xff] }
 0x167   : > { %v6119_v52 = vpop.eup %6118  ;;  %6138 = vrcp.f32 %v2038_v19  ;;  %v7627_v24 = vadd.f32 %v1281_v12, %v446_v28  ;;  %v2419_v9 = vmul.f32 %v6117_v49, %v7539_v47 }
 0x168   : > { %v6121_v21 = vpop.eup %6120  ;;  %v2418_v62 = vmul.f32 %v6119_v52, %v7543_v31  ;;  %6140 = vrcp.f32 %v2041_v13  ;;  %v4892_v16 = vmul.f32 -1.442695, %v7623_v51  ;;  %v455_v13 = vld [vmem:[%s7221_s19 + $0x248] sm:$0xff] }
 0x169   : > { %v6123_v63 = vpop.eup %6122  ;;  %v2040_v37 = vadd.f32 1.0, %v6121_v21  ;;  %6142 = vpow2.f32 %v4889_v26  ;;  %v4891_v40 = vmul.f32 -1.442695, %v7627_v24  ;;  %5759 = vmatmul.mubr.msk.f32.gmra.mrb[48].mxu1 %vm510_vm0, %v2417_v15  ;;  %v5587_v30 = vpop.f32.mrb[66].mxu0 }
 0x16a   : > { %v6125_v2 = vpop.eup %6124  ;;  %6144 = vpow2.f32 %v4892_v16  ;;  %v7635_v10 = vadd.f32 %v5587_v30, %v449_v29  ;;  %5761 = vmatprep.mubr.msk.f32.mxu1 %vm510_vm0, %v2418_v62  ;;  %v1291_v31 = vpop.f32.mrb[67].mxu0  ;;  %v2421_v53 = vmul.f32 %v6123_v63, %v7551_v6  ;;  %v454_v29 = vld [vmem:[%s7221_s19 + $0x240] sm:$0xff] }
 0x16b   : > { %v6127_v5 = vpop.eup %6126  ;;  %6146 = vrcp.f32 %v2040_v37  ;;  %v2043_v45 = vadd.f32 1.0, %v6125_v2  ;;  %v7639_v36 = vadd.f32 %v1291_v31, %v448_v42 }
 0x16c   : > { %v6129_v39 = vpop.eup %6128  ;;  %v2042_v17 = vadd.f32 1.0, %v6127_v5  ;;  %6148 = vpow2.f32 %v4891_v40  ;;  %v4894_v25 = vmul.f32 -1.442695, %v7635_v10  ;;  %v457_v5 = vld [vmem:[%s7221_s19 + $0x258] sm:$0xff] }
 0x16d   : > { %v6131_v55 = vpop.eup %6130  ;;  %6150 = vrcp.f32 %v2043_v45  ;;  %v2045_v0 = vadd.f32 1.0, %v6129_v39  ;;  %v4893_v54 = vmul.f32 -1.442695, %v7639_v36  ;;  %5762 = vmatmul.mubr.msk.f32.gmra.mrb[50].mxu1 %vm510_vm0, %v2419_v9  ;;  %v5590_v47 = vpop.f32.mrb[68].mxu0 }
 0x16e   : > { %v6133_v23 = vpop.eup %6132  ;;  %v2420_v58 = vmul.f32 %v6131_v55, %v7555_v46  ;;  %6152 = vrcp.f32 %v2042_v17  ;;  %v7647_v50 = vadd.f32 %v5590_v47, %v451_v48  ;;  %v1301_v32 = vpop.f32.mrb[69].mxu0 }
 0x16f   : > { %v6135_v33 = vpop.eup %6134  ;;  %6154 = vrcp.f32 %v2045_v0  ;;  %v7650_v34 = vadd.f32 %v1301_v32, %v450_v56  ;;  %v2423_v11 = vmul.f32 %v6133_v23, %v7563_v22  ;;  %v459_v23 = vld [vmem:[%s7221_s19 + $0x268] sm:$0xff] }
 0x170   : > { %v6137_v35 = vpop.eup %6136  ;;  %v2044_v4 = vadd.f32 1.0, %v6135_v33  ;;  %6156 = vpow2.f32 %v4894_v25  ;;  %v4896_v7 = vmul.f32 -1.442695, %v7647_v50  ;;  %5764 = vmatprep.mubr.msk.f32.mxu1 %vm510_vm0, %v2420_v58 }
 0x171   : > { %v6139_v46 = vpop.eup %6138  ;;  %v2047_v1 = vadd.f32 1.0, %v6137_v35  ;;  %6158 = vpow2.f32 %v4893_v54  ;;  %v4895_v44 = vmul.f32 -1.442695, %v7650_v34  ;;  %5765 = vmatmul.mubr.msk.f32.gmra.mrb[52].mxu1 %vm510_vm0, %v2421_v53  ;;  %v5593_v6 = vpop.f32.mrb[70].mxu0  ;;  %v458_v53 = vld [vmem:[%s7221_s19 + $0x260] sm:$0xff] }
 0x172   : > { %v6141_v3 = vpop.eup %6140  ;;  %v2422_v28 = vmul.f32 %v6139_v46, %v7567_v27  ;;  %6160 = vrcp.f32 %v2044_v4  ;;  %v7659_v60 = vadd.f32 %v5593_v6, %v453_v57  ;;  %v1311_v19 = vpop.f32.mrb[71].mxu0 }
 0x173   : > { %v6143_v26 = vpop.eup %6142  ;;  %6162 = vrcp.f32 %v2047_v1  ;;  %v7662_v49 = vadd.f32 %v1311_v19, %v452_v61  ;;  %v2425_v30 = vmul.f32 %v6141_v3, %v7575_v43  ;;  %v461_v3 = vld [vmem:[%s7221_s19 + $0x278] sm:$0xff] }
 0x174   : > { %v6145_v12 = vpop.eup %6144  ;;  %v2046_v52 = vadd.f32 1.0, %v6143_v26  ;;  %6164 = vpow2.f32 %v4896_v7  ;;  %v4898_v15 = vmul.f32 -1.442695, %v7659_v60  ;;  %5767 = vmatprep.mubr.msk.f32.mxu1 %vm510_vm0, %v2422_v28 }
 0x175   : > { %v6147_v27 = vpop.eup %6146  ;;  %v2049_v21 = vadd.f32 1.0, %v6145_v12  ;;  %6166 = vpow2.f32 %v4895_v44  ;;  %5768 = vmatmul.mubr.msk.f32.gmra.mrb[54].mxu1 %vm510_vm0, %v2423_v11  ;;  %v5596_v62 = vpop.f32.mrb[72].mxu0  ;;  %v4897_v42 = vmul.f32 -1.442695, %v7662_v49  ;;  %v460_v11 = vld [vmem:[%s7221_s19 + $0x270] sm:$0xff] }
 0x176   : > { %v6149_v22 = vpop.eup %6148  ;;  %v2424_v16 = vmul.f32 %v6147_v27, %v7579_v20  ;;  %6168 = vrcp.f32 %v2046_v52  ;;  %v7671_v63 = vadd.f32 %v5596_v62, %v455_v13  ;;  %v1321_v37 = vpop.f32.mrb[73].mxu0  ;;  %v456_v20 = vld [vmem:[%s7221_s19 + $0x250] sm:$0xff] }
 0x177   : > { %v6151_v40 = vpop.eup %6150  ;;  %6170 = vrcp.f32 %v2049_v21  ;;  %v2048_v2 = vadd.f32 1.0, %v6149_v22  ;;  %v7674_v31 = vadd.f32 %v1321_v37, %v454_v29 }
 0x178   : > { %v6153_v9 = vpop.eup %6152  ;;  %6172 = vpow2.f32 %v4898_v15  ;;  %v4900_v45 = vmul.f32 -1.442695, %v7671_v63  ;;  %5770 = vmatprep.mubr.msk.f32.mxu1 %vm510_vm0, %v2424_v16  ;;  %v2427_v54 = vmul.f32 %v6151_v40, %v7587_v59  ;;  %v463_v16 = vld [vmem:[%s7221_s19 + $0x288] sm:$0xff] }
 0x179   : > { %v6155_v48 = vpop.eup %6154  ;;  %v2426_v39 = vmul.f32 %v6153_v9, %v7591_v41  ;;  %6174 = vrcp.f32 %v2048_v2  ;;  %v4899_v17 = vmul.f32 -1.442695, %v7674_v31  ;;  %5771 = vmatmul.mubr.msk.f32.gmra.mrb[56].mxu1 %vm510_vm0, %v2425_v30  ;;  %v5599_v43 = vpop.f32.mrb[74].mxu0  ;;  %v462_v30 = vld [vmem:[%s7221_s19 + $0x280] sm:$0xff] }
 0x17a   : > { %v6157_v25 = vpop.eup %6156  ;;  %6176 = vpow2.f32 %v4897_v42  ;;  %v7683_v56 = vadd.f32 %v5599_v43, %v457_v5  ;;  %v1331_v55 = vpop.f32.mrb[75].mxu0  ;;  %v2429_v44 = vmul.f32 %v6155_v48, %v7599_v14 }
 0x17b   : > { %v6159_v0 = vpop.eup %6158  ;;  %v2051_v47 = vadd.f32 1.0, %v6157_v25  ;;  %6178 = vpow2.f32 %v4900_v45  ;;  %5773 = vmatprep.mubr.msk.f32.mxu1 %vm510_vm0, %v2426_v39  ;;  %v7687_v41 = vadd.f32 %v1331_v55, %v456_v20  ;;  %v465_v55 = vld [vmem:[%s7221_s19 + $0x298] sm:$0xff] }
 0x17c   : > { %v6161_v58 = vpop.eup %6160  ;;  %v2050_v32 = vadd.f32 1.0, %v6159_v0  ;;  %6180 = vpow2.f32 %v4899_v17  ;;  %v4902_v33 = vmul.f32 -1.442695, %v7683_v56 }
 0x17d   : > { %v6163_v57 = vpop.eup %6162  ;;  %v2428_v35 = vmul.f32 %v6161_v58, %v7602_v18  ;;  %6182 = vrcp.f32 %v2051_v47  ;;  %v4901_v59 = vmul.f32 -1.442695, %v7687_v41  ;;  %5774 = vmatmul.mubr.msk.f32.gmra.mrb[58].mxu1 %vm510_vm0, %v2427_v54  ;;  %v5602_v4 = vpop.f32.mrb[76].mxu0  ;;  %v464_v47 = vld [vmem:[%s7221_s19 + $0x290] sm:$0xff] }
 0x17e   : > { %v6165_v7 = vpop.eup %6164  ;;  %6184 = vrcp.f32 %v2050_v32  ;;  %v7695_v61 = vadd.f32 %v5602_v4, %v459_v23  ;;  %v1341_v46 = vpop.f32.mrb[77].mxu0  ;;  %v2431_v62 = vmul.f32 %v6163_v57, %v7611_v8 }
 0x17f   : > { %v6167_v1 = vpop.eup %6166  ;;  %v2053_v6 = vadd.f32 1.0, %v6165_v7  ;;  %6186 = vpow2.f32 %v4902_v33  ;;  %5776 = vmatprep.mubr.msk.f32.mxu1 %vm510_vm0, %v2428_v35  ;;  %v7699_v18 = vadd.f32 %v1341_v46, %v458_v53  ;;  %v467_v46 = vld [vmem:[%s7221_s19 + $0x2a8] sm:$0xff] }
 0x180   : > { %v6169_v28 = vpop.eup %6168  ;;  %v2052_v19 = vadd.f32 1.0, %v6167_v1  ;;  %6188 = vpow2.f32 %v4901_v59  ;;  %v4904_v26 = vmul.f32 -1.442695, %v7695_v61 }
 0x181   : > { %v6171_v13 = vpop.eup %6170  ;;  %v2430_v12 = vmul.f32 %v6169_v28, %v7615_v38  ;;  %6190 = vrcp.f32 %v2053_v6  ;;  %v4903_v14 = vmul.f32 -1.442695, %v7699_v18  ;;  %5777 = vmatmul.mubr.msk.f32.gmra.mrb[60].mxu1 %vm510_vm0, %v2429_v44  ;;  %v5605_v52 = vpop.f32.mrb[78].mxu0  ;;  %v466_v6 = vld [vmem:[%s7221_s19 + $0x2a0] sm:$0xff] }
 0x182   : > { %v6173_v15 = vpop.eup %6172  ;;  %6192 = vrcp.f32 %v2052_v19  ;;  %v7707_v29 = vadd.f32 %v5605_v52, %v461_v3  ;;  %v1351_v27 = vpop.f32.mrb[79].mxu0  ;;  %v2433_v17 = vmul.f32 %v6171_v13, %v7623_v51 }
 0x183   : > { %v6175_v21 = vpop.eup %6174  ;;  %v2055_v22 = vadd.f32 1.0, %v6173_v15  ;;  %6194 = vpow2.f32 %v4904_v26  ;;  %5779 = vmatprep.mubr.msk.f32.mxu1 %vm510_vm0, %v2430_v12  ;;  %v7711_v38 = vadd.f32 %v1351_v27, %v460_v11  ;;  %v469_v27 = vld [vmem:[%s7221_s19 + $0x2b8] sm:$0xff] }
 0x184   : > { %v6177_v42 = vpop.eup %6176  ;;  %v2432_v37 = vmul.f32 %v6175_v21, %v7627_v24  ;;  %6196 = vpow2.f32 %v4903_v14  ;;  %v4906_v40 = vmul.f32 -1.442695, %v7707_v29 }
 0x185   : > { %v6179_v2 = vpop.eup %6178  ;;  %6198 = vrcp.f32 %v2055_v22  ;;  %v2054_v5 = vadd.f32 1.0, %v6177_v42  ;;  %5780 = vmatmul.mubr.msk.f32.gmra.mrb[62].mxu1 %vm510_vm0, %v2431_v62  ;;  %v5608_v8 = vpop.f32.mrb[80].mxu0  ;;  %v4905_v20 = vmul.f32 -1.442695, %v7711_v38  ;;  %v468_v22 = vld [vmem:[%s7221_s19 + $0x2b0] sm:$0xff] }
 0x186   : > { %v6181_v9 = vpop.eup %6180  ;;  %v2057_v45 = vadd.f32 1.0, %v6179_v2  ;;  %6200 = vpow2.f32 %v4906_v40  ;;  %v7719_v48 = vadd.f32 %v5608_v8, %v463_v16  ;;  %5782 = vmatprep.mubr.msk.f32.mxu1 %vm510_vm0, %v2432_v37  ;;  %v1361_v24 = vpop.f32.mrb[81].mxu0 }
 0x187   : > { %v6183_v39 = vpop.eup %6182  ;;  %6202 = vrcp.f32 %v2054_v5  ;;  %v2056_v43 = vadd.f32 1.0, %v6181_v9  ;;  %v7723_v25 = vadd.f32 %v1361_v24, %v462_v30 }
 0x188   : > { %v6185_v0 = vpop.eup %6184  ;;  %6204 = vrcp.f32 %v2057_v45  ;;  %v4908_v54 = vmul.f32 -1.442695, %v7719_v48  ;;  %v2435_v4 = vmul.f32 %v6183_v39, %v7635_v10 }
 0x189   : > { %v6187_v23 = vpop.eup %6186  ;;  %v2434_v58 = vmul.f32 %v6185_v0, %v7639_v36  ;;  %6206 = vrcp.f32 %v2056_v43  ;;  %5783 = vmatmul.mubr.msk.f32.gmra.mrb[64].mxu1 %vm510_vm0, %v2433_v17  ;;  %v5611_v32 = vpop.f32.mrb[82].mxu0  ;;  %v4907_v53 = vmul.f32 -1.442695, %v7723_v25 }
 0x18a   : > { %v6189_v33 = vpop.eup %6188  ;;  %v2059_v51 = vadd.f32 1.0, %v6187_v23  ;;  %6208 = vpow2.f32 %v4905_v20  ;;  %v7731_v57 = vadd.f32 %v5611_v32, %v465_v55  ;;  %v1371_v35 = vpop.f32.mrb[83].mxu0  ;;  %v471_v20 = vld [vmem:[%s7221_s19 + $0x2c8] sm:$0xff] }
 0x18b   : > { %v6191_v59 = vpop.eup %6190  ;;  %v2058_v7 = vadd.f32 1.0, %v6189_v33  ;;  %6210 = vpow2.f32 %v4908_v54  ;;  %5785 = vmatprep.mubr.msk.f32.mxu1 %vm510_vm0, %v2434_v58  ;;  %v7735_v36 = vadd.f32 %v1371_v35, %v464_v47 }
 0x18c   : > { %v6193_v1 = vpop.eup %6192  ;;  %6212 = vrcp.f32 %v2059_v51  ;;  %v4910_v44 = vmul.f32 -1.442695, %v7731_v57  ;;  %v2437_v52 = vmul.f32 %v6191_v59, %v7647_v50  ;;  %v473_v51 = vld [vmem:[%s7221_s19 + $0x2d8] sm:$0xff] }
 0x18d   : > { %v6195_v3 = vpop.eup %6194  ;;  %v2436_v28 = vmul.f32 %v6193_v1, %v7650_v34  ;;  %6214 = vrcp.f32 %v2058_v7  ;;  %5786 = vmatmul.mubr.msk.f32.gmra.mrb[66].mxu1 %vm510_vm0, %v2435_v4  ;;  %v5614_v10 = vpop.f32.mrb[84].mxu0  ;;  %v4909_v11 = vmul.f32 -1.442695, %v7735_v36  ;;  %v472_v4 = vld [vmem:[%s7221_s19 + $0x2d0] sm:$0xff] }
 0x18e   : > { %v6197_v19 = vpop.eup %6196  ;;  %v2061_v26 = vadd.f32 1.0, %v6195_v3  ;;  %6216 = vpow2.f32 %v4907_v53  ;;  %v7743_v13 = vadd.f32 %v5614_v10, %v467_v46  ;;  %v1381_v12 = vpop.f32.mrb[85].mxu0 }
 0x18f   : > { %v6199_v14 = vpop.eup %6198  ;;  %v2060_v15 = vadd.f32 1.0, %v6197_v19  ;;  %6218 = vpow2.f32 %v4910_v44  ;;  %5788 = vmatprep.mubr.msk.f32.mxu1 %vm510_vm0, %v2436_v28  ;;  %v7747_v34 = vadd.f32 %v1381_v12, %v466_v6 }
 0x190   : > { %v6201_v21 = vpop.eup %6200  ;;  %6220 = vrcp.f32 %v2061_v26  ;;  %v4912_v62 = vmul.f32 -1.442695, %v7743_v13  ;;  %v2439_v9 = vmul.f32 %v6199_v14, %v7659_v60  ;;  %v475_v26 = vld [vmem:[%s7221_s19 + $0x2e8] sm:$0xff] }
 0x191   : > { %v6203_v16 = vpop.eup %6202  ;;  %6222 = vrcp.f32 %v2060_v15  ;;  %v2063_v42 = vadd.f32 1.0, %v6201_v21  ;;  %v4911_v37 = vmul.f32 -1.442695, %v7747_v34  ;;  %5789 = vmatmul.mubr.msk.f32.gmra.mrb[68].mxu1 %vm510_vm0, %v2437_v52  ;;  %v5617_v50 = vpop.f32.mrb[86].mxu0  ;;  %v474_v52 = vld [vmem:[%s7221_s19 + $0x2e0] sm:$0xff] }
 0x192   : > { %v6205_v40 = vpop.eup %6204  ;;  %v2438_v30 = vmul.f32 %v6203_v16, %v7662_v49  ;;  %6224 = vpow2.f32 %v4909_v11  ;;  %v7755_v2 = vadd.f32 %v5617_v50, %v469_v27  ;;  %v1391_v5 = vpop.f32.mrb[87].mxu0  ;;  %v470_v49 = vld [vmem:[%s7221_s19 + $0x2c0] sm:$0xff] }
 0x193   : > { %v6207_v8 = vpop.eup %6206  ;;  %6226 = vrcp.f32 %v2063_v42  ;;  %v7758_v45 = vadd.f32 %v1391_v5, %v468_v22  ;;  %v2441_v32 = vmul.f32 %v6205_v40, %v7671_v63  ;;  %v477_v40 = vld [vmem:[%s7221_s19 + $0x2f8] sm:$0xff] }
 0x194   : > { %v6209_v24 = vpop.eup %6208  ;;  %v2440_v39 = vmul.f32 %v6207_v8, %v7674_v31  ;;  %6228 = vpow2.f32 %v4912_v62  ;;  %v4914_v17 = vmul.f32 -1.442695, %v7755_v2  ;;  %5791 = vmatprep.mubr.msk.f32.mxu1 %vm510_vm0, %v2438_v30 }
 0x195   : > { %v6211_v43 = vpop.eup %6210  ;;  %v2062_v55 = vadd.f32 1.0, %v6209_v24  ;;  %6230 = vpow2.f32 %v4911_v37  ;;  %v4913_v0 = vmul.f32 -1.442695, %v7758_v45  ;;  %5792 = vmatmul.mubr.msk.f32.gmra.mrb[70].mxu1 %vm510_vm0, %v2439_v9  ;;  %v5620_v60 = vpop.f32.mrb[88].mxu0  ;;  %v476_v9 = vld [vmem:[%s7221_s19 + $0x2f0] sm:$0xff] }
 0x196   : > { %v6213_v54 = vpop.eup %6212  ;;  %v2065_v47 = vadd.f32 1.0, %v6211_v43  ;;  %6232 = vpow2.f32 %v4914_v17  ;;  %v7767_v31 = vadd.f32 %v5620_v60, %v471_v20  ;;  %5794 = vmatprep.mubr.msk.f32.mxu1 %vm510_vm0, %v2440_v39  ;;  %v1401_v23 = vpop.f32.mrb[89].mxu0 }
 0x197   : > { %v6215_v58 = vpop.eup %6214  ;;  %6234 = vrcp.f32 %v2062_v55  ;;  %v7771_v33 = vadd.f32 %v1401_v23, %v470_v49  ;;  %v2443_v10 = vmul.f32 %v6213_v54, %v7683_v56 }
 0x198   : > { %v6217_v53 = vpop.eup %6216  ;;  %v2442_v35 = vmul.f32 %v6215_v58, %v7687_v41  ;;  %6236 = vrcp.f32 %v2065_v47  ;;  %v4916_v59 = vmul.f32 -1.442695, %v7767_v31  ;;  %v479_v47 = vld [vmem:[%s7221_s19 + $0x308] sm:$0xff] }
 0x199   : > { %v6219_v7 = vpop.eup %6218  ;;  %v2064_v46 = vadd.f32 1.0, %v6217_v53  ;;  %6238 = vpow2.f32 %v4913_v0  ;;  %v4915_v1 = vmul.f32 -1.442695, %v7771_v33  ;;  %5795 = vmatmul.mubr.msk.f32.gmra.mrb[72].mxu1 %vm510_vm0, %v2441_v32  ;;  %v5623_v63 = vpop.f32.mrb[90].mxu0 }
 0x19a   : > { %v6221_v44 = vpop.eup %6220  ;;  %v2067_v6 = vadd.f32 1.0, %v6219_v7  ;;  %6240 = vpow2.f32 %v4916_v59  ;;  %v7779_v3 = vadd.f32 %v5623_v63, %v473_v51  ;;  %5797 = vmatprep.mubr.msk.f32.mxu1 %vm510_vm0, %v2442_v35  ;;  %v1411_v41 = vpop.f32.mrb[91].mxu0  ;;  %v478_v51 = vld [vmem:[%s7221_s19 + $0x300] sm:$0xff] }
 0x19b   : > { %v6223_v28 = vpop.eup %6222  ;;  %6242 = vrcp.f32 %v2064_v46  ;;  %v7783_v19 = vadd.f32 %v1411_v41, %v472_v4  ;;  %v2445_v42 = vmul.f32 %v6221_v44, %v7695_v61 }
 0x19c   : > { %v6225_v11 = vpop.eup %6224  ;;  %v2444_v12 = vmul.f32 %v6223_v28, %v7699_v18  ;;  %6244 = vrcp.f32 %v2067_v6  ;;  %v4918_v14 = vmul.f32 -1.442695, %v7779_v3  ;;  %v481_v6 = vld [vmem:[%s7221_s19 + $0x318] sm:$0xff] }
 0x19d   : > { %v6227_v15 = vpop.eup %6226  ;;  %v2066_v27 = vadd.f32 1.0, %v6225_v11  ;;  %6246 = vpow2.f32 %v4915_v1  ;;  %v4917_v21 = vmul.f32 -1.442695, %v7783_v19  ;;  %5798 = vmatmul.mubr.msk.f32.gmra.mrb[74].mxu1 %vm510_vm0, %v2443_v10  ;;  %v5626_v56 = vpop.f32.mrb[92].mxu0 }
 0x19e   : > { %v6229_v62 = vpop.eup %6228  ;;  %6248 = vpow2.f32 %v4918_v14  ;;  %v7791_v22 = vadd.f32 %v5626_v56, %v475_v26  ;;  %5800 = vmatprep.mubr.msk.f32.mxu1 %vm510_vm0, %v2444_v12  ;;  %v1421_v18 = vpop.f32.mrb[93].mxu0  ;;  %v2447_v60 = vmul.f32 %v6227_v15, %v7707_v29  ;;  %v480_v26 = vld [vmem:[%s7221_s19 + $0x310] sm:$0xff] }
 0x19f   : > { %v6231_v16 = vpop.eup %6230  ;;  %6250 = vrcp.f32 %v2066_v27  ;;  %v2069_v37 = vadd.f32 1.0, %v6229_v62  ;;  %v7795_v50 = vadd.f32 %v1421_v18, %v474_v52 }
 0x1a0   : > { %v6233_v30 = vpop.eup %6232  ;;  %v2068_v5 = vadd.f32 1.0, %v6231_v16  ;;  %6252 = vpow2.f32 %v4917_v21  ;;  %v4920_v8 = vmul.f32 -1.442695, %v7791_v22  ;;  %v483_v16 = vld [vmem:[%s7221_s19 + $0x328] sm:$0xff] }
 0x1a1   : > { %v6235_v20 = vpop.eup %6234  ;;  %6254 = vrcp.f32 %v2069_v37  ;;  %v2071_v24 = vadd.f32 1.0, %v6233_v30  ;;  %v4919_v39 = vmul.f32 -1.442695, %v7795_v50  ;;  %5801 = vmatmul.mubr.msk.f32.gmra.mrb[76].mxu1 %vm510_vm0, %v2445_v42  ;;  %v5629_v61 = vpop.f32.mrb[94].mxu0 }
 0x1a2   : > { %v6237_v17 = vpop.eup %6236  ;;  %v2446_v49 = vmul.f32 %v6235_v20, %v7711_v38  ;;  %6256 = vrcp.f32 %v2068_v5  ;;  %v7803_v43 = vadd.f32 %v5629_v61, %v477_v40  ;;  %v1431_v55 = vpop.f32.mrb[95].mxu0 }
 0x1a3   : > { %v6239_v0 = vpop.eup %6238  ;;  %6258 = vrcp.f32 %v2071_v24  ;;  %v7806_v54 = vadd.f32 %v1431_v55, %v476_v9  ;;  %v2449_v63 = vmul.f32 %v6237_v17, %v7719_v48  ;;  %v485_v17 = vld [vmem:[%s7221_s19 + $0x338] sm:$0xff] }
 0x1a4   : > { %v6241_v23 = vpop.eup %6240  ;;  %v2070_v58 = vadd.f32 1.0, %v6239_v0  ;;  %6260 = vpow2.f32 %v4920_v8  ;;  %v4922_v32 = vmul.f32 -1.442695, %v7803_v43  ;;  %5803 = vmatprep.mubr.msk.f32.mxu1 %vm510_vm0, %v2446_v49 }
 0x1a5   : > { %v6243_v38 = vpop.eup %6242  ;;  %v2073_v53 = vadd.f32 1.0, %v6241_v23  ;;  %6262 = vpow2.f32 %v4919_v39  ;;  %v4921_v35 = vmul.f32 -1.442695, %v7806_v54  ;;  %5804 = vmatmul.mubr.msk.f32.gmra.mrb[78].mxu1 %vm510_vm0, %v2447_v60  ;;  %v5632_v29 = vpop.f32.mrb[96].mxu0  ;;  %v484_v60 = vld [vmem:[%s7221_s19 + $0x330] sm:$0xff] }
 0x1a6   : > { %v6245_v59 = vpop.eup %6244  ;;  %v2448_v4 = vmul.f32 %v6243_v38, %v7723_v25  ;;  %6264 = vrcp.f32 %v2070_v58  ;;  %v7815_v7 = vadd.f32 %v5632_v29, %v479_v47  ;;  %v1441_v46 = vpop.f32.mrb[97].mxu0 }
 0x1a7   : > { %v6247_v1 = vpop.eup %6246  ;;  %6266 = vrcp.f32 %v2073_v53  ;;  %v7818_v44 = vadd.f32 %v1441_v46, %v478_v51  ;;  %v2451_v56 = vmul.f32 %v6245_v59, %v7731_v57  ;;  %v487_v59 = vld [vmem:[%s7221_s19 + $0x348] sm:$0xff] }
 0x1a8   : > { %v6249_v41 = vpop.eup %6248  ;;  %v2072_v28 = vadd.f32 1.0, %v6247_v1  ;;  %6268 = vpow2.f32 %v4922_v32  ;;  %v4924_v10 = vmul.f32 -1.442695, %v7815_v7  ;;  %5806 = vmatprep.mubr.msk.f32.mxu1 %vm510_vm0, %v2448_v4 }
 0x1a9   : > { %v6251_v25 = vpop.eup %6250  ;;  %v2075_v11 = vadd.f32 1.0, %v6249_v41  ;;  %6270 = vpow2.f32 %v4921_v35  ;;  %5807 = vmatmul.mubr.msk.f32.gmra.mrb[80].mxu1 %vm510_vm0, %v2449_v63  ;;  %v5635_v12 = vpop.f32.mrb[98].mxu0  ;;  %v4923_v52 = vmul.f32 -1.442695, %v7818_v44  ;;  %v486_v63 = vld [vmem:[%s7221_s19 + $0x340] sm:$0xff] }
 0x1aa   : > { %v6253_v48 = vpop.eup %6252  ;;  %v2450_v14 = vmul.f32 %v6251_v25, %v7735_v36  ;;  %6272 = vrcp.f32 %v2072_v28  ;;  %v7827_v15 = vadd.f32 %v5635_v12, %v481_v6  ;;  %v1451_v27 = vpop.f32.mrb[99].mxu0  ;;  %v482_v36 = vld [vmem:[%s7221_s19 + $0x320] sm:$0xff] }
 0x1ab   : > { %v6255_v21 = vpop.eup %6254  ;;  %6274 = vrcp.f32 %v2075_v11  ;;  %v2074_v62 = vadd.f32 1.0, %v6253_v48  ;;  %v7830_v18 = vadd.f32 %v1451_v27, %v480_v26 }
 0x1ac   : > { %v6257_v42 = vpop.eup %6256  ;;  %6276 = vpow2.f32 %v4924_v10  ;;  %v4926_v37 = vmul.f32 -1.442695, %v7827_v15  ;;  %5809 = vmatprep.mubr.msk.f32.mxu1 %vm510_vm0, %v2450_v14  ;;  %v2453_v39 = vmul.f32 %v6255_v21, %v7743_v13  ;;  %v489_v14 = vld [vmem:[%s7221_s19 + $0x358] sm:$0xff] }
 0x1ad   : > { %v6259_v40 = vpop.eup %6258  ;;  %v2452_v30 = vmul.f32 %v6257_v42, %v7747_v34  ;;  %6278 = vrcp.f32 %v2074_v62  ;;  %v4925_v5 = vmul.f32 -1.442695, %v7830_v18  ;;  %5810 = vmatmul.mubr.msk.f32.gmra.mrb[82].mxu1 %vm510_vm0, %v2451_v56  ;;  %v5638_v57 = vpop.f32.mrb[100].mxu0  ;;  %v488_v56 = vld [vmem:[%s7221_s19 + $0x350] sm:$0xff] }
 0x1ae   : > { %v6261_v8 = vpop.eup %6260  ;;  %6280 = vpow2.f32 %v4923_v52  ;;  %v7839_v9 = vadd.f32 %v5638_v57, %v483_v16  ;;  %v1461_v20 = vpop.f32.mrb[101].mxu0  ;;  %v2455_v35 = vmul.f32 %v6259_v40, %v7755_v2 }
 0x1af   : > { %v6263_v24 = vpop.eup %6262  ;;  %v2077_v61 = vadd.f32 1.0, %v6261_v8  ;;  %6282 = vpow2.f32 %v4926_v37  ;;  %5812 = vmatprep.mubr.msk.f32.mxu1 %vm510_vm0, %v2452_v30  ;;  %v7843_v34 = vadd.f32 %v1461_v20, %v482_v36  ;;  %v491_v20 = vld [vmem:[%s7221_s19 + $0x368] sm:$0xff] }
 0x1b0   : > { %v6265_v49 = vpop.eup %6264  ;;  %v2076_v55 = vadd.f32 1.0, %v6263_v24  ;;  %6284 = vpow2.f32 %v4925_v5  ;;  %v4928_v0 = vmul.f32 -1.442695, %v7839_v9 }
 0x1b1   : > { %v6267_v47 = vpop.eup %6266  ;;  %v2454_v23 = vmul.f32 %v6265_v49, %v7758_v45  ;;  %6286 = vrcp.f32 %v2077_v61  ;;  %v4927_v13 = vmul.f32 -1.442695, %v7843_v34  ;;  %5813 = vmatmul.mubr.msk.f32.gmra.mrb[84].mxu1 %vm510_vm0, %v2453_v39  ;;  %v5641_v58 = vpop.f32.mrb[102].mxu0  ;;  %v490_v61 = vld [vmem:[%s7221_s19 + $0x360] sm:$0xff] }
 0x1b2   : > { %v6269_v32 = vpop.eup %6268  ;;  %6288 = vrcp.f32 %v2076_v55  ;;  %v7851_v51 = vadd.f32 %v5641_v58, %v485_v17  ;;  %v1471_v38 = vpop.f32.mrb[103].mxu0  ;;  %v2457_v12 = vmul.f32 %v6267_v47, %v7767_v31 }
 0x1b3   : > { %v6271_v53 = vpop.eup %6270  ;;  %v2079_v29 = vadd.f32 1.0, %v6269_v32  ;;  %6290 = vpow2.f32 %v4928_v0  ;;  %5815 = vmatprep.mubr.msk.f32.mxu1 %vm510_vm0, %v2454_v23  ;;  %v7855_v45 = vadd.f32 %v1471_v38, %v484_v60  ;;  %v493_v38 = vld [vmem:[%s7221_s19 + $0x378] sm:$0xff] }
 0x1b4   : > { %v6273_v4 = vpop.eup %6272  ;;  %v2078_v46 = vadd.f32 1.0, %v6271_v53  ;;  %6292 = vpow2.f32 %v4927_v13  ;;  %v4930_v1 = vmul.f32 -1.442695, %v7851_v51 }
 0x1b5   : > { %v6275_v6 = vpop.eup %6274  ;;  %v2456_v41 = vmul.f32 %v6273_v4, %v7771_v33  ;;  %6294 = vrcp.f32 %v2079_v29  ;;  %v4929_v2 = vmul.f32 -1.442695, %v7855_v45  ;;  %5816 = vmatmul.mubr.msk.f32.gmra.mrb[86].mxu1 %vm510_vm0, %v2455_v35  ;;  %v5644_v28 = vpop.f32.mrb[104].mxu0  ;;  %v492_v29 = vld [vmem:[%s7221_s19 + $0x370] sm:$0xff] }
 0x1b6   : > { %v6277_v10 = vpop.eup %6276  ;;  %6296 = vrcp.f32 %v2078_v46  ;;  %v7863_v26 = vadd.f32 %v5644_v28, %v487_v59  ;;  %v1481_v25 = vpop.f32.mrb[105].mxu0  ;;  %v2459_v5 = vmul.f32 %v6275_v6, %v7779_v3 }
 0x1b7   : > { %v6279_v11 = vpop.eup %6278  ;;  %v2081_v48 = vadd.f32 1.0, %v6277_v10  ;;  %6298 = vpow2.f32 %v4930_v1  ;;  %5818 = vmatprep.mubr.msk.f32.mxu1 %vm510_vm0, %v2456_v41  ;;  %v7867_v33 = vadd.f32 %v1481_v25, %v486_v63  ;;  %v495_v25 = vld [vmem:[%s7221_s19 + $0x388] sm:$0xff] }
 0x1b8   : > { %v6281_v52 = vpop.eup %6280  ;;  %v2458_v27 = vmul.f32 %v6279_v11, %v7783_v19  ;;  %6300 = vpow2.f32 %v4929_v2  ;;  %v4932_v21 = vmul.f32 -1.442695, %v7863_v26 }
 0x1b9   : > { %v6283_v62 = vpop.eup %6282  ;;  %6302 = vrcp.f32 %v2081_v48  ;;  %v2080_v16 = vadd.f32 1.0, %v6281_v52  ;;  %5819 = vmatmul.mubr.msk.f32.gmra.mrb[88].mxu1 %vm510_vm0, %v2457_v12  ;;  %v5647_v31 = vpop.f32.mrb[106].mxu0  ;;  %v4931_v36 = vmul.f32 -1.442695, %v7867_v33  ;;  %v494_v48 = vld [vmem:[%s7221_s19 + $0x380] sm:$0xff] }
 0x1ba   : > { %v6285_v42 = vpop.eup %6284  ;;  %v2083_v37 = vadd.f32 1.0, %v6283_v62  ;;  %6304 = vpow2.f32 %v4932_v21  ;;  %v7875_v40 = vadd.f32 %v5647_v31, %v489_v14  ;;  %5821 = vmatprep.mubr.msk.f32.mxu1 %vm510_vm0, %v2458_v27  ;;  %v1491_v19 = vpop.f32.mrb[107].mxu0 }
 0x1bb   : > { %v6287_v30 = vpop.eup %6286  ;;  %6306 = vrcp.f32 %v2080_v16  ;;  %v2082_v57 = vadd.f32 1.0, %v6285_v42  ;;  %v7879_v8 = vadd.f32 %v1491_v19, %v488_v56 }
 0x1bc   : > { %v6289_v24 = vpop.eup %6288  ;;  %6308 = vrcp.f32 %v2083_v37  ;;  %v4934_v39 = vmul.f32 -1.442695, %v7875_v40  ;;  %v2461_v58 = vmul.f32 %v6287_v30, %v7791_v22 }
 0x1bd   : > { %v6291_v17 = vpop.eup %6290  ;;  %v2460_v49 = vmul.f32 %v6289_v24, %v7795_v50  ;;  %6310 = vrcp.f32 %v2082_v57  ;;  %5822 = vmatmul.mubr.msk.f32.gmra.mrb[90].mxu1 %vm510_vm0, %v2459_v5  ;;  %v5650_v55 = vpop.f32.mrb[108].mxu0  ;;  %v4933_v60 = vmul.f32 -1.442695, %v7879_v8 }
 0x1be   : > { %v6293_v0 = vpop.eup %6292  ;;  %v2085_v3 = vadd.f32 1.0, %v6291_v17  ;;  %6312 = vpow2.f32 %v4931_v36  ;;  %v7887_v47 = vadd.f32 %v5650_v55, %v491_v20  ;;  %v1501_v23 = vpop.f32.mrb[109].mxu0  ;;  %v497_v36 = vld [vmem:[%s7221_s19 + $0x398] sm:$0xff] }
 0x1bf   : > { %v6295_v13 = vpop.eup %6294  ;;  %v2084_v32 = vadd.f32 1.0, %v6293_v0  ;;  %6314 = vpow2.f32 %v4934_v39  ;;  %5824 = vmatprep.mubr.msk.f32.mxu1 %vm510_vm0, %v2460_v49  ;;  %v7891_v50 = vadd.f32 %v1501_v23, %v490_v61 }
 0x1c0   : > { %v6297_v53 = vpop.eup %6296  ;;  %6316 = vrcp.f32 %v2085_v3  ;;  %v4936_v35 = vmul.f32 -1.442695, %v7887_v47  ;;  %v2463_v28 = vmul.f32 %v6295_v13, %v7803_v43  ;;  %v499_v3 = vld [vmem:[%s7221_s19 + $0x3a8] sm:$0xff] }
 0x1c1   : > { %v6299_v59 = vpop.eup %6298  ;;  %v2462_v4 = vmul.f32 %v6297_v53, %v7806_v54  ;;  %6318 = vrcp.f32 %v2084_v32  ;;  %5825 = vmatmul.mubr.msk.f32.gmra.mrb[92].mxu1 %vm510_vm0, %v2461_v58  ;;  %v5653_v22 = vpop.f32.mrb[110].mxu0  ;;  %v4935_v63 = vmul.f32 -1.442695, %v7891_v50  ;;  %v498_v58 = vld [vmem:[%s7221_s19 + $0x3a0] sm:$0xff] }
 0x1c2   : > { %v6301_v46 = vpop.eup %6300  ;;  %v2087_v1 = vadd.f32 1.0, %v6299_v59  ;;  %6320 = vpow2.f32 %v4933_v60  ;;  %v7899_v6 = vadd.f32 %v5653_v22, %v493_v38  ;;  %v1511_v41 = vpop.f32.mrb[111].mxu0 }
 0x1c3   : > { %v6303_v2 = vpop.eup %6302  ;;  %v2086_v10 = vadd.f32 1.0, %v6301_v46  ;;  %6322 = vpow2.f32 %v4936_v35  ;;  %5827 = vmatprep.mubr.msk.f32.mxu1 %vm510_vm0, %v2462_v4  ;;  %v7903_v54 = vadd.f32 %v1511_v41, %v492_v29 }
 0x1c4   : > { %v6305_v11 = vpop.eup %6304  ;;  %6324 = vrcp.f32 %v2087_v1  ;;  %v4938_v12 = vmul.f32 -1.442695, %v7899_v6  ;;  %v2465_v42 = vmul.f32 %v6303_v2, %v7815_v7  ;;  %v501_v1 = vld [vmem:[%s7221_s19 + $0x3b8] sm:$0xff] }
 0x1c5   : > { %v6307_v14 = vpop.eup %6306  ;;  %6326 = vrcp.f32 %v2086_v10  ;;  %v2089_v52 = vadd.f32 1.0, %v6305_v11  ;;  %v4937_v27 = vmul.f32 -1.442695, %v7903_v54  ;;  %5828 = vmatmul.mubr.msk.f32.gmra.mrb[94].mxu1 %vm510_vm0, %v2463_v28  ;;  %v5656_v43 = vpop.f32.mrb[112].mxu0  ;;  %v500_v28 = vld [vmem:[%s7221_s19 + $0x3b0] sm:$0xff] }
 0x1c6   : > { %v6309_v21 = vpop.eup %6308  ;;  %v2464_v56 = vmul.f32 %v6307_v14, %v7818_v44  ;;  %6328 = vpow2.f32 %v4935_v63  ;;  %v7911_v62 = vadd.f32 %v5656_v43, %v495_v25  ;;  %v1521_v16 = vpop.f32.mrb[113].mxu0  ;;  %v496_v44 = vld [vmem:[%s7221_s19 + $0x390] sm:$0xff] }
 0x1c7   : > { %v6311_v31 = vpop.eup %6310  ;;  %6330 = vrcp.f32 %v2089_v52  ;;  %v7914_v37 = vadd.f32 %v1521_v16, %v494_v48  ;;  %v2467_v55 = vmul.f32 %v6309_v21, %v7827_v15  ;;  %v503_v21 = vld [vmem:[%s7221_s19 + $0x3c8] sm:$0xff] }
 0x1c8   : > { %v6313_v19 = vpop.eup %6312  ;;  %v2466_v30 = vmul.f32 %v6311_v31, %v7830_v18  ;;  %6332 = vpow2.f32 %v4938_v12  ;;  %v4940_v5 = vmul.f32 -1.442695, %v7911_v62  ;;  %5830 = vmatprep.mubr.msk.f32.mxu1 %vm510_vm0, %v2464_v56 }
 0x1c9   : > { %v6315_v57 = vpop.eup %6314  ;;  %v2088_v20 = vadd.f32 1.0, %v6313_v19  ;;  %6334 = vpow2.f32 %v4937_v27  ;;  %v4939_v24 = vmul.f32 -1.442695, %v7914_v37  ;;  %5831 = vmatmul.mubr.msk.f32.gmra.mrb[96].mxu1 %vm510_vm0, %v2465_v42  ;;  %v5659_v7 = vpop.f32.mrb[114].mxu0  ;;  %v502_v42 = vld [vmem:[%s7221_s19 + $0x3c0] sm:$0xff] }
 0x1ca   : > { %v6317_v39 = vpop.eup %6316  ;;  %v2091_v61 = vadd.f32 1.0, %v6315_v57  ;;  %6336 = vpow2.f32 %v4940_v5  ;;  %v7923_v18 = vadd.f32 %v5659_v7, %v497_v36  ;;  %5833 = vmatprep.mubr.msk.f32.mxu1 %vm510_vm0, %v2466_v30  ;;  %v1531_v17 = vpop.f32.mrb[115].mxu0 }
 0x1cb   : > { %v6319_v49 = vpop.eup %6318  ;;  %6338 = vrcp.f32 %v2088_v20  ;;  %v7927_v0 = vadd.f32 %v1531_v17, %v496_v44  ;;  %v2469_v22 = vmul.f32 %v6317_v39, %v7839_v9  ;;  %v7968_v17 = vld [vmem:[%s8960_s4] ss:$0 sm:$0xff] }
 0x1cc   : > { %v6321_v60 = vpop.eup %6320  ;;  %v2468_v23 = vmul.f32 %v6319_v49, %v7843_v34  ;;  %6340 = vrcp.f32 %v2091_v61  ;;  %v4942_v13 = vmul.f32 -1.442695, %v7923_v18  ;;  %v505_v61 = vld [vmem:[%s7221_s19 + $0x3d8] sm:$0xff] }
 0x1cd   : > { %v6323_v32 = vpop.eup %6322  ;;  %v2090_v38 = vadd.f32 1.0, %v6321_v60  ;;  %6342 = vpow2.f32 %v4939_v24  ;;  %v4941_v53 = vmul.f32 -1.442695, %v7927_v0  ;;  %5834 = vmatmul.mubr.msk.f32.gmra.mrb[98].mxu1 %vm510_vm0, %v2467_v55  ;;  %v5662_v15 = vpop.f32.mrb[116].mxu0 }
 0x1ce   : > { %v6325_v35 = vpop.eup %6324  ;;  %v2093_v29 = vadd.f32 1.0, %v6323_v32  ;;  %6344 = vpow2.f32 %v4942_v13  ;;  %v7935_v59 = vadd.f32 %v5662_v15, %v499_v3  ;;  %5836 = vmatprep.mubr.msk.f32.mxu1 %vm510_vm0, %v2468_v23  ;;  %v1541_v34 = vpop.f32.mrb[117].mxu0  ;;  %v504_v3 = vld [vmem:[%s7221_s19 + $0x3d0] sm:$0xff] }
 0x1cf   : > { %v6327_v4 = vpop.eup %6326  ;;  %6346 = vrcp.f32 %v2090_v38  ;;  %v7939_v46 = vadd.f32 %v1541_v34, %v498_v58  ;;  %v2471_v52 = vmul.f32 %v6325_v35, %v7851_v51 }
 0x1d0   : > { %v6329_v63 = vpop.eup %6328  ;;  %v2470_v41 = vmul.f32 %v6327_v4, %v7855_v45  ;;  %6348 = vrcp.f32 %v2093_v29  ;;  %v4944_v2 = vmul.f32 -1.442695, %v7935_v59 }
 0x1d1   : > { %v6331_v10 = vpop.eup %6330  ;;  %v2092_v25 = vadd.f32 1.0, %v6329_v63  ;;  %6350 = vpow2.f32 %v4941_v53  ;;  %v4943_v11 = vmul.f32 -1.442695, %v7939_v46  ;;  %5837 = vmatmul.mubr.msk.f32.gmra.mrb[100].mxu1 %vm510_vm0, %v2469_v22  ;;  %v5665_v9 = vpop.f32.mrb[118].mxu0 }
 0x1d2   : > { %v6333_v12 = vpop.eup %6332  ;;  %6352 = vpow2.f32 %v4944_v2  ;;  %v7947_v48 = vadd.f32 %v5665_v9, %v501_v1  ;;  %5839 = vmatprep.mubr.msk.f32.mxu1 %vm510_vm0, %v2470_v41  ;;  %v1551_v45 = vpop.f32.mrb[119].mxu0  ;;  %v2473_v7 = vmul.f32 %v6331_v10, %v7863_v26  ;;  %v507_v2 = vld [vmem:[%s7221_s19 + $0x3e8] sm:$0xff] }
 0x1d3   : > { %v6335_v14 = vpop.eup %6334  ;;  %6354 = vrcp.f32 %v2092_v25  ;;  %v2095_v27 = vadd.f32 1.0, %v6333_v12  ;;  %v7951_v43 = vadd.f32 %v1551_v45, %v500_v28 }
 0x1d4   : > { %v6337_v56 = vpop.eup %6336  ;;  %v2094_v16 = vadd.f32 1.0, %v6335_v14  ;;  %6356 = vpow2.f32 %v4943_v11  ;;  %v4946_v31 = vmul.f32 -1.442695, %v7947_v48 }
 0x1d5   : > { %v6339_v36 = vpop.eup %6338  ;;  %6358 = vrcp.f32 %v2095_v27  ;;  %v2097_v19 = vadd.f32 1.0, %v6337_v56  ;;  %v4945_v30 = vmul.f32 -1.442695, %v7951_v43  ;;  %5840 = vmatmul.mubr.msk.f32.gmra.mrb[102].mxu1 %vm510_vm0, %v2471_v52  ;;  %v5668_v51 = vpop.f32.mrb[120].mxu0 }
 0x1d6   : > { %v6341_v5 = vpop.eup %6340  ;;  %v2472_v44 = vmul.f32 %v6339_v36, %v7867_v33  ;;  %6360 = vrcp.f32 %v2094_v16  ;;  %v7959_v57 = vadd.f32 %v5668_v51, %v503_v21  ;;  %v1561_v20 = vpop.f32.mrb[121].mxu0  ;;  %v506_v16 = vld [vmem:[%s7221_s19 + $0x3e0] sm:$0xff] }
 0x1d7   : > { %v6343_v24 = vpop.eup %6342  ;;  %6362 = vrcp.f32 %v2097_v19  ;;  %v7962_v39 = vadd.f32 %v1561_v20, %v502_v42  ;;  %v2475_v4 = vmul.f32 %v6341_v5, %v7875_v40 }
 0x1d8   : > { %v6345_v49 = vpop.eup %6344  ;;  %v2096_v55 = vadd.f32 1.0, %v6343_v24  ;;  %6364 = vpow2.f32 %v4946_v31  ;;  %v4948_v33 = vmul.f32 -1.442695, %v7959_v57  ;;  %5842 = vmatprep.mubr.msk.f32.mxu1 %vm510_vm0, %v2472_v44 }
 0x1d9   : > { %v6347_v60 = vpop.eup %6346  ;;  %v2099_v23 = vadd.f32 1.0, %v6345_v49  ;;  %6366 = vpow2.f32 %v4945_v30  ;;  %v4947_v26 = vmul.f32 -1.442695, %v7962_v39  ;;  %5843 = vmatmul.mubr.msk.f32.gmra.mrb[104].mxu1 %vm510_vm0, %v2473_v7  ;;  %v5671_v13 = vpop.f32.mrb[122].mxu0 }
 0x1da   : > { %v5688_v58 = vpop.f32.mrb[0].mxu1  ;;  %v6349_v32 = vpop.eup %6348  ;;  %v2474_v38 = vmul.f32 %v6347_v60, %v7879_v8  ;;  %6368 = vrcp.f32 %v2096_v55  ;;  %v7976_v53 = vadd.f32 %v5671_v13, %v505_v61 }
 0x1db   : > { %v7979_v15 = vadd.f32 %v5688_v58, %v7968_v17  ;;  %v1571_v35 = vpop.f32.mrb[123].mxu0  ;;  %v2957_v29 = vpop.f32.mrb[1].mxu1  ;;  %6370 = vrcp.f32 %v2099_v23  ;;  %v2477_v11 = vmul.f32 %v6349_v32, %v7887_v47 }
 0x1dc   : > { %v6351_v34 = vpop.eup %6350  ;;  %v7982_v22 = vadd.f32 %v1571_v35, %v504_v3  ;;  %6372 = vpow2.f32 %v4948_v33  ;;  %v4950_v8 = vmul.f32 -1.442695, %v7976_v53  ;;  %5845 = vmatprep.mubr.msk.f32.mxu1 %vm510_vm0, %v2474_v38  ;;  %v7987_v41 = vadd.f32 %v7968_v17, %v2957_v29  ;;  %v509_v33 = vld [vmem:[%s7221_s19 + $0x3f8] sm:$0xff] }
 0x1dd   : > { %v6353_v1 = vpop.eup %6352  ;;  %v2098_v63 = vadd.f32 1.0, %v6351_v34  ;;  %6374 = vpow2.f32 %v4947_v26  ;;  %5846 = vmatmul.mubr.msk.f32.gmra.mrb[106].mxu1 %vm510_vm0, %v2475_v4  ;;  %v5674_v40 = vpop.f32.mrb[124].mxu0  ;;  %v5085_v12 = vmul.f32 -1.442695, %v7979_v15  ;;  %v508_v34 = vld [vmem:[%s7221_s19 + $0x3f0] sm:$0xff] }
 0x1de   : > { %v6355_v28 = vpop.eup %6354  ;;  %v2101_v10 = vadd.f32 1.0, %v6353_v1  ;;  %v5691_v45 = vpop.f32.mrb[2].mxu1  ;;  %v4949_v21 = vmul.f32 -1.442695, %v7982_v22  ;;  %v7995_v56 = vadd.f32 %v5674_v40, %v507_v2  ;;  %v5084_v47 = vmul.f32 -1.442695, %v7987_v41 }
 0x1df   : > { %v6357_v25 = vpop.eup %6356  ;;  %v2476_v9 = vmul.f32 %v6355_v28, %v7891_v50  ;;  %6376 = vrcp.f32 %v2098_v63  ;;  %v1581_v14 = vpop.f32.mrb[125].mxu0  ;;  %v8000_v50 = vadd.f32 %v5691_v45, %v7968_v17 }
 0x1e0   : > { %v6359_v52 = vpop.eup %6358  ;;  %6378 = vrcp.f32 %v2101_v10  ;;  %v2100_v27 = vadd.f32 1.0, %v6357_v25  ;;  %v2967_v31 = vpop.f32.mrb[3].mxu1  ;;  %v8005_v44 = vadd.f32 %v1581_v14, %v506_v16  ;;  %v4952_v55 = vmul.f32 -1.442695, %v7995_v56 }
 0x1e1   : > { %v6361_v42 = vpop.eup %6360  ;;  %6380 = vpow2.f32 %v4950_v8  ;;  %5848 = vmatprep.mubr.msk.f32.mxu1 %vm510_vm0, %v2476_v9  ;;  %v5677_v30 = vpop.f32.mrb[126].mxu0  ;;  %v2479_v61 = vmul.f32 %v6359_v52, %v7899_v6  ;;  %v5087_v60 = vmul.f32 -1.442695, %v8000_v50  ;;  %v8013_v23 = vadd.f32 %v7968_v17, %v2967_v31 }
 0x1e2   : > { %v6363_v36 = vpop.eup %6362  ;;  %v2478_v19 = vmul.f32 %v6361_v42, %v7903_v54  ;;  %6382 = vrcp.f32 %v2100_v27  ;;  %5849 = vmatmul.mubr.msk.f32.gmra.mrb[108].mxu1 %vm510_vm0, %v2477_v11  ;;  %v5694_v51 = vpop.f32.mrb[4].mxu1  ;;  %v8017_v58 = vadd.f32 %v5677_v30, %v509_v33  ;;  %v4951_v29 = vmul.f32 -1.442695, %v8005_v44 }
 0x1e3   : > { %v6365_v5 = vpop.eup %6364  ;;  %6384 = vpow2.f32 %v5085_v12  ;;  %v1591_v20 = vpop.f32.mrb[127].mxu0  ;;  %v2481_v38 = vmul.f32 %v6363_v36, %v7911_v62  ;;  %v5086_v63 = vmul.f32 -1.442695, %v8013_v23  ;;  %v8028_v40 = vadd.f32 %v5694_v51, %v7968_v17 }
 0x1e4   : > { %v2977_v24 = vpop.f32.mrb[5].mxu1  ;;  %v6367_v7 = vpop.eup %6366  ;;  %v2103_v49 = vadd.f32 1.0, %v6365_v5  ;;  %6386 = vpow2.f32 %v4949_v21  ;;  %5851 = vmatprep.mubr.msk.f32.mxu1 %vm510_vm0, %v2478_v19  ;;  %v4954_v10 = vmul.f32 -1.442695, %v8017_v58  ;;  %v8030_v25 = vadd.f32 %v1591_v20, %v508_v34 }
 0x1e5   : > { %v6369_v54 = vpop.eup %6368  ;;  %v2102_v3 = vadd.f32 1.0, %v6367_v7  ;;  %6388 = vpow2.f32 %v5084_v47  ;;  %v8036_v16 = vadd.f32 %v7968_v17, %v2977_v24  ;;  %v5089_v42 = vmul.f32 -1.442695, %v8028_v40 }
 0x1e6   : > { %v6371_v26 = vpop.eup %6370  ;;  %v2480_v13 = vmul.f32 %v6369_v54, %v7914_v37  ;;  %6390 = vrcp.f32 %v2103_v49  ;;  %5852 = vmatmul.mubr.msk.f32.gmra.mrb[110].mxu1 %vm510_vm0, %v2479_v61  ;;  %v4953_v47 = vmul.f32 -1.442695, %v8030_v25 }
 0x1e7   : > { %v6373_v6 = vpop.eup %6372  ;;  %6392 = vrcp.f32 %v2102_v3  ;;  %v5697_v4 = vpop.f32.mrb[6].mxu1  ;;  %v2483_v9 = vmul.f32 %v6371_v26, %v7923_v18 }
 0x1e8   : > { %v6375_v32 = vpop.eup %6374  ;;  %v2105_v35 = vadd.f32 1.0, %v6373_v6  ;;  %6394 = vpow2.f32 %v4952_v55  ;;  %5854 = vmatprep.mubr.msk.f32.mxu1 %vm510_vm0, %v2480_v13  ;;  %v2987_v8 = vpop.f32.mrb[7].mxu1  ;;  %v8044_v30 = vadd.f32 %v5697_v4, %v7968_v17 }
 0x1e9   : > { %v6377_v1 = vpop.eup %6376  ;;  %v2104_v37 = vadd.f32 1.0, %v6375_v32  ;;  %6396 = vpow2.f32 %v5087_v60  ;;  %v8050_v55 = vadd.f32 %v7968_v17, %v2987_v8 }
 0x1ea   : > { %v6379_v2 = vpop.eup %6378  ;;  %v2482_v28 = vmul.f32 %v6377_v1, %v7927_v0  ;;  %6398 = vrcp.f32 %v2105_v35  ;;  %5855 = vmatmul.mubr.msk.f32.gmra.mrb[112].mxu1 %vm510_vm0, %v2481_v38  ;;  %v5091_v60 = vmul.f32 -1.442695, %v8044_v30 }
 0x1eb   : > { %v6381_v62 = vpop.eup %6380  ;;  %6400 = vrcp.f32 %v2104_v37  ;;  %v5700_v45 = vpop.f32.mrb[8].mxu1  ;;  %v2485_v36 = vmul.f32 %v6379_v2, %v7935_v59  ;;  %v5088_v59 = vmul.f32 -1.442695, %v8036_v16  ;;  %v5090_v34 = vmul.f32 -1.442695, %v8050_v55 }
 0x1ec   : > { %v6383_v11 = vpop.eup %6382  ;;  %v2107_v12 = vadd.f32 1.0, %v6381_v62  ;;  %6402 = vpow2.f32 %v4951_v29  ;;  %5857 = vmatprep.mubr.msk.f32.mxu1 %vm510_vm0, %v2482_v28  ;;  %v2997_v52 = vpop.f32.mrb[9].mxu1  ;;  %v8056_v13 = vadd.f32 %v5700_v45, %v7968_v17 }
 0x1ed   : > { %v6385_v0 = vpop.eup %6384  ;;  %v2484_v14 = vmul.f32 %v6383_v11, %v7939_v46  ;;  %6404 = vpow2.f32 %v5086_v63  ;;  %v8060_v35 = vadd.f32 %v7968_v17, %v2997_v52 }
 0x1ee   : > { %v6387_v27 = vpop.eup %6386  ;;  %6406 = vrcp.f32 %v2107_v12  ;;  %v3981_v21 = vadd.f32 1.0, %v6385_v0  ;;  %5858 = vmatmul.mubr.msk.f32.gmra.mrb[114].mxu1 %vm510_vm0, %v2483_v9  ;;  %v5093_v2 = vmul.f32 -1.442695, %v8056_v13 }
 0x1ef   : > { %v6389_v31 = vpop.eup %6388  ;;  %v2106_v18 = vadd.f32 1.0, %v6387_v27  ;;  %6408 = vpow2.f32 %v4954_v10  ;;  %5860 = vmatprep.mubr.msk.f32.mxu1 %vm510_vm0, %v2484_v14  ;;  %v5703_v51 = vpop.f32.mrb[10].mxu1 }
 0x1f0   : > { %v6391_v46 = vpop.eup %6390  ;;  %6410 = vrcp.f32 %v3981_v21  ;;  %v3980_v19 = vadd.f32 1.0, %v6389_v31  ;;  %v3007_v20 = vpop.f32.mrb[11].mxu1  ;;  %v8065_v4 = vadd.f32 %v5703_v51, %v7968_v17 }
 0x1f1   : > { %v6393_v5 = vpop.eup %6392  ;;  %6412 = vrcp.f32 %v2106_v18  ;;  %v2487_v54 = vmul.f32 %v6391_v46, %v7947_v48  ;;  %v8078_v11 = vadd.f32 %v7968_v17, %v3007_v20 }
 0x1f2   : > { %v6395_v24 = vpop.eup %6394  ;;  %v2486_v7 = vmul.f32 %v6393_v5, %v7951_v43  ;;  %6414 = vrcp.f32 %v3980_v19  ;;  %5861 = vmatmul.mubr.msk.f32.gmra.mrb[116].mxu1 %vm510_vm0, %v2485_v36  ;;  %v5095_v45 = vmul.f32 -1.442695, %v8065_v4 }
 0x1f3   : > { %v6397_v61 = vpop.eup %6396  ;;  %v2109_v49 = vadd.f32 1.0, %v6395_v24  ;;  %6416 = vpow2.f32 %v5089_v42  ;;  %v5706_v26 = vpop.f32.mrb[12].mxu1  ;;  %v5094_v46 = vmul.f32 -1.442695, %v8078_v11 }
 0x1f4   : > { %v6399_v33 = vpop.eup %6398  ;;  %v3983_v3 = vadd.f32 1.0, %v6397_v61  ;;  %6418 = vpow2.f32 %v4953_v47  ;;  %5863 = vmatprep.mubr.msk.f32.mxu1 %vm510_vm0, %v2486_v7  ;;  %v3017_v6 = vpop.f32.mrb[13].mxu1  ;;  %v8084_v0 = vadd.f32 %v5706_v26, %v7968_v17 }
 0x1f5   : > { %v6401_v43 = vpop.eup %6400  ;;  %6420 = vrcp.f32 %v2109_v49  ;;  %v2489_v37 = vmul.f32 %v6399_v33, %v7959_v57  ;;  %v5092_v57 = vmul.f32 -1.442695, %v8060_v35  ;;  %v8093_v36 = vadd.f32 %v7968_v17, %v3017_v6 }
 0x1f6   : > { %v6403_v32 = vpop.eup %6402  ;;  %v2488_v38 = vmul.f32 %v6401_v43, %v7962_v39  ;;  %6422 = vrcp.f32 %v3983_v3  ;;  %5864 = vmatmul.mubr.msk.f32.gmra.mrb[118].mxu1 %vm510_vm0, %v2487_v54  ;;  %v5097_v19 = vmul.f32 -1.442695, %v8084_v0 }
 0x1f7   : > { %v6405_v48 = vpop.eup %6404  ;;  %v2108_v29 = vadd.f32 1.0, %v6403_v32  ;;  %6424 = vpow2.f32 %v5088_v59  ;;  %v5709_v39 = vpop.f32.mrb[14].mxu1  ;;  %v5096_v59 = vmul.f32 -1.442695, %v8093_v36 }
 0x1f8   : > { %v6407_v1 = vpop.eup %6406  ;;  %v3982_v63 = vadd.f32 1.0, %v6405_v48  ;;  %6426 = vpow2.f32 %v5091_v60  ;;  %5866 = vmatprep.mubr.msk.f32.mxu1 %vm510_vm0, %v2488_v38  ;;  %v3027_v28 = vpop.f32.mrb[15].mxu1 }
 0x1f9   : > { %v6409_v8 = vpop.eup %6408  ;;  %6428 = vrcp.f32 %v2108_v29  ;;  %v2491_v31 = vmul.f32 %v6407_v1, %v7976_v53  ;;  %v8104_v5 = vadd.f32 %v7968_v17, %v3027_v28 }
 0x1fa   : > { %v6411_v62 = vpop.eup %6410  ;;  %6430 = vrcp.f32 %v3982_v63  ;;  %v2111_v10 = vadd.f32 1.0, %v6409_v8  ;;  %5867 = vmatmul.mubr.msk.f32.gmra.mrb[120].mxu1 %vm510_vm0, %v2489_v37 }
 0x1fb   : > { %v6413_v9 = vpop.eup %6412  ;;  %v4365_v12 = vmul.f32 %v6411_v62, %v7979_v15  ;;  %6432 = vpow2.f32 %v5090_v34  ;;  %v5712_v27 = vpop.f32.mrb[16].mxu1 }
 0x1fc   : > { %v6415_v14 = vpop.eup %6414  ;;  %v2490_v52 = vmul.f32 %v6413_v9, %v7982_v22  ;;  %6434 = vrcp.f32 %v2111_v10  ;;  %v3037_v15 = vpop.f32.mrb[17].mxu1  ;;  %v8116_v48 = vadd.f32 %v5712_v27, %v7968_v17 }
 0x1fd   : > { %v6417_v21 = vpop.eup %6416  ;;  %4493 = vst.msk [vmem:[%s8074_s24 + $0x8] sm:$0xff] %vm510_vm0, %v4365_v12  ;;  %v4364_v18 = vmul.f32 %v6415_v14, %v7987_v41  ;;  %6436 = vpow2.f32 %v5093_v2  ;;  %v8100_v41 = vadd.f32 %v5709_v39, %v7968_v17  ;;  %v8119_v37 = vadd.f32 %v7968_v17, %v3037_v15 }
 0x1fe   : > { %v6419_v42 = vpop.eup %6418  ;;  %v3985_v47 = vadd.f32 1.0, %v6417_v21  ;;  %6438 = vpow2.f32 %v5092_v57  ;;  %5869 = vmatprep.mubr.msk.f32.mxu1 %vm510_vm0, %v2490_v52  ;;  %v5101_v28 = vmul.f32 -1.442695, %v8116_v48 }
 0x1ff   : > { %v6421_v22 = vpop.eup %6420  ;;  %4492 = vst.msk [vmem:[%s8074_s24] sm:$0xff] %vm510_vm0, %v4364_v18  ;;  %v2110_v53 = vadd.f32 1.0, %v6419_v42  ;;  %6440 = vpow2.f32 %v5095_v45  ;;  %5870 = vmatmul.mubr.msk.f32.gmra.mrb[122].mxu1 %vm510_vm0, %v2491_v31  ;;  %v5099_v60 = vmul.f32 -1.442695, %v8100_v41  ;;  %v5100_v9 = vmul.f32 -1.442695, %v8119_v37 }
 0x200   : > { %v6423_v51 = vpop.eup %6422  ;;  %6442 = vrcp.f32 %v3985_v47  ;;  %v5715_v7 = vpop.f32.mrb[18].mxu1  ;;  %v2493_v32 = vmul.f32 %v6421_v22, %v7995_v56 }
 0x201   : > { %v6425_v20 = vpop.eup %6424  ;;  %v4367_v24 = vmul.f32 %v6423_v51, %v8000_v50  ;;  %6444 = vrcp.f32 %v2110_v53  ;;  %v3047_v33 = vpop.f32.mrb[19].mxu1  ;;  %v5098_v50 = vmul.f32 -1.442695, %v8104_v5  ;;  %v8126_v39 = vadd.f32 %v5715_v7, %v7968_v17 }
 0x202   : > { %v6427_v61 = vpop.eup %6426  ;;  %v3984_v49 = vadd.f32 1.0, %v6425_v20  ;;  %6446 = vpow2.f32 %v5094_v46  ;;  %v8131_v12 = vadd.f32 %v7968_v17, %v3047_v33 }
 0x203   : > { %v6429_v54 = vpop.eup %6428  ;;  %4495 = vst.msk [vmem:[%s8074_s24 + $0x18] sm:$0xff] %vm510_vm0, %v4367_v24  ;;  %v3987_v3 = vadd.f32 1.0, %v6427_v61  ;;  %6448 = vpow2.f32 %v5097_v19  ;;  %v5103_v31 = vmul.f32 -1.442695, %v8126_v39 }
 0x204   : > { %v6431_v26 = vpop.eup %6430  ;;  %v2492_v43 = vmul.f32 %v6429_v54, %v8005_v44  ;;  %6450 = vrcp.f32 %v3984_v49  ;;  %v5718_v29 = vpop.f32.mrb[20].mxu1 }
 0x205   : > { %v6433_v6 = vpop.eup %6432  ;;  %v4366_v38 = vmul.f32 %v6431_v26, %v8013_v23  ;;  %6452 = vrcp.f32 %v3987_v3  ;;  %v3057_v44 = vpop.f32.mrb[21].mxu1  ;;  %v8140_v47 = vadd.f32 %v5718_v29, %v7968_v17 }
 0x206   : > { %v6435_v34 = vpop.eup %6434  ;;  %v3986_v1 = vadd.f32 1.0, %v6433_v6  ;;  %6454 = vpow2.f32 %v5096_v59  ;;  %5872 = vmatprep.mubr.msk.f32.mxu1 %vm510_vm0, %v2492_v43  ;;  %v8146_v51 = vadd.f32 %v7968_v17, %v3057_v44 }
 0x207   : > { %v6437_v63 = vpop.eup %6436  ;;  %4494 = vst.msk [vmem:[%s8074_s24 + $0x10] sm:$0xff] %vm510_vm0, %v4366_v38  ;;  %6456 = vpow2.f32 %v5099_v60  ;;  %5873 = vmatmul.mubr.msk.f32.gmra.mrb[124].mxu1 %vm510_vm0, %v2493_v32  ;;  %v2495_v15 = vmul.f32 %v6435_v34, %v8017_v58 }
 0x208   : > { %v6439_v56 = vpop.eup %6438  ;;  %6458 = vrcp.f32 %v3986_v1  ;;  %v3989_v23 = vadd.f32 1.0, %v6437_v63  ;;  %v5721_v62 = vpop.f32.mrb[22].mxu1  ;;  %v5104_v43 = vmul.f32 -1.442695, %v8146_v51 }
 0x209   : > { %v6441_v8 = vpop.eup %6440  ;;  %v3988_v2 = vadd.f32 1.0, %v6439_v56  ;;  %6460 = vpow2.f32 %v5098_v50  ;;  %v3067_v45 = vpop.f32.mrb[23].mxu1  ;;  %v8151_v7 = vadd.f32 %v5721_v62, %v7968_v17 }
 0x20a   : > { %v6443_v10 = vpop.eup %6442  ;;  %6462 = vrcp.f32 %v3989_v23  ;;  %v3991_v57 = vadd.f32 1.0, %v6441_v8  ;;  %v8157_v59 = vadd.f32 %v7968_v17, %v3067_v45 }
 0x20b   : > { %v6445_v14 = vpop.eup %6444  ;;  %v4369_v52 = vmul.f32 %v6443_v10, %v8028_v40  ;;  %6464 = vrcp.f32 %v3988_v2  ;;  %v5107_v32 = vmul.f32 -1.442695, %v8151_v7 }
 0x20c   : > { %v6447_v27 = vpop.eup %6446  ;;  %v2494_v21 = vmul.f32 %v6445_v14, %v8030_v25  ;;  %6466 = vrcp.f32 %v3991_v57  ;;  %v5724_v46 = vpop.f32.mrb[24].mxu1  ;;  %v5102_v25 = vmul.f32 -1.442695, %v8131_v12 }
 0x20d   : > { %v6449_v18 = vpop.eup %6448  ;;  %4497 = vst.msk [vmem:[%s8074_s24 + $0x28] sm:$0xff] %vm510_vm0, %v4369_v52  ;;  %v3990_v42 = vadd.f32 1.0, %v6447_v27  ;;  %6468 = vpow2.f32 %v5101_v28  ;;  %v3077_v53 = vpop.f32.mrb[25].mxu1  ;;  %v8165_v38 = vadd.f32 %v5724_v46, %v7968_v17 }
 0x20e   : > { %v6451_v22 = vpop.eup %6450  ;;  %v3993_v40 = vadd.f32 1.0, %v6449_v18  ;;  %6470 = vpow2.f32 %v5100_v9  ;;  %5875 = vmatprep.mubr.msk.f32.mxu1 %vm510_vm0, %v2494_v21  ;;  %v8172_v1 = vadd.f32 %v7968_v17, %v3077_v53 }
 0x20f   : > { %v6453_v19 = vpop.eup %6452  ;;  %v4368_v58 = vmul.f32 %v6451_v22, %v8036_v16  ;;  %6472 = vrcp.f32 %v3990_v42  ;;  %5876 = vmatmul.mubr.msk.f32.gmra.mrb[126].mxu1 %vm510_vm0, %v2495_v15  ;;  %v5105_v16 = vmul.f32 -1.442695, %v8140_v47  ;;  %v5109_v62 = vmul.f32 -1.442695, %v8165_v38 }
 0x210   : > { %v6455_v20 = vpop.eup %6454  ;;  %v4371_v24 = vmul.f32 %v6453_v19, %v8044_v30  ;;  %6474 = vrcp.f32 %v3993_v40  ;;  %v5727_v33 = vpop.f32.mrb[26].mxu1  ;;  %v5108_v9 = vmul.f32 -1.442695, %v8172_v1 }
 0x211   : > { %v6457_v61 = vpop.eup %6456  ;;  %4496 = vst.msk [vmem:[%s8074_s24 + $0x20] sm:$0xff] %vm510_vm0, %v4368_v58  ;;  %v3992_v49 = vadd.f32 1.0, %v6455_v20  ;;  %6476 = vpow2.f32 %v5103_v31  ;;  %v3087_v3 = vpop.f32.mrb[27].mxu1  ;;  %v8182_v10 = vadd.f32 %v5727_v33, %v7968_v17 }
 0x212   : > { %v6459_v54 = vpop.eup %6458  ;;  %4499 = vst.msk [vmem:[%s8074_s24 + $0x38] sm:$0xff] %vm510_vm0, %v4371_v24  ;;  %v3995_v30 = vadd.f32 1.0, %v6457_v61  ;;  %6478 = vpow2.f32 %v5102_v25 }
 0x213   : > { %v6461_v60 = vpop.eup %6460  ;;  %v4370_v26 = vmul.f32 %v6459_v54, %v8050_v55  ;;  %6480 = vrcp.f32 %v3992_v49  ;;  %v5106_v55 = vmul.f32 -1.442695, %v8157_v59  ;;  %v5111_v46 = vmul.f32 -1.442695, %v8182_v10 }
 0x214   : > { %v6463_v50 = vpop.eup %6462  ;;  %6482 = vrcp.f32 %v3995_v30  ;;  %v3994_v6 = vadd.f32 1.0, %v6461_v60  ;;  %v5730_v44 = vpop.f32.mrb[28].mxu1 }
 0x215   : > { %v6465_v29 = vpop.eup %6464  ;;  %4498 = vst.msk [vmem:[%s8074_s24 + $0x30] sm:$0xff] %vm510_vm0, %v4370_v26  ;;  %v4373_v34 = vmul.f32 %v6463_v50, %v8056_v13  ;;  %6484 = vpow2.f32 %v5105_v16  ;;  %v3097_v23 = vpop.f32.mrb[29].mxu1  ;;  %v8193_v18 = vadd.f32 %v5730_v44, %v7968_v17 }
 0x216   : > { %v6467_v63 = vpop.eup %6466  ;;  %v4372_v56 = vmul.f32 %v6465_v29, %v8060_v35  ;;  %6486 = vrcp.f32 %v3994_v6  ;;  %v8205_v61 = vadd.f32 %v7968_v17, %v3097_v23 }
 0x217   : > { %v6469_v8 = vpop.eup %6468  ;;  %4501 = vst.msk [vmem:[%s8074_s24 + $0x48] sm:$0xff] %vm510_vm0, %v4373_v34  ;;  %v4375_v2 = vmul.f32 %v6467_v63, %v8065_v4  ;;  %6488 = vpow2.f32 %v5104_v43  ;;  %v8188_v4 = vadd.f32 %v7968_v17, %v3087_v3  ;;  %v5113_v24 = vmul.f32 -1.442695, %v8193_v18 }
 0x218   : > { %v6471_v13 = vpop.eup %6470  ;;  %4500 = vst.msk [vmem:[%s8074_s24 + $0x40] sm:$0xff] %vm510_vm0, %v4372_v56  ;;  %v3997_v28 = vadd.f32 1.0, %v6469_v8  ;;  %6490 = vpow2.f32 %v5107_v32  ;;  %v5733_v45 = vpop.f32.mrb[30].mxu1  ;;  %v5112_v50 = vmul.f32 -1.442695, %v8205_v61 }
 0x219   : > { %v6473_v57 = vpop.eup %6472  ;;  %4503 = vst.msk [vmem:[%s8074_s24 + $0x58] sm:$0xff] %vm510_vm0, %v4375_v2  ;;  %v3996_v35 = vadd.f32 1.0, %v6471_v13  ;;  %6492 = vpow2.f32 %v5106_v55  ;;  %v3107_v27 = vpop.f32.mrb[31].mxu1  ;;  %v5110_v40 = vmul.f32 -1.442695, %v8188_v4  ;;  %v8210_v33 = vadd.f32 %v5733_v45, %v7968_v17 }
 0x21a   : > { %v6475_v14 = vpop.eup %6474  ;;  %v4374_v52 = vmul.f32 %v6473_v57, %v8078_v11  ;;  %6494 = vrcp.f32 %v3997_v28  ;;  %v8219_v6 = vadd.f32 %v7968_v17, %v3107_v27 }
 0x21b   : > { %v6477_v21 = vpop.eup %6476  ;;  %v4377_v31 = vmul.f32 %v6475_v14, %v8084_v0  ;;  %6496 = vrcp.f32 %v3996_v35  ;;  %v5115_v29 = vmul.f32 -1.442695, %v8210_v33 }
 0x21c   : > { %v6479_v15 = vpop.eup %6478  ;;  %4502 = vst.msk [vmem:[%s8074_s24 + $0x50] sm:$0xff] %vm510_vm0, %v4374_v52  ;;  %v3999_v42 = vadd.f32 1.0, %v6477_v21  ;;  %6498 = vpow2.f32 %v5109_v62  ;;  %v5736_v0 = vpop.f32.mrb[32].mxu1  ;;  %v5114_v28 = vmul.f32 -1.442695, %v8219_v6 }
 0x21d   : > { %v6481_v22 = vpop.eup %6480  ;;  %4505 = vst.msk [vmem:[%s8074_s24 + $0x68] sm:$0xff] %vm510_vm0, %v4377_v31  ;;  %v3998_v11 = vadd.f32 1.0, %v6479_v15  ;;  %6500 = vpow2.f32 %v5108_v9  ;;  %v3117_v19 = vpop.f32.mrb[33].mxu1  ;;  %v8223_v34 = vadd.f32 %v5736_v0, %v7968_v17 }
 0x21e   : > { %v6483_v25 = vpop.eup %6482  ;;  %v4376_v53 = vmul.f32 %v6481_v22, %v8093_v36  ;;  %6502 = vrcp.f32 %v3999_v42  ;;  %v8231_v62 = vadd.f32 %v7968_v17, %v3117_v19 }
 0x21f   : > { %v6485_v58 = vpop.eup %6484  ;;  %v4379_v20 = vmul.f32 %v6483_v25, %v8100_v41  ;;  %6504 = vrcp.f32 %v3998_v11 }
 0x220   : > { %v6487_v49 = vpop.eup %6486  ;;  %4504 = vst.msk [vmem:[%s8074_s24 + $0x60] sm:$0xff] %vm510_vm0, %v4376_v53  ;;  %v4001_v16 = vadd.f32 1.0, %v6485_v58  ;;  %6506 = vpow2.f32 %v5111_v46  ;;  %v5739_v54 = vpop.f32.mrb[34].mxu1 }
 0x221   : > { %v6489_v36 = vpop.eup %6488  ;;  %4507 = vst.msk [vmem:[%s8074_s24 + $0x78] sm:$0xff] %vm510_vm0, %v4379_v20  ;;  %v4378_v41 = vmul.f32 %v6487_v49, %v8104_v5  ;;  %6508 = vpow2.f32 %v5110_v40  ;;  %v3127_v60 = vpop.f32.mrb[35].mxu1  ;;  %v8238_v45 = vadd.f32 %v5739_v54, %v7968_v17 }
 0x222   : > { %v6491_v30 = vpop.eup %6490  ;;  %6510 = vrcp.f32 %v4001_v16  ;;  %v4000_v3 = vadd.f32 1.0, %v6489_v36  ;;  %v8242_v21 = vadd.f32 %v7968_v17, %v3127_v60 }
 0x223   : > { %v6493_v26 = vpop.eup %6492  ;;  %4506 = vst.msk [vmem:[%s8074_s24 + $0x70] sm:$0xff] %vm510_vm0, %v4378_v41  ;;  %v4003_v43 = vadd.f32 1.0, %v6491_v30  ;;  %6512 = vpow2.f32 %v5113_v24  ;;  %v5119_v0 = vmul.f32 -1.442695, %v8238_v45 }
 0x224   : > { %v6495_v32 = vpop.eup %6494  ;;  %6514 = vrcp.f32 %v4000_v3  ;;  %v4002_v5 = vadd.f32 1.0, %v6493_v26  ;;  %v5742_v63 = vpop.f32.mrb[36].mxu1  ;;  %v5118_v58 = vmul.f32 -1.442695, %v8242_v21 }
 0x225   : > { %v6497_v55 = vpop.eup %6496  ;;  %v4381_v44 = vmul.f32 %v6495_v32, %v8116_v48  ;;  %6516 = vrcp.f32 %v4003_v43  ;;  %v3137_v8 = vpop.f32.mrb[37].mxu1  ;;  %v8248_v46 = vadd.f32 %v5742_v63, %v7968_v17 }
 0x226   : > { %v6499_v56 = vpop.eup %6498  ;;  %v4380_v23 = vmul.f32 %v6497_v55, %v8119_v37  ;;  %6518 = vrcp.f32 %v4002_v5  ;;  %v5117_v37 = vmul.f32 -1.442695, %v8223_v34  ;;  %v8256_v20 = vadd.f32 %v7968_v17, %v3137_v8 }
 0x227   : > { %v6501_v2 = vpop.eup %6500  ;;  %4509 = vst.msk [vmem:[%s8074_s24 + $0x88] sm:$0xff] %vm510_vm0, %v4381_v44  ;;  %v4005_v13 = vadd.f32 1.0, %v6499_v56  ;;  %6520 = vpow2.f32 %v5112_v50  ;;  %v5121_v16 = vmul.f32 -1.442695, %v8248_v46 }
 0x228   : > { %v6503_v57 = vpop.eup %6502  ;;  %4508 = vst.msk [vmem:[%s8074_s24 + $0x80] sm:$0xff] %vm510_vm0, %v4380_v23  ;;  %v4004_v48 = vadd.f32 1.0, %v6501_v2  ;;  %6522 = vpow2.f32 %v5115_v29  ;;  %v5745_v14 = vpop.f32.mrb[38].mxu1  ;;  %v5120_v43 = vmul.f32 -1.442695, %v8256_v20 }
 0x229   : > { %v6505_v35 = vpop.eup %6504  ;;  %v4383_v9 = vmul.f32 %v6503_v57, %v8126_v39  ;;  %6524 = vrcp.f32 %v4005_v13  ;;  %v3147_v31 = vpop.f32.mrb[39].mxu1  ;;  %v5116_v39 = vmul.f32 -1.442695, %v8231_v62  ;;  %v8263_v36 = vadd.f32 %v5745_v14, %v7968_v17 }
 0x22a   : > { %v6507_v52 = vpop.eup %6506  ;;  %v4382_v27 = vmul.f32 %v6505_v35, %v8131_v12  ;;  %6526 = vrcp.f32 %v4004_v48  ;;  %v8273_v50 = vadd.f32 %v7968_v17, %v3147_v31 }
 0x22b   : > { %v6509_v15 = vpop.eup %6508  ;;  %4511 = vst.msk [vmem:[%s8074_s24 + $0x98] sm:$0xff] %vm510_vm0, %v4383_v9  ;;  %v4007_v42 = vadd.f32 1.0, %v6507_v52  ;;  %6528 = vpow2.f32 %v5114_v28 }
 0x22c   : > { %v6511_v22 = vpop.eup %6510  ;;  %4510 = vst.msk [vmem:[%s8074_s24 + $0x90] sm:$0xff] %vm510_vm0, %v4382_v27  ;;  %v4006_v12 = vadd.f32 1.0, %v6509_v15  ;;  %6530 = vpow2.f32 %v5117_v37  ;;  %v5748_v25 = vpop.f32.mrb[40].mxu1  ;;  %v5122_v28 = vmul.f32 -1.442695, %v8273_v50 }
 0x22d   : > { %v6513_v11 = vpop.eup %6512  ;;  %v4385_v40 = vmul.f32 %v6511_v22, %v8140_v47  ;;  %6532 = vrcp.f32 %v4007_v42  ;;  %v3157_v24 = vpop.f32.mrb[41].mxu1  ;;  %v8279_v29 = vadd.f32 %v5748_v25, %v7968_v17 }
 0x22e   : > { %v6515_v53 = vpop.eup %6514  ;;  %6534 = vrcp.f32 %v4006_v12  ;;  %v4009_v19 = vadd.f32 1.0, %v6513_v11  ;;  %v8284_v23 = vadd.f32 %v7968_v17, %v3157_v24 }
 0x22f   : > { %v6517_v49 = vpop.eup %6516  ;;  %4513 = vst.msk [vmem:[%s8074_s24 + $0xa8] sm:$0xff] %vm510_vm0, %v4385_v40  ;;  %v4384_v47 = vmul.f32 %v6515_v53, %v8146_v51  ;;  %6536 = vpow2.f32 %v5116_v39 }
 0x230   : > { %v6519_v41 = vpop.eup %6518  ;;  %v4387_v54 = vmul.f32 %v6517_v49, %v8151_v7  ;;  %6538 = vrcp.f32 %v4009_v19  ;;  %v5751_v60 = vpop.f32.mrb[42].mxu1  ;;  %v5124_v52 = vmul.f32 -1.442695, %v8284_v23 }
 0x231   : > { %v6521_v30 = vpop.eup %6520  ;;  %4512 = vst.msk [vmem:[%s8074_s24 + $0xa0] sm:$0xff] %vm510_vm0, %v4384_v47  ;;  %v4386_v3 = vmul.f32 %v6519_v41, %v8157_v59  ;;  %6540 = vpow2.f32 %v5119_v0  ;;  %v3167_v32 = vpop.f32.mrb[43].mxu1  ;;  %v5123_v59 = vmul.f32 -1.442695, %v8263_v36  ;;  %v8296_v27 = vadd.f32 %v5751_v60, %v7968_v17 }
 0x232   : > { %v6523_v26 = vpop.eup %6522  ;;  %4515 = vst.msk [vmem:[%s8074_s24 + $0xb8] sm:$0xff] %vm510_vm0, %v4387_v54  ;;  %v4008_v51 = vadd.f32 1.0, %v6521_v30  ;;  %6542 = vpow2.f32 %v5118_v58  ;;  %v8301_v39 = vadd.f32 %v7968_v17, %v3167_v32  ;;  %v8312_v17 = vld [vmem:[%s8960_s4] ss:$0 sm:$0xff] }
 0x233   : > { %v6525_v7 = vpop.eup %6524  ;;  %4514 = vst.msk [vmem:[%s8074_s24 + $0xb0] sm:$0xff] %vm510_vm0, %v4386_v3  ;;  %v4011_v5 = vadd.f32 1.0, %v6523_v26  ;;  %6544 = vpow2.f32 %v5121_v16  ;;  %v5127_v25 = vmul.f32 -1.442695, %v8296_v27 }
 0x234   : > { %v6527_v55 = vpop.eup %6526  ;;  %v4389_v44 = vmul.f32 %v6525_v7, %v8165_v38  ;;  %6546 = vrcp.f32 %v4008_v51  ;;  %v5754_v8 = vpop.f32.mrb[44].mxu1  ;;  %v5126_v24 = vmul.f32 -1.442695, %v8301_v39 }
 0x235   : > { %v6529_v63 = vpop.eup %6528  ;;  %v4388_v56 = vmul.f32 %v6527_v55, %v8172_v1  ;;  %6548 = vrcp.f32 %v4011_v5  ;;  %v3177_v57 = vpop.f32.mrb[45].mxu1  ;;  %v5125_v1 = vmul.f32 -1.442695, %v8279_v29  ;;  %v8315_v53 = vadd.f32 %v8312_v17, %v5754_v8 }
 0x236   : > { %v6531_v2 = vpop.eup %6530  ;;  %4517 = vst.msk [vmem:[%s8074_s24 + $0xc8] sm:$0xff] %vm510_vm0, %v4389_v44  ;;  %v4010_v13 = vadd.f32 1.0, %v6529_v63  ;;  %6550 = vpow2.f32 %v5120_v43  ;;  %v8319_v49 = vadd.f32 %v8312_v17, %v3177_v57 }
 0x237   : > { %v6533_v48 = vpop.eup %6532  ;;  %4516 = vst.msk [vmem:[%s8074_s24 + $0xc0] sm:$0xff] %vm510_vm0, %v4388_v56  ;;  %v4013_v38 = vadd.f32 1.0, %v6531_v2  ;;  %6552 = vpow2.f32 %v5123_v59  ;;  %v5129_v26 = vmul.f32 -1.442695, %v8315_v53 }
 0x238   : > { %v6535_v37 = vpop.eup %6534  ;;  %v4391_v35 = vmul.f32 %v6533_v48, %v8182_v10  ;;  %6554 = vrcp.f32 %v4010_v13  ;;  %v5757_v31 = vpop.f32.mrb[46].mxu1 }
 0x239   : > { %v6537_v9 = vpop.eup %6536  ;;  %v4390_v14 = vmul.f32 %v6535_v37, %v8188_v4  ;;  %6556 = vrcp.f32 %v4013_v38  ;;  %v3187_v10 = vpop.f32.mrb[47].mxu1  ;;  %v8327_v51 = vadd.f32 %v8312_v17, %v5757_v31 }
 0x23a   : > { %v6539_v15 = vpop.eup %6538  ;;  %4519 = vst.msk [vmem:[%s8074_s24 + $0xd8] sm:$0xff] %vm510_vm0, %v4391_v35  ;;  %v4012_v42 = vadd.f32 1.0, %v6537_v9  ;;  %6558 = vpow2.f32 %v5122_v28  ;;  %v8334_v55 = vadd.f32 %v8312_v17, %v3187_v10 }
 0x23b   : > { %v6541_v22 = vpop.eup %6540  ;;  %4518 = vst.msk [vmem:[%s8074_s24 + $0xd0] sm:$0xff] %vm510_vm0, %v4390_v14  ;;  %v4393_v4 = vmul.f32 %v6539_v15, %v8193_v18  ;;  %6560 = vpow2.f32 %v5125_v1  ;;  %v5131_v13 = vmul.f32 -1.442695, %v8327_v51 }
 0x23c   : > { %v6543_v12 = vpop.eup %6542  ;;  %6562 = vrcp.f32 %v4012_v42  ;;  %v4015_v11 = vadd.f32 1.0, %v6541_v22  ;;  %v5760_v18 = vpop.f32.mrb[48].mxu1  ;;  %v5130_v37 = vmul.f32 -1.442695, %v8334_v55 }
 0x23d   : > { %v6545_v40 = vpop.eup %6544  ;;  %4521 = vst.msk [vmem:[%s8074_s24 + $0xe8] sm:$0xff] %vm510_vm0, %v4393_v4  ;;  %v4014_v0 = vadd.f32 1.0, %v6543_v12  ;;  %6564 = vpow2.f32 %v5124_v52  ;;  %v3197_v47 = vpop.f32.mrb[49].mxu1  ;;  %v8338_v56 = vadd.f32 %v8312_v17, %v5760_v18 }
 0x23e   : > { %v6547_v19 = vpop.eup %6546  ;;  %6566 = vrcp.f32 %v4015_v11  ;;  %v4017_v58 = vadd.f32 1.0, %v6545_v40 }
 0x23f   : > { %v6549_v16 = vpop.eup %6548  ;;  %v4392_v41 = vmul.f32 %v6547_v19, %v8205_v61  ;;  %6568 = vrcp.f32 %v4014_v0  ;;  %v5133_v14 = vmul.f32 -1.442695, %v8338_v56 }
 0x240   : > { %v6551_v54 = vpop.eup %6550  ;;  %v4395_v30 = vmul.f32 %v6549_v16, %v8210_v33  ;;  %6570 = vrcp.f32 %v4017_v58  ;;  %v5763_v43 = vpop.f32.mrb[50].mxu1  ;;  %v5128_v33 = vmul.f32 -1.442695, %v8319_v49 }
 0x241   : > { %v6553_v3 = vpop.eup %6552  ;;  %4520 = vst.msk [vmem:[%s8074_s24 + $0xe0] sm:$0xff] %vm510_vm0, %v4392_v41  ;;  %v4016_v60 = vadd.f32 1.0, %v6551_v54  ;;  %6572 = vpow2.f32 %v5127_v25  ;;  %v3207_v7 = vpop.f32.mrb[51].mxu1  ;;  %v8352_v52 = vadd.f32 %v8312_v17, %v5763_v43 }
 0x242   : > { %v6555_v32 = vpop.eup %6554  ;;  %4523 = vst.msk [vmem:[%s8074_s24 + $0xf8] sm:$0xff] %vm510_vm0, %v4395_v30  ;;  %v4019_v61 = vadd.f32 1.0, %v6553_v3  ;;  %6574 = vpow2.f32 %v5126_v24  ;;  %v8359_v42 = vadd.f32 %v8312_v17, %v3207_v7 }
 0x243   : > { %v6557_v5 = vpop.eup %6556  ;;  %v4394_v59 = vmul.f32 %v6555_v32, %v8219_v6  ;;  %6576 = vrcp.f32 %v4016_v60  ;;  %v8344_v6 = vadd.f32 %v8312_v17, %v3197_v47  ;;  %v5135_v25 = vmul.f32 -1.442695, %v8352_v52 }
 0x244   : > { %v6559_v44 = vpop.eup %6558  ;;  %v4397_v63 = vmul.f32 %v6557_v5, %v8223_v34  ;;  %6578 = vrcp.f32 %v4019_v61  ;;  %v5766_v28 = vpop.f32.mrb[52].mxu1  ;;  %v5134_v58 = vmul.f32 -1.442695, %v8359_v42 }
 0x245   : > { %v6561_v8 = vpop.eup %6560  ;;  %4522 = vst.msk [vmem:[%s8074_s24 + $0xf0] sm:$0xff] %vm510_vm0, %v4394_v59  ;;  %v4018_v2 = vadd.f32 1.0, %v6559_v44  ;;  %6580 = vpow2.f32 %v5129_v26  ;;  %v3217_v48 = vpop.f32.mrb[53].mxu1  ;;  %v8369_v18 = vadd.f32 %v8312_v17, %v5766_v28 }
 0x246   : > { %v6563_v57 = vpop.eup %6562  ;;  %4525 = vst.msk [vmem:[%s8074_s24 + $0x108] sm:$0xff] %vm510_vm0, %v4397_v63  ;;  %v4021_v34 = vadd.f32 1.0, %v6561_v8  ;;  %6582 = vpow2.f32 %v5128_v33 }
 0x247   : > { %v6565_v38 = vpop.eup %6564  ;;  %v4396_v1 = vmul.f32 %v6563_v57, %v8231_v62  ;;  %6584 = vrcp.f32 %v4018_v2  ;;  %v5132_v62 = vmul.f32 -1.442695, %v8344_v6  ;;  %v5137_v43 = vmul.f32 -1.442695, %v8369_v18 }
 0x248   : > { %v6567_v35 = vpop.eup %6566  ;;  %6586 = vrcp.f32 %v4021_v34  ;;  %v4020_v9 = vadd.f32 1.0, %v6565_v38  ;;  %v5769_v10 = vpop.f32.mrb[54].mxu1 }
 0x249   : > { %v6569_v31 = vpop.eup %6568  ;;  %4524 = vst.msk [vmem:[%s8074_s24 + $0x100] sm:$0xff] %vm510_vm0, %v4396_v1  ;;  %v4399_v15 = vmul.f32 %v6567_v35, %v8238_v45  ;;  %6588 = vpow2.f32 %v5131_v13  ;;  %v3227_v12 = vpop.f32.mrb[55].mxu1  ;;  %v8380_v3 = vadd.f32 %v8312_v17, %v5769_v10 }
 0x24a   : > { %v6571_v22 = vpop.eup %6570  ;;  %v4398_v4 = vmul.f32 %v6569_v31, %v8242_v21  ;;  %6590 = vrcp.f32 %v4020_v9  ;;  %v8392_v8 = vadd.f32 %v8312_v17, %v3227_v12 }
 0x24b   : > { %v6573_v11 = vpop.eup %6572  ;;  %4527 = vst.msk [vmem:[%s8074_s24 + $0x118] sm:$0xff] %vm510_vm0, %v4399_v15  ;;  %v4401_v40 = vmul.f32 %v6571_v22, %v8248_v46  ;;  %6592 = vpow2.f32 %v5130_v37  ;;  %v8375_v46 = vadd.f32 %v8312_v17, %v3217_v48  ;;  %v5139_v63 = vmul.f32 -1.442695, %v8380_v3 }
 0x24c   : > { %v6575_v45 = vpop.eup %6574  ;;  %4526 = vst.msk [vmem:[%s8074_s24 + $0x110] sm:$0xff] %vm510_vm0, %v4398_v4  ;;  %v4023_v0 = vadd.f32 1.0, %v6573_v11  ;;  %6594 = vpow2.f32 %v5133_v14  ;;  %v5772_v24 = vpop.f32.mrb[56].mxu1  ;;  %v5138_v35 = vmul.f32 -1.442695, %v8392_v8 }
 0x24d   : > { %v6577_v19 = vpop.eup %6576  ;;  %4529 = vst.msk [vmem:[%s8074_s24 + $0x128] sm:$0xff] %vm510_vm0, %v4401_v40  ;;  %v4022_v21 = vadd.f32 1.0, %v6575_v45  ;;  %6596 = vpow2.f32 %v5132_v62  ;;  %v3237_v41 = vpop.f32.mrb[57].mxu1  ;;  %v5136_v61 = vmul.f32 -1.442695, %v8375_v46  ;;  %v8397_v28 = vadd.f32 %v8312_v17, %v5772_v24 }
 0x24e   : > { %v6579_v47 = vpop.eup %6578  ;;  %v4400_v16 = vmul.f32 %v6577_v19, %v8256_v20  ;;  %6598 = vrcp.f32 %v4023_v0  ;;  %v8406_v9 = vadd.f32 %v8312_v17, %v3237_v41 }
 0x24f   : > { %v6581_v54 = vpop.eup %6580  ;;  %v4403_v30 = vmul.f32 %v6579_v47, %v8263_v36  ;;  %6600 = vrcp.f32 %v4022_v21  ;;  %v5141_v31 = vmul.f32 -1.442695, %v8397_v28 }
 0x250   : > { %v6583_v60 = vpop.eup %6582  ;;  %4528 = vst.msk [vmem:[%s8074_s24 + $0x120] sm:$0xff] %vm510_vm0, %v4400_v16  ;;  %v4025_v26 = vadd.f32 1.0, %v6581_v54  ;;  %6602 = vpow2.f32 %v5135_v25  ;;  %v5775_v36 = vpop.f32.mrb[58].mxu1  ;;  %v5140_v0 = vmul.f32 -1.442695, %v8406_v9 }
 0x251   : > { %v6585_v32 = vpop.eup %6584  ;;  %4531 = vst.msk [vmem:[%s8074_s24 + $0x138] sm:$0xff] %vm510_vm0, %v4403_v30  ;;  %v4024_v20 = vadd.f32 1.0, %v6583_v60  ;;  %6604 = vpow2.f32 %v5134_v58  ;;  %v3247_v5 = vpop.f32.mrb[59].mxu1  ;;  %v8410_v15 = vadd.f32 %v8312_v17, %v5775_v36 }
 0x252   : > { %v6587_v33 = vpop.eup %6586  ;;  %v4402_v7 = vmul.f32 %v6585_v32, %v8273_v50  ;;  %6606 = vrcp.f32 %v4025_v26  ;;  %v8418_v25 = vadd.f32 %v8312_v17, %v3247_v5 }
 0x253   : > { %v6589_v59 = vpop.eup %6588  ;;  %v4405_v44 = vmul.f32 %v6587_v33, %v8279_v29  ;;  %6608 = vrcp.f32 %v4024_v20 }
 0x254   : > { %v6591_v2 = vpop.eup %6590  ;;  %4530 = vst.msk [vmem:[%s8074_s24 + $0x130] sm:$0xff] %vm510_vm0, %v4402_v7  ;;  %v4027_v13 = vadd.f32 1.0, %v6589_v59  ;;  %6610 = vpow2.f32 %v5137_v43  ;;  %v5778_v57 = vpop.f32.mrb[60].mxu1 }
 0x255   : > { %v6593_v50 = vpop.eup %6592  ;;  %4533 = vst.msk [vmem:[%s8074_s24 + $0x148] sm:$0xff] %vm510_vm0, %v4405_v44  ;;  %v4404_v29 = vmul.f32 %v6591_v2, %v8284_v23  ;;  %6612 = vpow2.f32 %v5136_v61  ;;  %v3257_v38 = vpop.f32.mrb[61].mxu1  ;;  %v8425_v24 = vadd.f32 %v8312_v17, %v5778_v57 }
 0x256   : > { %v6595_v34 = vpop.eup %6594  ;;  %6614 = vrcp.f32 %v4027_v13  ;;  %v4026_v48 = vadd.f32 1.0, %v6593_v50  ;;  %v8429_v54 = vadd.f32 %v8312_v17, %v3257_v38 }
 0x257   : > { %v6597_v1 = vpop.eup %6596  ;;  %4532 = vst.msk [vmem:[%s8074_s24 + $0x140] sm:$0xff] %vm510_vm0, %v4404_v29  ;;  %v4029_v37 = vadd.f32 1.0, %v6595_v34  ;;  %6616 = vpow2.f32 %v5139_v63  ;;  %v5145_v36 = vmul.f32 -1.442695, %v8425_v24 }
 0x258   : > { %v6599_v14 = vpop.eup %6598  ;;  %6618 = vrcp.f32 %v4026_v48  ;;  %v4028_v23 = vadd.f32 1.0, %v6597_v1  ;;  %v5781_v22 = vpop.f32.mrb[62].mxu1  ;;  %v5144_v59 = vmul.f32 -1.442695, %v8429_v54 }
 0x259   : > { %v6601_v62 = vpop.eup %6600  ;;  %v4407_v10 = vmul.f32 %v6599_v14, %v8296_v27  ;;  %6620 = vrcp.f32 %v4029_v37  ;;  %v3267_v11 = vpop.f32.mrb[63].mxu1  ;;  %v8435_v43 = vadd.f32 %v8312_v17, %v5781_v22 }
 0x25a   : > { %v6603_v4 = vpop.eup %6602  ;;  %v4406_v12 = vmul.f32 %v6601_v62, %v8301_v39  ;;  %6622 = vrcp.f32 %v4028_v23  ;;  %v5143_v39 = vmul.f32 -1.442695, %v8410_v15  ;;  %v8443_v44 = vadd.f32 %v8312_v17, %v3267_v11 }
 0x25b   : > { %v6605_v40 = vpop.eup %6604  ;;  %4535 = vst.msk [vmem:[%s8074_s24 + $0x158] sm:$0xff] %vm510_vm0, %v4407_v10  ;;  %v4031_v45 = vadd.f32 1.0, %v6603_v4  ;;  %6624 = vpow2.f32 %v5138_v35  ;;  %v5147_v13 = vmul.f32 -1.442695, %v8435_v43 }
 0x25c   : > { %v6607_v19 = vpop.eup %6606  ;;  %4534 = vst.msk [vmem:[%s8074_s24 + $0x150] sm:$0xff] %vm510_vm0, %v4406_v12  ;;  %v4030_v27 = vadd.f32 1.0, %v6605_v40  ;;  %6626 = vpow2.f32 %v5141_v31  ;;  %v5784_v47 = vpop.f32.mrb[64].mxu1  ;;  %v5146_v37 = vmul.f32 -1.442695, %v8443_v44 }
 0x25d   : > { %v6609_v21 = vpop.eup %6608  ;;  %v4409_v58 = vmul.f32 %v6607_v19, %v8315_v53  ;;  %6628 = vrcp.f32 %v4031_v45  ;;  %v3277_v30 = vpop.f32.mrb[65].mxu1  ;;  %v5142_v53 = vmul.f32 -1.442695, %v8418_v25  ;;  %v8450_v50 = vadd.f32 %v8312_v17, %v5784_v47 }
 0x25e   : > { %v6611_v16 = vpop.eup %6610  ;;  %v4408_v41 = vmul.f32 %v6609_v21, %v8319_v49  ;;  %6630 = vrcp.f32 %v4030_v27  ;;  %v8460_v35 = vadd.f32 %v8312_v17, %v3277_v30 }
 0x25f   : > { %v6613_v60 = vpop.eup %6612  ;;  %4537 = vst.msk [vmem:[%s8074_s24 + $0x168] sm:$0xff] %vm510_vm0, %v4409_v58  ;;  %v4033_v26 = vadd.f32 1.0, %v6611_v16  ;;  %6632 = vpow2.f32 %v5140_v0 }
 0x260   : > { %v6615_v32 = vpop.eup %6614  ;;  %4536 = vst.msk [vmem:[%s8074_s24 + $0x160] sm:$0xff] %vm510_vm0, %v4408_v41  ;;  %v4032_v49 = vadd.f32 1.0, %v6613_v60  ;;  %6634 = vpow2.f32 %v5143_v39  ;;  %v5787_v33 = vpop.f32.mrb[66].mxu1  ;;  %v5148_v0 = vmul.f32 -1.442695, %v8460_v35 }
 0x261   : > { %v6617_v20 = vpop.eup %6616  ;;  %v4411_v61 = vmul.f32 %v6615_v32, %v8327_v51  ;;  %6636 = vrcp.f32 %v4033_v26  ;;  %v3287_v63 = vpop.f32.mrb[67].mxu1  ;;  %v8466_v31 = vadd.f32 %v8312_v17, %v5787_v33 }
 0x262   : > { %v6619_v7 = vpop.eup %6618  ;;  %6638 = vrcp.f32 %v4032_v49  ;;  %v4035_v5 = vadd.f32 1.0, %v6617_v20  ;;  %v8471_v12 = vadd.f32 %v8312_v17, %v3287_v63 }
 0x263   : > { %v6621_v2 = vpop.eup %6620  ;;  %4539 = vst.msk [vmem:[%s8074_s24 + $0x178] sm:$0xff] %vm510_vm0, %v4411_v61  ;;  %v4410_v51 = vmul.f32 %v6619_v7, %v8334_v55  ;;  %6640 = vpow2.f32 %v5142_v53 }
 0x264   : > { %v6623_v29 = vpop.eup %6622  ;;  %v4413_v57 = vmul.f32 %v6621_v2, %v8338_v56  ;;  %6642 = vrcp.f32 %v4035_v5  ;;  %v5790_v38 = vpop.f32.mrb[68].mxu1  ;;  %v5150_v16 = vmul.f32 -1.442695, %v8471_v12 }
 0x265   : > { %v6625_v34 = vpop.eup %6624  ;;  %4538 = vst.msk [vmem:[%s8074_s24 + $0x170] sm:$0xff] %vm510_vm0, %v4410_v51  ;;  %v4412_v48 = vmul.f32 %v6623_v29, %v8344_v6  ;;  %6644 = vpow2.f32 %v5145_v36  ;;  %v3297_v14 = vpop.f32.mrb[69].mxu1  ;;  %v5149_v6 = vmul.f32 -1.442695, %v8450_v50  ;;  %v8483_v41 = vadd.f32 %v8312_v17, %v5790_v38 }
 0x266   : > { %v6627_v1 = vpop.eup %6626  ;;  %4541 = vst.msk [vmem:[%s8074_s24 + $0x188] sm:$0xff] %vm510_vm0, %v4413_v57  ;;  %v4034_v55 = vadd.f32 1.0, %v6625_v34  ;;  %6646 = vpow2.f32 %v5144_v59  ;;  %v8488_v53 = vadd.f32 %v8312_v17, %v3297_v14 }
 0x267   : > { %v6629_v56 = vpop.eup %6628  ;;  %4540 = vst.msk [vmem:[%s8074_s24 + $0x180] sm:$0xff] %vm510_vm0, %v4412_v48  ;;  %v4037_v23 = vadd.f32 1.0, %v6627_v1  ;;  %6648 = vpow2.f32 %v5147_v13  ;;  %v5153_v33 = vmul.f32 -1.442695, %v8483_v41 }
 0x268   : > { %v6631_v62 = vpop.eup %6630  ;;  %v4415_v10 = vmul.f32 %v6629_v56, %v8352_v52  ;;  %6650 = vrcp.f32 %v4034_v55  ;;  %v5793_v11 = vpop.f32.mrb[70].mxu1 }
 0x269   : > { %v6633_v22 = vpop.eup %6632  ;;  %v4414_v4 = vmul.f32 %v6631_v62, %v8359_v42  ;;  %6652 = vrcp.f32 %v4037_v23  ;;  %v3307_v19 = vpop.f32.mrb[71].mxu1  ;;  %v5151_v42 = vmul.f32 -1.442695, %v8466_v31  ;;  %v8497_v7 = vadd.f32 %v8312_v17, %v5793_v11 }
 0x26a   : > { %v6635_v40 = vpop.eup %6634  ;;  %4543 = vst.msk [vmem:[%s8074_s24 + $0x198] sm:$0xff] %vm510_vm0, %v4415_v10  ;;  %v4036_v45 = vadd.f32 1.0, %v6633_v22  ;;  %6654 = vpow2.f32 %v5146_v37  ;;  %v8501_v2 = vadd.f32 %v8312_v17, %v3307_v19 }
 0x26b   : > { %v6637_v27 = vpop.eup %6636  ;;  %4542 = vst.msk [vmem:[%s8074_s24 + $0x190] sm:$0xff] %vm510_vm0, %v4414_v4  ;;  %v4039_v52 = vadd.f32 1.0, %v6635_v40  ;;  %6656 = vpow2.f32 %v5149_v6  ;;  %v5155_v1 = vmul.f32 -1.442695, %v8497_v7 }
 0x26c   : > { %v6639_v39 = vpop.eup %6638  ;;  %v4417_v21 = vmul.f32 %v6637_v27, %v8369_v18  ;;  %6658 = vrcp.f32 %v4036_v45  ;;  %v5796_v30 = vpop.f32.mrb[72].mxu1 }
 0x26d   : > { %v6641_v58 = vpop.eup %6640  ;;  %v4416_v47 = vmul.f32 %v6639_v39, %v8375_v46  ;;  %6660 = vrcp.f32 %v4039_v52  ;;  %v3317_v18 = vpop.f32.mrb[73].mxu1  ;;  %v8509_v55 = vadd.f32 %v8312_v17, %v5796_v30 }
 0x26e   : > { %v6643_v60 = vpop.eup %6642  ;;  %4545 = vst.msk [vmem:[%s8074_s24 + $0x1a8] sm:$0xff] %vm510_vm0, %v4417_v21  ;;  %v4038_v26 = vadd.f32 1.0, %v6641_v58  ;;  %6662 = vpow2.f32 %v5148_v0  ;;  %v8516_v62 = vadd.f32 %v8312_v17, %v3317_v18 }
 0x26f   : > { %v6645_v32 = vpop.eup %6644  ;;  %4544 = vst.msk [vmem:[%s8074_s24 + $0x1a0] sm:$0xff] %vm510_vm0, %v4416_v47  ;;  %v4419_v46 = vmul.f32 %v6643_v60, %v8380_v3  ;;  %6664 = vpow2.f32 %v5151_v42  ;;  %v5152_v3 = vmul.f32 -1.442695, %v8488_v53  ;;  %v5157_v45 = vmul.f32 -1.442695, %v8509_v55 }
 0x270   : > { %v6647_v49 = vpop.eup %6646  ;;  %6666 = vrcp.f32 %v4038_v26  ;;  %v4041_v20 = vadd.f32 1.0, %v6645_v32  ;;  %v5799_v5 = vpop.f32.mrb[74].mxu1  ;;  %v5156_v39 = vmul.f32 -1.442695, %v8516_v62 }
 0x271   : > { %v6649_v61 = vpop.eup %6648  ;;  %4547 = vst.msk [vmem:[%s8074_s24 + $0x1b8] sm:$0xff] %vm510_vm0, %v4419_v46  ;;  %v4040_v36 = vadd.f32 1.0, %v6647_v49  ;;  %6668 = vpow2.f32 %v5150_v16  ;;  %v3327_v51 = vpop.f32.mrb[75].mxu1  ;;  %v8520_v4 = vadd.f32 %v8312_v17, %v5799_v5 }
 0x272   : > { %v6651_v59 = vpop.eup %6650  ;;  %6670 = vrcp.f32 %v4041_v20  ;;  %v4043_v63 = vadd.f32 1.0, %v6649_v61 }
 0x273   : > { %v6653_v13 = vpop.eup %6652  ;;  %v4418_v29 = vmul.f32 %v6651_v59, %v8392_v8  ;;  %6672 = vrcp.f32 %v4040_v36  ;;  %v5159_v47 = vmul.f32 -1.442695, %v8520_v4 }
 0x274   : > { %v6655_v57 = vpop.eup %6654  ;;  %v4421_v34 = vmul.f32 %v6653_v13, %v8397_v28  ;;  %6674 = vrcp.f32 %v4043_v63  ;;  %v5802_v37 = vpop.f32.mrb[76].mxu1  ;;  %v5154_v28 = vmul.f32 -1.442695, %v8501_v2 }
 0x275   : > { %v6657_v48 = vpop.eup %6656  ;;  %4546 = vst.msk [vmem:[%s8074_s24 + $0x1b0] sm:$0xff] %vm510_vm0, %v4418_v29  ;;  %v4042_v38 = vadd.f32 1.0, %v6655_v57  ;;  %6676 = vpow2.f32 %v5153_v33  ;;  %v3337_v56 = vpop.f32.mrb[77].mxu1  ;;  %v8534_v16 = vadd.f32 %v8312_v17, %v5802_v37 }
 0x276   : > { %v6659_v14 = vpop.eup %6658  ;;  %4549 = vst.msk [vmem:[%s8074_s24 + $0x1c8] sm:$0xff] %vm510_vm0, %v4421_v34  ;;  %v4045_v8 = vadd.f32 1.0, %v6657_v48  ;;  %6678 = vpow2.f32 %v5152_v3  ;;  %v8541_v26 = vadd.f32 %v8312_v17, %v3337_v56 }
 0x277   : > { %v6661_v23 = vpop.eup %6660  ;;  %v4420_v6 = vmul.f32 %v6659_v14, %v8406_v9  ;;  %6680 = vrcp.f32 %v4042_v38  ;;  %v8526_v9 = vadd.f32 %v8312_v17, %v3327_v51  ;;  %v5161_v33 = vmul.f32 -1.442695, %v8534_v16 }
 0x278   : > { %v6663_v10 = vpop.eup %6662  ;;  %v4423_v22 = vmul.f32 %v6661_v23, %v8410_v15  ;;  %6682 = vrcp.f32 %v4045_v8  ;;  %v5805_v0 = vpop.f32.mrb[78].mxu1  ;;  %v5160_v63 = vmul.f32 -1.442695, %v8541_v26 }
 0x279   : > { %v6665_v11 = vpop.eup %6664  ;;  %4548 = vst.msk [vmem:[%s8074_s24 + $0x1c0] sm:$0xff] %vm510_vm0, %v4420_v6  ;;  %v4044_v40 = vadd.f32 1.0, %v6663_v10  ;;  %6684 = vpow2.f32 %v5155_v1  ;;  %v3347_v27 = vpop.f32.mrb[79].mxu1  ;;  %v8551_v5 = vadd.f32 %v8312_v17, %v5805_v0 }
 0x27a   : > { %v6667_v19 = vpop.eup %6666  ;;  %4551 = vst.msk [vmem:[%s8074_s24 + $0x1d8] sm:$0xff] %vm510_vm0, %v4423_v22  ;;  %v4047_v15 = vadd.f32 1.0, %v6665_v11  ;;  %6686 = vpow2.f32 %v5154_v28 }
 0x27b   : > { %v6669_v52 = vpop.eup %6668  ;;  %v4422_v42 = vmul.f32 %v6667_v19, %v8418_v25  ;;  %6688 = vrcp.f32 %v4044_v40  ;;  %v5158_v25 = vmul.f32 -1.442695, %v8526_v9  ;;  %v5163_v37 = vmul.f32 -1.442695, %v8551_v5 }
 0x27c   : > { %v6671_v21 = vpop.eup %6670  ;;  %6690 = vrcp.f32 %v4047_v15  ;;  %v4046_v58 = vadd.f32 1.0, %v6669_v52  ;;  %v5808_v18 = vpop.f32.mrb[80].mxu1 }
 0x27d   : > { %v6673_v30 = vpop.eup %6672  ;;  %4550 = vst.msk [vmem:[%s8074_s24 + $0x1d0] sm:$0xff] %vm510_vm0, %v4422_v42  ;;  %v4425_v60 = vmul.f32 %v6671_v21, %v8425_v24  ;;  %6692 = vpow2.f32 %v5157_v45  ;;  %v3357_v49 = vpop.f32.mrb[81].mxu1  ;;  %v8562_v48 = vadd.f32 %v8312_v17, %v5808_v18 }
 0x27e   : > { %v6675_v32 = vpop.eup %6674  ;;  %v4424_v46 = vmul.f32 %v6673_v30, %v8429_v54  ;;  %6694 = vrcp.f32 %v4046_v58  ;;  %v8574_v11 = vadd.f32 %v8312_v17, %v3357_v49 }
 0x27f   : > { %v6677_v20 = vpop.eup %6676  ;;  %4553 = vst.msk [vmem:[%s8074_s24 + $0x1e8] sm:$0xff] %vm510_vm0, %v4425_v60  ;;  %v4427_v61 = vmul.f32 %v6675_v32, %v8435_v43  ;;  %6696 = vpow2.f32 %v5156_v39  ;;  %v8557_v43 = vadd.f32 %v8312_v17, %v3347_v27  ;;  %v5165_v22 = vmul.f32 -1.442695, %v8562_v48 }
 0x280   : > { %v6679_v24 = vpop.eup %6678  ;;  %4552 = vst.msk [vmem:[%s8074_s24 + $0x1e0] sm:$0xff] %vm510_vm0, %v4424_v46  ;;  %v4049_v36 = vadd.f32 1.0, %v6677_v20  ;;  %6698 = vpow2.f32 %v5159_v47  ;;  %v5811_v3 = vpop.f32.mrb[82].mxu1  ;;  %v5164_v21 = vmul.f32 -1.442695, %v8574_v11 }
 0x281   : > { %v6681_v59 = vpop.eup %6680  ;;  %4555 = vst.msk [vmem:[%s8074_s24 + $0x1f8] sm:$0xff] %vm510_vm0, %v4427_v61  ;;  %v4048_v54 = vadd.f32 1.0, %v6679_v24  ;;  %6700 = vpow2.f32 %v5158_v25  ;;  %v3367_v29 = vpop.f32.mrb[83].mxu1  ;;  %v5162_v8 = vmul.f32 -1.442695, %v8557_v43  ;;  %v8579_v0 = vadd.f32 %v8312_v17, %v5811_v3 }
 0x282   : > { %v6683_v51 = vpop.eup %6682  ;;  %v4426_v13 = vmul.f32 %v6681_v59, %v8443_v44  ;;  %6702 = vrcp.f32 %v4049_v36  ;;  %v8588_v58 = vadd.f32 %v8312_v17, %v3367_v29 }
 0x283   : > { %v6685_v57 = vpop.eup %6684  ;;  %v4429_v34 = vmul.f32 %v6683_v51, %v8450_v50  ;;  %6704 = vrcp.f32 %v4048_v54  ;;  %v5167_v30 = vmul.f32 -1.442695, %v8579_v0 }
 0x284   : > { %v6687_v38 = vpop.eup %6686  ;;  %4554 = vst.msk [vmem:[%s8074_s24 + $0x1f0] sm:$0xff] %vm510_vm0, %v4426_v13  ;;  %v4051_v1 = vadd.f32 1.0, %v6685_v57  ;;  %6706 = vpow2.f32 %v5161_v33  ;;  %v5814_v50 = vpop.f32.mrb[84].mxu1  ;;  %v5166_v36 = vmul.f32 -1.442695, %v8588_v58 }
 0x285   : > { %v6689_v14 = vpop.eup %6688  ;;  %4557 = vst.msk [vmem:[%s8074_s24 + $0x208] sm:$0xff] %vm510_vm0, %v4429_v34  ;;  %v4050_v44 = vadd.f32 1.0, %v6687_v38  ;;  %6708 = vpow2.f32 %v5160_v63  ;;  %v3377_v23 = vpop.f32.mrb[85].mxu1  ;;  %v8592_v60 = vadd.f32 %v8312_v17, %v5814_v50 }
 0x286   : > { %v6691_v28 = vpop.eup %6690  ;;  %v4428_v56 = vmul.f32 %v6689_v14, %v8460_v35  ;;  %6710 = vrcp.f32 %v4051_v1  ;;  %v8600_v33 = vadd.f32 %v8312_v17, %v3377_v23 }
 0x287   : > { %v6693_v6 = vpop.eup %6692  ;;  %v4431_v10 = vmul.f32 %v6691_v28, %v8466_v31  ;;  %6712 = vrcp.f32 %v4050_v44 }
 0x288   : > { %v6695_v40 = vpop.eup %6694  ;;  %4556 = vst.msk [vmem:[%s8074_s24 + $0x200] sm:$0xff] %vm510_vm0, %v4428_v56  ;;  %v4053_v45 = vadd.f32 1.0, %v6693_v6  ;;  %6714 = vpow2.f32 %v5163_v37  ;;  %v5817_v19 = vpop.f32.mrb[86].mxu1 }
 0x289   : > { %v6697_v35 = vpop.eup %6696  ;;  %4559 = vst.msk [vmem:[%s8074_s24 + $0x218] sm:$0xff] %vm510_vm0, %v4431_v10  ;;  %v4430_v31 = vmul.f32 %v6695_v40, %v8471_v12  ;;  %6716 = vpow2.f32 %v5162_v8  ;;  %v3387_v52 = vpop.f32.mrb[87].mxu1  ;;  %v8607_v3 = vadd.f32 %v8312_v17, %v5817_v19 }
 0x28a   : > { %v6699_v15 = vpop.eup %6698  ;;  %6718 = vrcp.f32 %v4053_v45  ;;  %v4052_v27 = vadd.f32 1.0, %v6697_v35  ;;  %v8611_v57 = vadd.f32 %v8312_v17, %v3387_v52 }
 0x28b   : > { %v6701_v42 = vpop.eup %6700  ;;  %4558 = vst.msk [vmem:[%s8074_s24 + $0x210] sm:$0xff] %vm510_vm0, %v4430_v31  ;;  %v4055_v39 = vadd.f32 1.0, %v6699_v15  ;;  %6720 = vpow2.f32 %v5165_v22  ;;  %v5171_v50 = vmul.f32 -1.442695, %v8607_v3 }
 0x28c   : > { %v6703_v47 = vpop.eup %6702  ;;  %6722 = vrcp.f32 %v4052_v27  ;;  %v4054_v12 = vadd.f32 1.0, %v6701_v42  ;;  %v5820_v32 = vpop.f32.mrb[88].mxu1  ;;  %v5170_v6 = vmul.f32 -1.442695, %v8611_v57 }
 0x28d   : > { %v6705_v25 = vpop.eup %6704  ;;  %v4433_v18 = vmul.f32 %v6703_v47, %v8483_v41  ;;  %6724 = vrcp.f32 %v4055_v39  ;;  %v3397_v20 = vpop.f32.mrb[89].mxu1  ;;  %v8617_v37 = vadd.f32 %v8312_v17, %v5820_v32 }
 0x28e   : > { %v6707_v46 = vpop.eup %6706  ;;  %v4432_v49 = vmul.f32 %v6705_v25, %v8488_v53  ;;  %6726 = vrcp.f32 %v4054_v12  ;;  %v5169_v53 = vmul.f32 -1.442695, %v8592_v60  ;;  %v8625_v10 = vadd.f32 %v8312_v17, %v3397_v20 }
 0x28f   : > { %v6709_v61 = vpop.eup %6708  ;;  %4561 = vst.msk [vmem:[%s8074_s24 + $0x228] sm:$0xff] %vm510_vm0, %v4433_v18  ;;  %v4057_v24 = vadd.f32 1.0, %v6707_v46  ;;  %6728 = vpow2.f32 %v5164_v21  ;;  %v5173_v45 = vmul.f32 -1.442695, %v8617_v37 }
 0x290   : > { %v6711_v59 = vpop.eup %6710  ;;  %4560 = vst.msk [vmem:[%s8074_s24 + $0x220] sm:$0xff] %vm510_vm0, %v4432_v49  ;;  %v4056_v41 = vadd.f32 1.0, %v6709_v61  ;;  %6730 = vpow2.f32 %v5167_v30  ;;  %v5823_v51 = vpop.f32.mrb[90].mxu1  ;;  %v5172_v39 = vmul.f32 -1.442695, %v8625_v10 }
 0x291   : > { %v6713_v54 = vpop.eup %6712  ;;  %v4435_v63 = vmul.f32 %v6711_v59, %v8497_v7  ;;  %6732 = vrcp.f32 %v4057_v24  ;;  %v3407_v34 = vpop.f32.mrb[91].mxu1  ;;  %v5168_v7 = vmul.f32 -1.442695, %v8600_v33  ;;  %v8632_v35 = vadd.f32 %v8312_v17, %v5823_v51 }
 0x292   : > { %v6715_v13 = vpop.eup %6714  ;;  %v4434_v29 = vmul.f32 %v6713_v54, %v8501_v2  ;;  %6734 = vrcp.f32 %v4056_v41  ;;  %v8642_v21 = vadd.f32 %v8312_v17, %v3407_v34 }
 0x293   : > { %v6717_v38 = vpop.eup %6716  ;;  %4563 = vst.msk [vmem:[%s8074_s24 + $0x238] sm:$0xff] %vm510_vm0, %v4435_v63  ;;  %v4059_v1 = vadd.f32 1.0, %v6715_v13  ;;  %6736 = vpow2.f32 %v5166_v36 }
 0x294   : > { %v6719_v14 = vpop.eup %6718  ;;  %4562 = vst.msk [vmem:[%s8074_s24 + $0x230] sm:$0xff] %vm510_vm0, %v4434_v29  ;;  %v4058_v2 = vadd.f32 1.0, %v6717_v38  ;;  %6738 = vpow2.f32 %v5169_v53  ;;  %v5826_v28 = vpop.f32.mrb[92].mxu1  ;;  %v5174_v36 = vmul.f32 -1.442695, %v8642_v21 }
 0x295   : > { %v6721_v44 = vpop.eup %6720  ;;  %v4437_v8 = vmul.f32 %v6719_v14, %v8509_v55  ;;  %6740 = vrcp.f32 %v4059_v1  ;;  %v3417_v22 = vpop.f32.mrb[93].mxu1  ;;  %v8648_v30 = vadd.f32 %v8312_v17, %v5826_v28 }
 0x296   : > { %v6723_v56 = vpop.eup %6722  ;;  %6742 = vrcp.f32 %v4058_v2  ;;  %v4061_v23 = vadd.f32 1.0, %v6721_v44  ;;  %v8653_v49 = vadd.f32 %v8312_v17, %v3417_v22 }
 0x297   : > { %v6725_v40 = vpop.eup %6724  ;;  %4565 = vst.msk [vmem:[%s8074_s24 + $0x248] sm:$0xff] %vm510_vm0, %v4437_v8  ;;  %v4436_v55 = vmul.f32 %v6723_v56, %v8516_v62  ;;  %6744 = vpow2.f32 %v5168_v7 }
 0x298   : > { %v6727_v31 = vpop.eup %6726  ;;  %v4439_v19 = vmul.f32 %v6725_v40, %v8520_v4  ;;  %6746 = vrcp.f32 %v4061_v23  ;;  %v5829_v52 = vpop.f32.mrb[94].mxu1  ;;  %v5176_v13 = vmul.f32 -1.442695, %v8653_v49 }
 0x299   : > { %v6729_v15 = vpop.eup %6728  ;;  %4564 = vst.msk [vmem:[%s8074_s24 + $0x240] sm:$0xff] %vm510_vm0, %v4436_v55  ;;  %v4438_v27 = vmul.f32 %v6727_v31, %v8526_v9  ;;  %6748 = vpow2.f32 %v5171_v50  ;;  %v3427_v47 = vpop.f32.mrb[95].mxu1  ;;  %v5175_v9 = vmul.f32 -1.442695, %v8632_v35  ;;  %v8665_v29 = vadd.f32 %v8312_v17, %v5829_v52 }
 0x29a   : > { %v6731_v42 = vpop.eup %6730  ;;  %4567 = vst.msk [vmem:[%s8074_s24 + $0x258] sm:$0xff] %vm510_vm0, %v4439_v19  ;;  %v4060_v62 = vadd.f32 1.0, %v6729_v15  ;;  %6750 = vpow2.f32 %v5170_v6  ;;  %v8670_v7 = vadd.f32 %v8312_v17, %v3427_v47  ;;  %v8681_v17 = vld [vmem:[%s8960_s4] ss:$0 sm:$0xff] }
 0x29b   : > { %v6733_v4 = vpop.eup %6732  ;;  %4566 = vst.msk [vmem:[%s8074_s24 + $0x250] sm:$0xff] %vm510_vm0, %v4438_v27  ;;  %v4063_v12 = vadd.f32 1.0, %v6731_v42  ;;  %6752 = vpow2.f32 %v5173_v45  ;;  %v5179_v28 = vmul.f32 -1.442695, %v8665_v29 }
 0x29c   : > { %v6735_v25 = vpop.eup %6734  ;;  %v4441_v18 = vmul.f32 %v6733_v4, %v8534_v16  ;;  %6754 = vrcp.f32 %v4060_v62  ;;  %v5832_v20 = vpop.f32.mrb[96].mxu1  ;;  %v5178_v22 = vmul.f32 -1.442695, %v8670_v7 }
 0x29d   : > { %v6737_v32 = vpop.eup %6736  ;;  %v4440_v46 = vmul.f32 %v6735_v25, %v8541_v26  ;;  %6756 = vrcp.f32 %v4063_v12  ;;  %v3437_v59 = vpop.f32.mrb[97].mxu1  ;;  %v5177_v26 = vmul.f32 -1.442695, %v8648_v30  ;;  %v8684_v56 = vadd.f32 %v8681_v17, %v5832_v20 }
 0x29e   : > { %v6739_v61 = vpop.eup %6738  ;;  %4569 = vst.msk [vmem:[%s8074_s24 + $0x268] sm:$0xff] %vm510_vm0, %v4441_v18  ;;  %v4062_v24 = vadd.f32 1.0, %v6737_v32  ;;  %6758 = vpow2.f32 %v5172_v39  ;;  %v8688_v40 = vadd.f32 %v8681_v17, %v3437_v59 }
 0x29f   : > { %v6741_v41 = vpop.eup %6740  ;;  %4568 = vst.msk [vmem:[%s8074_s24 + $0x260] sm:$0xff] %vm510_vm0, %v4440_v46  ;;  %v4065_v16 = vadd.f32 1.0, %v6739_v61  ;;  %6760 = vpow2.f32 %v5175_v9  ;;  %v5181_v42 = vmul.f32 -1.442695, %v8684_v56 }
 0x2a0   : > { %v6743_v53 = vpop.eup %6742  ;;  %v4443_v54 = vmul.f32 %v6741_v41, %v8551_v5  ;;  %6762 = vrcp.f32 %v4062_v24  ;;  %v5835_v34 = vpop.f32.mrb[98].mxu1 }
 0x2a1   : > { %v6745_v63 = vpop.eup %6744  ;;  %v4442_v51 = vmul.f32 %v6743_v53, %v8557_v43  ;;  %6764 = vrcp.f32 %v4065_v16  ;;  %v3447_v5 = vpop.f32.mrb[99].mxu1  ;;  %v8696_v62 = vadd.f32 %v8681_v17, %v5835_v34 }
 0x2a2   : > { %v6747_v38 = vpop.eup %6746  ;;  %4571 = vst.msk [vmem:[%s8074_s24 + $0x278] sm:$0xff] %vm510_vm0, %v4443_v54  ;;  %v4064_v1 = vadd.f32 1.0, %v6745_v63  ;;  %6766 = vpow2.f32 %v5174_v36  ;;  %v8703_v25 = vadd.f32 %v8681_v17, %v3447_v5 }
 0x2a3   : > { %v6749_v14 = vpop.eup %6748  ;;  %4570 = vst.msk [vmem:[%s8074_s24 + $0x270] sm:$0xff] %vm510_vm0, %v4442_v51  ;;  %v4445_v43 = vmul.f32 %v6747_v38, %v8562_v48  ;;  %6768 = vpow2.f32 %v5177_v26  ;;  %v5183_v24 = vmul.f32 -1.442695, %v8696_v62 }
 0x2a4   : > { %v6751_v2 = vpop.eup %6750  ;;  %6770 = vrcp.f32 %v4064_v1  ;;  %v4067_v44 = vadd.f32 1.0, %v6749_v14  ;;  %v5838_v48 = vpop.f32.mrb[100].mxu1  ;;  %v5182_v53 = vmul.f32 -1.442695, %v8703_v25 }
 0x2a5   : > { %v6753_v8 = vpop.eup %6752  ;;  %4573 = vst.msk [vmem:[%s8074_s24 + $0x288] sm:$0xff] %vm510_vm0, %v4445_v43  ;;  %v4066_v50 = vadd.f32 1.0, %v6751_v2  ;;  %6772 = vpow2.f32 %v5176_v13  ;;  %v3457_v55 = vpop.f32.mrb[101].mxu1  ;;  %v8707_v46 = vadd.f32 %v8681_v17, %v5838_v48 }
 0x2a6   : > { %v6755_v23 = vpop.eup %6754  ;;  %6774 = vrcp.f32 %v4067_v44  ;;  %v4069_v6 = vadd.f32 1.0, %v6753_v8 }
 0x2a7   : > { %v6757_v45 = vpop.eup %6756  ;;  %v4444_v31 = vmul.f32 %v6755_v23, %v8574_v11  ;;  %6776 = vrcp.f32 %v4066_v50  ;;  %v5185_v51 = vmul.f32 -1.442695, %v8707_v46 }
 0x2a8   : > { %v6759_v19 = vpop.eup %6758  ;;  %v4447_v15 = vmul.f32 %v6757_v45, %v8579_v0  ;;  %6778 = vrcp.f32 %v4069_v6  ;;  %v5841_v39 = vpop.f32.mrb[102].mxu1  ;;  %v5180_v0 = vmul.f32 -1.442695, %v8688_v40 }
 0x2a9   : > { %v6761_v27 = vpop.eup %6760  ;;  %4572 = vst.msk [vmem:[%s8074_s24 + $0x280] sm:$0xff] %vm510_vm0, %v4444_v31  ;;  %v4068_v52 = vadd.f32 1.0, %v6759_v19  ;;  %6780 = vpow2.f32 %v5179_v28  ;;  %v3467_v4 = vpop.f32.mrb[103].mxu1  ;;  %v8721_v13 = vadd.f32 %v8681_v17, %v5841_v39 }
 0x2aa   : > { %v6763_v47 = vpop.eup %6762  ;;  %4575 = vst.msk [vmem:[%s8074_s24 + $0x298] sm:$0xff] %vm510_vm0, %v4447_v15  ;;  %v4071_v11 = vadd.f32 1.0, %v6761_v27  ;;  %6782 = vpow2.f32 %v5178_v22  ;;  %v8728_v1 = vadd.f32 %v8681_v17, %v3467_v4 }
 0x2ab   : > { %v6765_v12 = vpop.eup %6764  ;;  %v4446_v9 = vmul.f32 %v6763_v47, %v8588_v58  ;;  %6784 = vrcp.f32 %v4068_v52  ;;  %v8713_v58 = vadd.f32 %v8681_v17, %v3457_v55  ;;  %v5187_v28 = vmul.f32 -1.442695, %v8721_v13 }
 0x2ac   : > { %v6767_v18 = vpop.eup %6766  ;;  %v4449_v32 = vmul.f32 %v6765_v12, %v8592_v60  ;;  %6786 = vrcp.f32 %v4071_v11  ;;  %v5844_v36 = vpop.f32.mrb[104].mxu1  ;;  %v5186_v6 = vmul.f32 -1.442695, %v8728_v1 }
 0x2ad   : > { %v6769_v20 = vpop.eup %6768  ;;  %4574 = vst.msk [vmem:[%s8074_s24 + $0x290] sm:$0xff] %vm510_vm0, %v4446_v9  ;;  %v4070_v61 = vadd.f32 1.0, %v6767_v18  ;;  %6788 = vpow2.f32 %v5181_v42  ;;  %v3477_v41 = vpop.f32.mrb[105].mxu1  ;;  %v8738_v48 = vadd.f32 %v8681_v17, %v5844_v36 }
 0x2ae   : > { %v6771_v59 = vpop.eup %6770  ;;  %4577 = vst.msk [vmem:[%s8074_s24 + $0x2a8] sm:$0xff] %vm510_vm0, %v4449_v32  ;;  %v4073_v60 = vadd.f32 1.0, %v6769_v20  ;;  %6790 = vpow2.f32 %v5180_v0 }
 0x2af   : > { %v6773_v16 = vpop.eup %6772  ;;  %v4448_v26 = vmul.f32 %v6771_v59, %v8600_v33  ;;  %6792 = vrcp.f32 %v4070_v61  ;;  %v5184_v33 = vmul.f32 -1.442695, %v8713_v58  ;;  %v5189_v39 = vmul.f32 -1.442695, %v8738_v48 }
 0x2b0   : > { %v6775_v54 = vpop.eup %6774  ;;  %6794 = vrcp.f32 %v4073_v60  ;;  %v4072_v63 = vadd.f32 1.0, %v6773_v16  ;;  %v5847_v5 = vpop.f32.mrb[106].mxu1 }
 0x2b1   : > { %v6777_v34 = vpop.eup %6776  ;;  %4576 = vst.msk [vmem:[%s8074_s24 + $0x2a0] sm:$0xff] %vm510_vm0, %v4448_v26  ;;  %v4451_v38 = vmul.f32 %v6775_v54, %v8607_v3  ;;  %6796 = vpow2.f32 %v5183_v24  ;;  %v3487_v2 = vpop.f32.mrb[107].mxu1  ;;  %v8749_v27 = vadd.f32 %v8681_v17, %v5847_v5 }
 0x2b2   : > { %v6779_v14 = vpop.eup %6778  ;;  %v4450_v43 = vmul.f32 %v6777_v34, %v8611_v57  ;;  %6798 = vrcp.f32 %v4072_v63  ;;  %v8761_v20 = vadd.f32 %v8681_v17, %v3487_v2 }
 0x2b3   : > { %v6781_v44 = vpop.eup %6780  ;;  %4579 = vst.msk [vmem:[%s8074_s24 + $0x2b8] sm:$0xff] %vm510_vm0, %v4451_v38  ;;  %v4453_v8 = vmul.f32 %v6779_v14, %v8617_v37  ;;  %6800 = vpow2.f32 %v5182_v53  ;;  %v8744_v37 = vadd.f32 %v8681_v17, %v3477_v41  ;;  %v5191_v32 = vmul.f32 -1.442695, %v8749_v27 }
 0x2b4   : > { %v6783_v3 = vpop.eup %6782  ;;  %4578 = vst.msk [vmem:[%s8074_s24 + $0x2b0] sm:$0xff] %vm510_vm0, %v4450_v43  ;;  %v4075_v50 = vadd.f32 1.0, %v6781_v44  ;;  %6802 = vpow2.f32 %v5185_v51  ;;  %v5190_v54 = vmul.f32 -1.442695, %v8761_v20 }
 0x2b5   : > { %v6785_v23 = vpop.eup %6784  ;;  %4581 = vst.msk [vmem:[%s8074_s24 + $0x2c8] sm:$0xff] %vm510_vm0, %v4453_v8  ;;  %v4074_v57 = vadd.f32 1.0, %v6783_v3  ;;  %6804 = vpow2.f32 %v5184_v33  ;;  %v5850_v22 = vpop.f32.mrb[108].mxu1  ;;  %v5188_v11 = vmul.f32 -1.442695, %v8744_v37 }
 0x2b6   : > { %v6787_v55 = vpop.eup %6786  ;;  %v4452_v45 = vmul.f32 %v6785_v23, %v8625_v10  ;;  %6806 = vrcp.f32 %v4075_v50  ;;  %v3497_v31 = vpop.f32.mrb[109].mxu1  ;;  %v8766_v36 = vadd.f32 %v8681_v17, %v5850_v22 }
 0x2b7   : > { %v6789_v19 = vpop.eup %6788  ;;  %v4455_v15 = vmul.f32 %v6787_v55, %v8632_v35  ;;  %6808 = vrcp.f32 %v4074_v57  ;;  %v8775_v63 = vadd.f32 %v8681_v17, %v3497_v31 }
 0x2b8   : > { %v6791_v52 = vpop.eup %6790  ;;  %4580 = vst.msk [vmem:[%s8074_s24 + $0x2c0] sm:$0xff] %vm510_vm0, %v4452_v45  ;;  %v4077_v42 = vadd.f32 1.0, %v6789_v19  ;;  %6810 = vpow2.f32 %v5187_v28  ;;  %v5193_v34 = vmul.f32 -1.442695, %v8766_v36 }
 0x2b9   : > { %v6793_v47 = vpop.eup %6792  ;;  %4583 = vst.msk [vmem:[%s8074_s24 + $0x2d8] sm:$0xff] %vm510_vm0, %v4455_v15  ;;  %v4076_v10 = vadd.f32 1.0, %v6791_v52  ;;  %6812 = vpow2.f32 %v5186_v6  ;;  %v5853_v35 = vpop.f32.mrb[110].mxu1  ;;  %v5192_v50 = vmul.f32 -1.442695, %v8775_v63 }
 0x2ba   : > { %v6795_v0 = vpop.eup %6794  ;;  %v4454_v4 = vmul.f32 %v6793_v47, %v8642_v21  ;;  %6814 = vrcp.f32 %v4077_v42  ;;  %v3507_v12 = vpop.f32.mrb[111].mxu1  ;;  %v8779_v38 = vadd.f32 %v8681_v17, %v5853_v35 }
 0x2bb   : > { %v6797_v9 = vpop.eup %6796  ;;  %v4457_v18 = vmul.f32 %v6795_v0, %v8648_v30  ;;  %6816 = vrcp.f32 %v4076_v10  ;;  %v8787_v28 = vadd.f32 %v8681_v17, %v3507_v12 }
 0x2bc   : > { %v6799_v61 = vpop.eup %6798  ;;  %4582 = vst.msk [vmem:[%s8074_s24 + $0x2d0] sm:$0xff] %vm510_vm0, %v4454_v4  ;;  %v4079_v24 = vadd.f32 1.0, %v6797_v9  ;;  %6818 = vpow2.f32 %v5189_v39 }
 0x2bd   : > { %v6801_v21 = vpop.eup %6800  ;;  %4585 = vst.msk [vmem:[%s8074_s24 + $0x2e8] sm:$0xff] %vm510_vm0, %v4457_v18  ;;  %v4456_v30 = vmul.f32 %v6799_v61, %v8653_v49  ;;  %6820 = vpow2.f32 %v5188_v11  ;;  %v5856_v59 = vpop.f32.mrb[112].mxu1 }
 0x2be   : > { %v6803_v60 = vpop.eup %6802  ;;  %6822 = vrcp.f32 %v4079_v24  ;;  %v4078_v41 = vadd.f32 1.0, %v6801_v21  ;;  %v3517_v16 = vpop.f32.mrb[113].mxu1  ;;  %v8794_v22 = vadd.f32 %v8681_v17, %v5856_v59 }
 0x2bf   : > { %v6805_v26 = vpop.eup %6804  ;;  %4584 = vst.msk [vmem:[%s8074_s24 + $0x2e0] sm:$0xff] %vm510_vm0, %v4456_v30  ;;  %v4081_v53 = vadd.f32 1.0, %v6803_v60  ;;  %6824 = vpow2.f32 %v5191_v32  ;;  %v8798_v19 = vadd.f32 %v8681_v17, %v3517_v16 }
 0x2c0   : > { %v6807_v51 = vpop.eup %6806  ;;  %6826 = vrcp.f32 %v4078_v41  ;;  %v4080_v49 = vadd.f32 1.0, %v6805_v26  ;;  %v5197_v35 = vmul.f32 -1.442695, %v8794_v22 }
 0x2c1   : > { %v6809_v33 = vpop.eup %6808  ;;  %v4459_v5 = vmul.f32 %v6807_v51, %v8665_v29  ;;  %6828 = vrcp.f32 %v4081_v53  ;;  %v5859_v14 = vpop.f32.mrb[114].mxu1  ;;  %v5196_v9 = vmul.f32 -1.442695, %v8798_v19 }
 0x2c2   : > { %v6811_v43 = vpop.eup %6810  ;;  %v4458_v2 = vmul.f32 %v6809_v33, %v8670_v7  ;;  %6830 = vrcp.f32 %v4080_v49  ;;  %v3527_v44 = vpop.f32.mrb[115].mxu1  ;;  %v5195_v7 = vmul.f32 -1.442695, %v8779_v38  ;;  %v8804_v39 = vadd.f32 %v8681_v17, %v5859_v14 }
 0x2c3   : > { %v6813_v8 = vpop.eup %6812  ;;  %4587 = vst.msk [vmem:[%s8074_s24 + $0x2f8] sm:$0xff] %vm510_vm0, %v4459_v5  ;;  %v4083_v3 = vadd.f32 1.0, %v6811_v43  ;;  %6832 = vpow2.f32 %v5190_v54  ;;  %v8812_v18 = vadd.f32 %v8681_v17, %v3527_v44 }
 0x2c4   : > { %v6815_v23 = vpop.eup %6814  ;;  %4586 = vst.msk [vmem:[%s8074_s24 + $0x2f0] sm:$0xff] %vm510_vm0, %v4458_v2  ;;  %v4082_v29 = vadd.f32 1.0, %v6813_v8  ;;  %6834 = vpow2.f32 %v5193_v34  ;;  %v5199_v24 = vmul.f32 -1.442695, %v8804_v39 }
 0x2c5   : > { %v6817_v57 = vpop.eup %6816  ;;  %v4461_v6 = vmul.f32 %v6815_v23, %v8684_v56  ;;  %6836 = vrcp.f32 %v4083_v3  ;;  %v5862_v55 = vpop.f32.mrb[116].mxu1  ;;  %v5194_v56 = vmul.f32 -1.442695, %v8787_v28  ;;  %v5198_v53 = vmul.f32 -1.442695, %v8812_v18 }
 0x2c6   : > { %v6819_v45 = vpop.eup %6818  ;;  %v4460_v31 = vmul.f32 %v6817_v57, %v8688_v40  ;;  %6838 = vrcp.f32 %v4082_v29  ;;  %v3537_v15 = vpop.f32.mrb[117].mxu1  ;;  %v8819_v21 = vadd.f32 %v8681_v17, %v5862_v55 }
 0x2c7   : > { %v6821_v52 = vpop.eup %6820  ;;  %4589 = vst.msk [vmem:[%s8074_s24 + $0x308] sm:$0xff] %vm510_vm0, %v4461_v6  ;;  %v4085_v42 = vadd.f32 1.0, %v6819_v45  ;;  %6840 = vpow2.f32 %v5192_v50  ;;  %v8829_v54 = vadd.f32 %v8681_v17, %v3537_v15 }
 0x2c8   : > { %v6823_v47 = vpop.eup %6822  ;;  %4588 = vst.msk [vmem:[%s8074_s24 + $0x300] sm:$0xff] %vm510_vm0, %v4460_v31  ;;  %v4084_v40 = vadd.f32 1.0, %v6821_v52  ;;  %6842 = vpow2.f32 %v5195_v7 }
 0x2c9   : > { %v6825_v10 = vpop.eup %6824  ;;  %v4463_v11 = vmul.f32 %v6823_v47, %v8696_v62  ;;  %6844 = vrcp.f32 %v4085_v42  ;;  %v5865_v0 = vpop.f32.mrb[118].mxu1  ;;  %v5200_v3 = vmul.f32 -1.442695, %v8829_v54 }
 0x2ca   : > { %v6827_v4 = vpop.eup %6826  ;;  %6846 = vrcp.f32 %v4084_v40  ;;  %v4087_v12 = vadd.f32 1.0, %v6825_v10  ;;  %v3547_v32 = vpop.f32.mrb[119].mxu1  ;;  %v8835_v34 = vadd.f32 %v8681_v17, %v5865_v0 }
 0x2cb   : > { %v6829_v61 = vpop.eup %6828  ;;  %4591 = vst.msk [vmem:[%s8074_s24 + $0x318] sm:$0xff] %vm510_vm0, %v4463_v11  ;;  %v4462_v62 = vmul.f32 %v6827_v4, %v8703_v25  ;;  %6848 = vpow2.f32 %v5194_v56  ;;  %v8840_v2 = vadd.f32 %v8681_v17, %v3547_v32 }
 0x2cc   : > { %v6831_v30 = vpop.eup %6830  ;;  %v4465_v59 = vmul.f32 %v6829_v61, %v8707_v46  ;;  %6850 = vrcp.f32 %v4087_v12 }
 0x2cd   : > { %v6833_v60 = vpop.eup %6832  ;;  %4590 = vst.msk [vmem:[%s8074_s24 + $0x310] sm:$0xff] %vm510_vm0, %v4462_v62  ;;  %v4464_v41 = vmul.f32 %v6831_v30, %v8713_v58  ;;  %6852 = vpow2.f32 %v5197_v35  ;;  %v5868_v16 = vpop.f32.mrb[120].mxu1  ;;  %v5201_v58 = vmul.f32 -1.442695, %v8819_v21  ;;  %v5202_v45 = vmul.f32 -1.442695, %v8840_v2 }
 0x2ce   : > { %v6835_v26 = vpop.eup %6834  ;;  %4593 = vst.msk [vmem:[%s8074_s24 + $0x328] sm:$0xff] %vm510_vm0, %v4465_v59  ;;  %v4086_v25 = vadd.f32 1.0, %v6833_v60  ;;  %6854 = vpow2.f32 %v5196_v9  ;;  %v3557_v46 = vpop.f32.mrb[121].mxu1  ;;  %v8852_v31 = vadd.f32 %v8681_v17, %v5868_v16 }
 0x2cf   : > { %v6837_v51 = vpop.eup %6836  ;;  %4592 = vst.msk [vmem:[%s8074_s24 + $0x320] sm:$0xff] %vm510_vm0, %v4464_v41  ;;  %v4089_v49 = vadd.f32 1.0, %v6835_v26  ;;  %6856 = vpow2.f32 %v5199_v24  ;;  %v8857_v42 = vadd.f32 %v8681_v17, %v3557_v46 }
 0x2d0   : > { %v6839_v33 = vpop.eup %6838  ;;  %v4467_v5 = vmul.f32 %v6837_v51, %v8721_v13  ;;  %6858 = vrcp.f32 %v4086_v25  ;;  %v5205_v11 = vmul.f32 -1.442695, %v8852_v31 }
 0x2d1   : > { %v6841_v14 = vpop.eup %6840  ;;  %v4466_v43 = vmul.f32 %v6839_v33, %v8728_v1  ;;  %6860 = vrcp.f32 %v4089_v49  ;;  %v5203_v1 = vmul.f32 -1.442695, %v8835_v34 }
 0x2d2   : > { %v6843_v44 = vpop.eup %6842  ;;  %4595 = vst.msk [vmem:[%s8074_s24 + $0x338] sm:$0xff] %vm510_vm0, %v4467_v5  ;;  %v4088_v8 = vadd.f32 1.0, %v6841_v14  ;;  %6862 = vpow2.f32 %v5198_v53  ;;  %v5871_v50 = vpop.f32.mrb[122].mxu1 }
 0x2d3   : > { %v6845_v23 = vpop.eup %6844  ;;  %4594 = vst.msk [vmem:[%s8074_s24 + $0x330] sm:$0xff] %vm510_vm0, %v4466_v43  ;;  %v4091_v13 = vadd.f32 1.0, %v6843_v44  ;;  %6864 = vpow2.f32 %v5201_v58  ;;  %v3567_v29 = vpop.f32.mrb[123].mxu1  ;;  %v8866_v35 = vadd.f32 %v8681_v17, %v5871_v50 }
 0x2d4   : > { %v6847_v7 = vpop.eup %6846  ;;  %v4469_v57 = vmul.f32 %v6845_v23, %v8738_v48  ;;  %6866 = vrcp.f32 %v4088_v8  ;;  %v8870_v12 = vadd.f32 %v8681_v17, %v3567_v29 }
 0x2d5   : > { %v6849_v6 = vpop.eup %6848  ;;  %v4468_v55 = vmul.f32 %v6847_v7, %v8744_v37  ;;  %6868 = vrcp.f32 %v4091_v13  ;;  %v5207_v41 = vmul.f32 -1.442695, %v8866_v35 }
 0x2d6   : > { %v6851_v15 = vpop.eup %6850  ;;  %4597 = vst.msk [vmem:[%s8074_s24 + $0x348] sm:$0xff] %vm510_vm0, %v4469_v57  ;;  %v4090_v52 = vadd.f32 1.0, %v6849_v6  ;;  %6870 = vpow2.f32 %v5200_v3 }
 0x2d7   : > { %v6853_v48 = vpop.eup %6852  ;;  %4596 = vst.msk [vmem:[%s8074_s24 + $0x340] sm:$0xff] %vm510_vm0, %v4468_v55  ;;  %v4471_v37 = vmul.f32 %v6851_v15, %v8749_v27  ;;  %6872 = vpow2.f32 %v5203_v1  ;;  %v5204_v27 = vmul.f32 -1.442695, %v8857_v42 }
 0x2d8   : > { %v6855_v56 = vpop.eup %6854  ;;  %6874 = vrcp.f32 %v4090_v52  ;;  %v4093_v47 = vadd.f32 1.0, %v6853_v48 }
 0x2d9   : > { %v6857_v40 = vpop.eup %6856  ;;  %4599 = vst.msk [vmem:[%s8074_s24 + $0x358] sm:$0xff] %vm510_vm0, %v4471_v37  ;;  %v4092_v10 = vadd.f32 1.0, %v6855_v56  ;;  %6876 = vpow2.f32 %v5202_v45 }
 0x2da   : > { %v6859_v0 = vpop.eup %6858  ;;  %6878 = vrcp.f32 %v4093_v47  ;;  %v4095_v4 = vadd.f32 1.0, %v6857_v40  ;;  %v5874_v9 = vpop.f32.mrb[124].mxu1 }
 0x2db   : > { %v6861_v32 = vpop.eup %6860  ;;  %v4470_v61 = vmul.f32 %v6859_v0, %v8761_v20  ;;  %6880 = vrcp.f32 %v4092_v10  ;;  %v3577_v62 = vpop.f32.mrb[125].mxu1  ;;  %v8878_v16 = vadd.f32 %v8681_v17, %v5874_v9 }
 0x2dc   : > { %v6863_v24 = vpop.eup %6862  ;;  %v4473_v30 = vmul.f32 %v6861_v32, %v8766_v36  ;;  %6882 = vrcp.f32 %v4095_v4  ;;  %v5206_v36 = vmul.f32 -1.442695, %v8870_v12  ;;  %v8885_v46 = vadd.f32 %v8681_v17, %v3577_v62 }
 0x2dd   : > { %v6865_v59 = vpop.eup %6864  ;;  %4598 = vst.msk [vmem:[%s8074_s24 + $0x350] sm:$0xff] %vm510_vm0, %v4470_v61  ;;  %v4094_v60 = vadd.f32 1.0, %v6863_v24  ;;  %6884 = vpow2.f32 %v5205_v11  ;;  %v5209_v5 = vmul.f32 -1.442695, %v8878_v16 }
 0x2de   : > { %v6867_v26 = vpop.eup %6866  ;;  %4601 = vst.msk [vmem:[%s8074_s24 + $0x368] sm:$0xff] %vm510_vm0, %v4473_v30  ;;  %v4097_v20 = vadd.f32 1.0, %v6865_v59  ;;  %6886 = vpow2.f32 %v5204_v27 }
 0x2df   : > { %v6869_v25 = vpop.eup %6868  ;;  %v4472_v53 = vmul.f32 %v6867_v26, %v8775_v63  ;;  %6888 = vrcp.f32 %v4094_v60 }
 0x2e0   : > { %v6871_v51 = vpop.eup %6870  ;;  %v4475_v49 = vmul.f32 %v6869_v25, %v8779_v38  ;;  %6890 = vrcp.f32 %v4097_v20  ;;  %v5208_v38 = vmul.f32 -1.442695, %v8885_v46 }
 0x2e1   : > { %v6873_v58 = vpop.eup %6872  ;;  %4600 = vst.msk [vmem:[%s8074_s24 + $0x360] sm:$0xff] %vm510_vm0, %v4472_v53  ;;  %v4096_v33 = vadd.f32 1.0, %v6871_v51  ;;  %6892 = vpow2.f32 %v5207_v41 }
 0x2e2   : > { %v6875_v14 = vpop.eup %6874  ;;  %4603 = vst.msk [vmem:[%s8074_s24 + $0x378] sm:$0xff] %vm510_vm0, %v4475_v49  ;;  %v4099_v63 = vadd.f32 1.0, %v6873_v58  ;;  %6894 = vpow2.f32 %v5206_v36  ;;  %v5877_v43 = vpop.f32.mrb[126].mxu1 }
 0x2e3   : > { %v6877_v44 = vpop.eup %6876  ;;  %v4474_v8 = vmul.f32 %v6875_v14, %v8787_v28  ;;  %6896 = vrcp.f32 %v4096_v33  ;;  %v8896_v3 = vadd.f32 %v8681_v17, %v5877_v43  ;;  %v3587_v50 = vpop.f32.mrb[127].mxu1 }
 0x2e4   : > { %v6879_v23 = vpop.eup %6878  ;;  %6898 = vrcp.f32 %v4099_v63  ;;  %v4098_v13 = vadd.f32 1.0, %v6877_v44  ;;  %v8899_v1 = vadd.f32 %v8681_v17, %v3587_v50 }
 0x2e5   : > { %v6881_v29 = vpop.eup %6880  ;;  %4602 = vst.msk [vmem:[%s8074_s24 + $0x370] sm:$0xff] %vm510_vm0, %v4474_v8  ;;  %v4477_v28 = vmul.f32 %v6879_v23, %v8794_v22  ;;  %6900 = vpow2.f32 %v5209_v5  ;;  %v5211_v7 = vmul.f32 -1.442695, %v8896_v3 }
 0x2e6   : > { %v6883_v57 = vpop.eup %6882  ;;  %v4476_v6 = vmul.f32 %v6881_v29, %v8798_v19  ;;  %6902 = vrcp.f32 %v4098_v13  ;;  %v5210_v55 = vmul.f32 -1.442695, %v8899_v1 }
 0x2e7   : > { %v6885_v45 = vpop.eup %6884  ;;  %4605 = vst.msk [vmem:[%s8074_s24 + $0x388] sm:$0xff] %vm510_vm0, %v4477_v28  ;;  %v4479_v17 = vmul.f32 %v6883_v57, %v8804_v39  ;;  %6904 = vpow2.f32 %v5208_v38 }
 0x2e8   : > { %v6887_v15 = vpop.eup %6886  ;;  %4604 = vst.msk [vmem:[%s8074_s24 + $0x380] sm:$0xff] %vm510_vm0, %v4476_v6  ;;  %v4101_v22 = vadd.f32 1.0, %v6885_v45  ;;  %6906 = vpow2.f32 %v5211_v7 }
 0x2e9   : > { %v6889_v52 = vpop.eup %6888  ;;  %4607 = vst.msk [vmem:[%s8074_s24 + $0x398] sm:$0xff] %vm510_vm0, %v4479_v17  ;;  %v4100_v19 = vadd.f32 1.0, %v6887_v15  ;;  %6908 = vpow2.f32 %v5210_v55 }
 0x2ea   : > { %v6891_v48 = vpop.eup %6890  ;;  %v4478_v37 = vmul.f32 %v6889_v52, %v8812_v18  ;;  %6910 = vrcp.f32 %v4101_v22 }
 0x2eb   : > { %v6893_v56 = vpop.eup %6892  ;;  %v4481_v39 = vmul.f32 %v6891_v48, %v8819_v21  ;;  %6912 = vrcp.f32 %v4100_v19 }
 0x2ec   : > { %v6895_v47 = vpop.eup %6894  ;;  %4606 = vst.msk [vmem:[%s8074_s24 + $0x390] sm:$0xff] %vm510_vm0, %v4478_v37  ;;  %v4103_v40 = vadd.f32 1.0, %v6893_v56 }
 0x2ed   : > { %v6897_v10 = vpop.eup %6896  ;;  %4609 = vst.msk [vmem:[%s8074_s24 + $0x3a8] sm:$0xff] %vm510_vm0, %v4481_v39  ;;  %v4102_v11 = vadd.f32 1.0, %v6895_v47 }
 0x2ee   : > { %v6899_v0 = vpop.eup %6898  ;;  %v4480_v4 = vmul.f32 %v6897_v10, %v8829_v54  ;;  %6914 = vrcp.f32 %v4103_v40 }
 0x2ef   : > { %v6901_v18 = vpop.eup %6900  ;;  %v4483_v27 = vmul.f32 %v6899_v0, %v8835_v34  ;;  %6916 = vrcp.f32 %v4102_v11 }
 0x2f0   : > { %v6903_v21 = vpop.eup %6902  ;;  %4608 = vst.msk [vmem:[%s8074_s24 + $0x3a0] sm:$0xff] %vm510_vm0, %v4480_v4  ;;  %v4105_v9 = vadd.f32 1.0, %v6901_v18 }
 0x2f1   : > { %v6905_v32 = vpop.eup %6904  ;;  %4611 = vst.msk [vmem:[%s8074_s24 + $0x3b8] sm:$0xff] %vm510_vm0, %v4483_v27  ;;  %v4482_v61 = vmul.f32 %v6903_v21, %v8840_v2 }
 0x2f2   : > { %v6907_v62 = vpop.eup %6906  ;;  %6918 = vrcp.f32 %v4105_v9  ;;  %v4104_v24 = vadd.f32 1.0, %v6905_v32 }
 0x2f3   : > { %v6909_v54 = vpop.eup %6908  ;;  %4610 = vst.msk [vmem:[%s8074_s24 + $0x3b0] sm:$0xff] %vm510_vm0, %v4482_v61  ;;  %v4107_v34 = vadd.f32 1.0, %v6907_v62 }
 0x2f4   : > { %v6911_v30 = vpop.eup %6910  ;;  %6920 = vrcp.f32 %v4104_v24  ;;  %v4106_v59 = vadd.f32 1.0, %v6909_v54 }
 0x2f5   : > { %v6913_v60 = vpop.eup %6912  ;;  %v4485_v41 = vmul.f32 %v6911_v30, %v8852_v31  ;;  %6922 = vrcp.f32 %v4107_v34 }
 0x2f6   : > { %v4484_v2 = vmul.f32 %v6913_v60, %v8857_v42  ;;  %6924 = vrcp.f32 %v4106_v59 }
 0x2f7   : > { %4613 = vst.msk [vmem:[%s8074_s24 + $0x3c8] sm:$0xff] %vm510_vm0, %v4485_v41 }
 0x2f8   : > { %v6915_v26 = vpop.eup %6914  ;;  %4612 = vst.msk [vmem:[%s8074_s24 + $0x3c0] sm:$0xff] %vm510_vm0, %v4484_v2 }
 0x2f9   : > { %v6917_v20 = vpop.eup %6916  ;;  %v4487_v36 = vmul.f32 %v6915_v26, %v8866_v35 }
 0x2fa   : > { %v4486_v25 = vmul.f32 %v6917_v20, %v8870_v12 }
 0x2fb   : > { %4615 = vst.msk [vmem:[%s8074_s24 + $0x3d8] sm:$0xff] %vm510_vm0, %v4487_v36 }
 0x2fc   : > { %v6919_v31 = vpop.eup %6918  ;;  %4614 = vst.msk [vmem:[%s8074_s24 + $0x3d0] sm:$0xff] %vm510_vm0, %v4486_v25 }
 0x2fd   : > { %v4489_v42 = vmul.f32 %v6919_v31, %v8878_v16 }
 0x2fe   : > { %v6921_v53 = vpop.eup %6920 }
 0x2ff   : > { %v6923_v51 = vpop.eup %6922  ;;  %4617 = vst.msk [vmem:[%s8074_s24 + $0x3e8] sm:$0xff] %vm510_vm0, %v4489_v42  ;;  %v4488_v49 = vmul.f32 %v6921_v53, %v8885_v46 }
 0x300   : > { %v6925_v58 = vpop.eup %6924  ;;  %v4491_v33 = vmul.f32 %v6923_v51, %v8896_v3 }
 0x301   : > { %4616 = vst.msk [vmem:[%s8074_s24 + $0x3e0] sm:$0xff] %vm510_vm0, %v4488_v49  ;;  %v4490_v35 = vmul.f32 %v6925_v58, %v8899_v1 }
 0x302   : > { %4619 = vst.msk [vmem:[%s8074_s24 + $0x3f8] sm:$0xff] %vm510_vm0, %v4491_v33 }
 0x303   : > { %4618 = vst.msk [vmem:[%s8074_s24 + $0x3f0] sm:$0xff] %vm510_vm0, %v4490_v35 }
 0x304 PF: > { %s15_s18 = sadd.s32 1, %s6934_s18  }
 0x305   : > { %p12_p4 = scmp.ge.s32.totalorder %s15_s18, 5  }
 0x307   :  { %14 = sbr.rel (!%p12_p4) target bundleno = 1 (0x1), region = 73 }

</bundles_post_ra>
